<compile_context>
chip_gen: v7x
topology: tpu7x:2x2x1
jax: 0.10.0
libtpu: 0.0.40
codegen_flags: <defaults>
</compile_context>

<pallas_src>
import jax
import jax.numpy as jnp
from jax.experimental import pallas as pl
from jax.experimental.pallas import tpu as pltpu

EPS = 1e-5
N_STEPS = 16      # fixed by the architecture: H goes 2 -> 4 -> 8 -> 16
N_PITCHES = 84    # fixed by the architecture: W goes 1 -> 7 -> 84
PITCH_PAD = 128   # lane-dense padding of the output slab (sliced back to 84 outside)

# Row blocks of the last VMEM stage accumulate the convT kernel indices MSB-first,
# i.e. block b (of size block_b) holds the batch rows of time-step bitreverse4(b).
_H_OF_BLOCK = tuple(int(format(b, "04b")[::-1], 2) for b in range(N_STEPS))


# --------------------------------------------------------------------------
# Fused kernel: fc + BN + ReLU, 4x ConvT(2,1)/(1,7) + BN + ReLU, ConvT(1,12) + tanh
# --------------------------------------------------------------------------
def _make_fused_kernel(compute_dtype):
    cdt = compute_dtype

    def kernel(x_ref,
               fc_w0, fc_w1, fc_s0, fc_s1,
               wi0, wi1, sh_i,
               w10, w11, sh_1,
               w20, w21, sh_2,
               w3, sh_3,
               w_out, sh_out,
               o_ref,
               x1, x2, x3, x4):
        bb = x_ref.shape[0]

        def mm(a, w_ref):
            # MXU matmul (bf16 or f32 operands) with f32 accumulation.
            return jnp.dot(a, w_ref[...], preferred_element_type=jnp.float32)

        def stage(a, w_ref, sh_ref):
            # f32 epilogue (shift-add + ReLU), cast to compute dtype at the store.
            return jnp.maximum(mm(a, w_ref) + sh_ref[...], 0.0).astype(cdt)

        # fc_1 + BatchNorm1d + ReLU.  Columns were permuted at trace time so the
        # torch reshape (B, hid_c) -> (B, hid_c//2, 2, 1) becomes two contiguous
        # row-block stores (h1 = 0, 1) into the convT_in input scratch.
        a = x_ref[...]
        x1[0 * bb:1 * bb, :] = stage(a, fc_w0, fc_s0)
        x1[1 * bb:2 * bb, :] = stage(a, fc_w1, fc_s1)

        # convT_in, kernel (2,1) == stride: row (n, h) -> rows (n, 2h + i), i = 0, 1.
        a = x1[...]
        x2[0 * bb:2 * bb, :] = stage(a, wi0, sh_i)
        x2[2 * bb:4 * bb, :] = stage(a, wi1, sh_i)

        # convT_1, kernel (2,1) == stride.
        a = x2[...]
        x3[0 * bb:4 * bb, :] = stage(a, w10, sh_1)
        x3[4 * bb:8 * bb, :] = stage(a, w11, sh_1)

        # convT_2, kernel (2,1) == stride.
        a = x3[...]
        x4[0 * bb:8 * bb, :] = stage(a, w20, sh_2)
        x4[8 * bb:16 * bb, :] = stage(a, w21, sh_2)

        # convT_3 (1,7) + convT_out (1,12) + tanh, chunked per time-step block so
        # the live f32 temporary is only (bb, 7*c4) and each output tile is written
        # directly (no monolithic intermediate, no extra VMEM->VMEM copy).
        # o_ref is (16, bb, 128) time-step major; every store is a full, aligned,
        # unmasked, lane-dense (bb, 128) tile write.
        for b in range(N_STEPS):
            ab = stage(x4[b * bb:(b + 1) * bb, :], w3, sh_3)
            yb = jnp.tanh(mm(ab, w_out) + sh_out[...])
            o_ref[_H_OF_BLOCK[b]] = yb.astype(o_ref.dtype)

    return kernel


# --------------------------------------------------------------------------
# Trace-time parameter preparation (BN folding + matmul re-layout)
# --------------------------------------------------------------------------
def _bn_fold(bn):
    s = bn["gamma"] * jax.lax.rsqrt(bn["rvar"] + EPS)
    t = bn["beta"] - bn["rmean"] * s
    return s, t


def _prepare_fused_params(params, hid_c, compute_dtype):
    """Fold inference BatchNorm into the weights and re-layout every
    ConvTranspose2d (kernel_size == stride, padding 0) as matmul matrices."""
    c2, c4 = hid_c // 2, hid_c // 4
    cdt = compute_dtype
    f32 = jnp.float32
    p = params

    # fc_1 + BatchNorm1d: columns permuted so column q = h1*c2 + c corresponds to
    # torch channel m = 2*c + h1 (the reshape to (B, c2, 2, 1)), then split by h1.
    s, t = _bn_fold(p["bn_first"])
    w = p["fc_w"].T * s[None, :]                       # (4z, hid_c)
    sh = p["fc_b"] * s + t                             # (hid_c,)
    q = jnp.arange(hid_c)
    m = 2 * (q % c2) + q // c2
    w, sh = w[:, m], sh[m]
    fc_w0, fc_w1 = w[:, :c2].astype(cdt), w[:, c2:].astype(cdt)
    fc_s0 = sh[:c2].reshape(1, c2).astype(f32)
    fc_s1 = sh[c2:].reshape(1, c2).astype(f32)

    def prep_convT_k2(wc, b, bn):                      # kernel (2, 1), stride (2, 1)
        s, t = _bn_fold(bn)
        w0 = (wc[:, :, 0, 0] * s[None, :]).astype(cdt)  # (Cin, Cout), kernel row i=0
        w1 = (wc[:, :, 1, 0] * s[None, :]).astype(cdt)  # kernel row i=1
        shv = (b * s + t).reshape(1, -1).astype(f32)
        return w0, w1, shv

    wi0, wi1, sh_i = prep_convT_k2(p["convT_in_w"], p["convT_in_b"], p["bn_in"])
    w10, w11, sh_1 = prep_convT_k2(p["convT_1_w"], p["convT_1_b"], p["bn_1"])
    w20, w21, sh_2 = prep_convT_k2(p["convT_2_w"], p["convT_2_b"], p["bn_2"])

    # convT_3: kernel (1, 7) -> one matmul whose columns are (w-major, channel-minor).
    s, t = _bn_fold(p["bn_3"])
    w3 = p["convT_3_w"][:, :, 0, :] * s[None, :, None]          # (c4, c4, 7)
    w3 = jnp.transpose(w3, (0, 2, 1)).reshape(c4, 7 * c4).astype(cdt)
    sh_3 = jnp.tile(p["convT_3_b"] * s + t, 7).reshape(1, 7 * c4).astype(f32)

    # convT_out: kernel (1, 12) -> block-diagonal (7*c4, 84) matmul, zero-padded to
    # 128 output lanes so the single HBM write is lane-dense / unmasked.
    wo = p["convT_out_w"][:, 0, 0, :]                            # (c4, 12)
    w_out = jnp.kron(jnp.eye(7, dtype=wo.dtype), wo)             # (7*c4, 84)
    w_out = jnp.pad(w_out, ((0, 0), (0, PITCH_PAD - N_PITCHES))).astype(cdt)
    sh_out = jnp.pad(jnp.full((1, N_PITCHES), p["convT_out_b"][0], dtype=f32),
                     ((0, 0), (0, PITCH_PAD - N_PITCHES)))

    return [fc_w0, fc_w1, fc_s0, fc_s1,
            wi0, wi1, sh_i,
            w10, w11, sh_1,
            w20, w21, sh_2,
            w3, sh_3,
            w_out, sh_out]


def _vmem_estimate(bb, zin, c2, c4, fused, compute_dtype, out_dtype):
    """Rough VMEM budget: scratch + (single-buffered) weights + in/out blocks."""
    act = jnp.dtype(compute_dtype).itemsize
    outw = jnp.dtype(out_dtype).itemsize
    scratch = bb * (2 * c2 + 4 * c2 + 8 * c4 + 16 * c4) * act
    weights = sum(int(a.size) * jnp.dtype(a.dtype).itemsize for a in fused)
    inp = 2 * bb * zin * act                        # double-buffered input block
    outb = 2 * N_STEPS * bb * PITCH_PAD * outw      # double-buffered output block
    live = 2 * bb * 7 * c4 * 4                      # chunked f32 temporaries
    return scratch + weights + inp + outb + live


# --------------------------------------------------------------------------
# Forward pass (single fused pallas_call)
# --------------------------------------------------------------------------
def bar_generator_forward(params, x, hid_c, *,
                          compute_dtype=jnp.bfloat16,
                          out_dtype=jnp.bfloat16,
                          block_b=None,
                          time_major_output=False,
                          vmem_limit_bytes=None):
    """Fused Pallas forward of BarGenerator: x (B, 4*z_dim) -> (B, 1, 1, 16, 84).

    block_b: batch rows per grid step.  Default 256 (good for v6e/v7x 256x256 MXU);
    use 128 on v5e.  It is clamped to the padded batch, so tiny batches stay tiny.
    For v7x megacore, choose block_b so that B / block_b >= 2.
    time_major_output=True returns the kernel's native (16, B_pad, 128) lane-dense
    slab and skips the extra HBM round trip of the slice/transpose relayout.
    """
    assert hid_c % 4 == 0
    B, zin = x.shape
    c2, c4 = hid_c // 2, hid_c // 4

    # Sublane alignment: 8 rows for f32 scratch, 16 for 16-bit packed scratch.
    align = 8 if jnp.dtype(compute_dtype).itemsize >= 4 else 16
    if block_b is None:
        block_b = 256                                 # v6e/v7x default; 128 on v5e
    bb = min(block_b, ((B + align - 1) // align) * align)
    bb = max(align, (bb // align) * align)

    b_pad = ((B + bb - 1) // bb) * bb
    nb = b_pad // bb

    x = x.astype(compute_dtype)
    if b_pad != B:
        x = jnp.pad(x, ((0, b_pad - B), (0, 0)))

    fused = _prepare_fused_params(params, hid_c, compute_dtype)

    if vmem_limit_bytes is None:
        est = _vmem_estimate(bb, zin, c2, c4, fused, compute_dtype, out_dtype)
        vmem_limit_bytes = min(128 << 20, max(32 << 20, int(1.5 * est) + (2 << 20)))

    def bcast_spec(a):
        # Grid-invariant weights/shifts: constant block index -> single-buffer them
        # (the default double buffer would only waste VMEM).
        idx_map = lambda i, _nd=a.ndim: (0,) * _nd
        try:
            return pl.BlockSpec(a.shape, idx_map, pipeline_mode=pl.Buffered(1))
        except (AttributeError, TypeError):
            return pl.BlockSpec(a.shape, idx_map)

    out = pl.pallas_call(
        _make_fused_kernel(compute_dtype),
        out_shape=jax.ShapeDtypeStruct((N_STEPS, b_pad, PITCH_PAD), out_dtype),
        grid=(nb,),
        in_specs=[pl.BlockSpec((bb, zin), lambda i: (i, 0))]
                 + [bcast_spec(a) for a in fused],
        out_specs=pl.BlockSpec((N_STEPS, bb, PITCH_PAD), lambda i: (0, i, 0)),
        scratch_shapes=[
            pltpu.VMEM((2 * bb, c2), compute_dtype),    # convT_in input rows
            pltpu.VMEM((4 * bb, c2), compute_dtype),    # convT_1 input rows
            pltpu.VMEM((8 * bb, c4), compute_dtype),    # convT_2 input rows
            pltpu.VMEM((16 * bb, c4), compute_dtype),   # convT_3 input rows
        ],
        compiler_params=pltpu.CompilerParams(
            dimension_semantics=("parallel",),          # megacore sharding on v7x
            vmem_limit_bytes=vmem_limit_bytes,
        ),
    )(x, *fused)

    if time_major_output:
        # Native layout: (16, B_pad, 128); consumer slices [:, :B, :84] lazily.
        return out

    # Module-compatible layout: (16, B_pad, 128) -> (B, 1, 1, 16, 84).
    out = out[:, :B, :N_PITCHES].transpose(1, 0, 2)
    return out.reshape(B, 1, 1, N_STEPS, N_PITCHES)


# --------------------------------------------------------------------------
# Independent float32 reference (mirrors the PyTorch module, inference BN)
# --------------------------------------------------------------------------
def reference_forward(params, x):
    p = params
    B = x.shape[0]

    def bn(v, q, axis):
        shape = [1] * v.ndim
        shape[axis] = -1
        s = q["gamma"] * jax.lax.rsqrt(q["rvar"] + EPS)
        t = q["beta"] - q["rmean"] * s
        return v * s.reshape(shape) + t.reshape(shape)

    def convT(v, w, b):
        # ConvTranspose2d with kernel_size == stride, padding 0 (NCHW / IOHW).
        _, cout, kh, kw = w.shape
        n, _, h, ww = v.shape
        o = jnp.einsum("nchw,cdij->ndhiwj", v, w).reshape(n, cout, h * kh, ww * kw)
        return o + b.reshape(1, cout, 1, 1)

    h = x @ p["fc_w"].T + p["fc_b"]
    h = jnp.maximum(bn(h, p["bn_first"], 1), 0.0)
    h = h.reshape(B, -1, 2, 1)
    h = jnp.maximum(bn(convT(h, p["convT_in_w"], p["convT_in_b"]), p["bn_in"], 1), 0.0)
    h = jnp.maximum(bn(convT(h, p["convT_1_w"], p["convT_1_b"]), p["bn_1"], 1), 0.0)
    h = jnp.maximum(bn(convT(h, p["convT_2_w"], p["convT_2_b"]), p["bn_2"], 1), 0.0)
    h = jnp.maximum(bn(convT(h, p["convT_3_w"], p["convT_3_b"]), p["bn_3"], 1), 0.0)
    h = jnp.tanh(convT(h, p["convT_out_w"], p["convT_out_b"]))
    return h.reshape(B, 1, 1, N_STEPS, N_PITCHES)


# --------------------------------------------------------------------------
# Deterministic synthetic parameters
# --------------------------------------------------------------------------
def init_params(key, z_dim, hid_c):
    c2, c4 = hid_c // 2, hid_c // 4
    ks = iter(jax.random.split(key, 40))

    def nrm(shape, std=0.05):
        return std * jax.random.normal(next(ks), shape, dtype=jnp.float32)

    def bn(c):
        return dict(gamma=1.0 + nrm((c,), 0.1), beta=nrm((c,), 0.1),
                    rmean=nrm((c,), 0.05), rvar=1.0 + jnp.abs(nrm((c,), 0.1)))

    return dict(
        fc_w=nrm((hid_c, 4 * z_dim)), fc_b=nrm((hid_c,)), bn_first=bn(hid_c),
        convT_in_w=nrm((c2, c2, 2, 1)), convT_in_b=nrm((c2,)), bn_in=bn(c2),
        convT_1_w=nrm((c2, c4, 2, 1)), convT_1_b=nrm((c4,)), bn_1=bn(c4),
        convT_2_w=nrm((c4, c4, 2, 1)), convT_2_b=nrm((c4,)), bn_2=bn(c4),
        convT_3_w=nrm((c4, c4, 1, 7)), convT_3_b=nrm((c4,)), bn_3=bn(c4),
        convT_out_w=nrm((c4, 1, 1, 12)), convT_out_b=nrm((1,)),
    )


# --------------------------------------------------------------------------
if __name__ == "__main__":
    # Small config consistent with the module (real defaults: z_dim=32, hid_c=1024).
    z_dim, hid_c, batch = 8, 128, 4

    key = jax.random.PRNGKey(0)
    pkey, xkey = jax.random.split(key)
    params = init_params(pkey, z_dim, hid_c)
    x = jax.random.normal(xkey, (batch, 4 * z_dim), dtype=jnp.float32)

    # Optimized path: bf16 MXU operands, bf16 scratch, bf16 output slab.
    fwd_bf16 = jax.jit(lambda p, v: bar_generator_forward(p, v, hid_c))
    # f32 path for a tight numerical check against the reference.
    fwd_f32 = jax.jit(lambda p, v: bar_generator_forward(
        p, v, hid_c, compute_dtype=jnp.float32, out_dtype=jnp.float32))

    out = jax.block_until_ready(fwd_bf16(params, x))
    out_f32 = jax.block_until_ready(fwd_f32(params, x))
    ref = reference_forward(params, x)

    assert out.shape == (batch, 1, 1, N_STEPS, N_PITCHES), out.shape
    assert out_f32.shape == (batch, 1, 1, N_STEPS, N_PITCHES), out_f32.shape
    err_f32 = float(jnp.max(jnp.abs(out_f32 - ref)))
    err_bf16 = float(jnp.max(jnp.abs(out.astype(jnp.float32) - ref)))
    assert err_f32 < 5e-3, f"f32 Pallas vs reference mismatch: {err_f32}"
    assert err_bf16 < 5e-2, f"bf16 Pallas vs reference mismatch: {err_bf16}"
    print("KERNEL_OK")
</pallas_src>

<mosaic_0001>
module attributes {stable_mosaic.version = 11 : i64} {
  func.func @kernel(%arg0: i32, %arg1: memref<16x32xbf16, #tpu.memory_space<vmem>>, %arg2: memref<32x64xbf16, #tpu.memory_space<vmem>>, %arg3: memref<32x64xbf16, #tpu.memory_space<vmem>>, %arg4: memref<1x64xf32, #tpu.memory_space<vmem>>, %arg5: memref<1x64xf32, #tpu.memory_space<vmem>>, %arg6: memref<64x64xbf16, #tpu.memory_space<vmem>>, %arg7: memref<64x64xbf16, #tpu.memory_space<vmem>>, %arg8: memref<1x64xf32, #tpu.memory_space<vmem>>, %arg9: memref<64x32xbf16, #tpu.memory_space<vmem>>, %arg10: memref<64x32xbf16, #tpu.memory_space<vmem>>, %arg11: memref<1x32xf32, #tpu.memory_space<vmem>>, %arg12: memref<32x32xbf16, #tpu.memory_space<vmem>>, %arg13: memref<32x32xbf16, #tpu.memory_space<vmem>>, %arg14: memref<1x32xf32, #tpu.memory_space<vmem>>, %arg15: memref<32x224xbf16, #tpu.memory_space<vmem>>, %arg16: memref<1x224xf32, #tpu.memory_space<vmem>>, %arg17: memref<224x128xbf16, #tpu.memory_space<vmem>>, %arg18: memref<1x128xf32, #tpu.memory_space<vmem>>, %arg19: memref<16x16x128xbf16, #tpu.memory_space<vmem>>, %arg20: memref<32x64xbf16, #tpu.memory_space<vmem>>, %arg21: memref<64x64xbf16, #tpu.memory_space<vmem>>, %arg22: memref<128x32xbf16, #tpu.memory_space<vmem>>, %arg23: memref<256x32xbf16, #tpu.memory_space<vmem>>) attributes {dimension_semantics = [#tpu.dimension_semantics<parallel>], iteration_bounds = array<i64: 1>, scalar_prefetch = 0 : i64, scratch_operands = 4 : i64, tpu.core_type = #tpu.core_type<tc>, window_params = [{transform_indices = @transform_0, window_bounds = array<i64: 16, 32>}, {pipeline_mode = #tpu.pipeline_mode<synchronous>, transform_indices = @transform_1, window_bounds = array<i64: 32, 64>}, {pipeline_mode = #tpu.pipeline_mode<synchronous>, transform_indices = @transform_2, window_bounds = array<i64: 32, 64>}, {pipeline_mode = #tpu.pipeline_mode<synchronous>, transform_indices = @transform_3, window_bounds = array<i64: 1, 64>}, {pipeline_mode = #tpu.pipeline_mode<synchronous>, transform_indices = @transform_4, window_bounds = array<i64: 1, 64>}, {pipeline_mode = #tpu.pipeline_mode<synchronous>, transform_indices = @transform_5, window_bounds = array<i64: 64, 64>}, {pipeline_mode = #tpu.pipeline_mode<synchronous>, transform_indices = @transform_6, window_bounds = array<i64: 64, 64>}, {pipeline_mode = #tpu.pipeline_mode<synchronous>, transform_indices = @transform_7, window_bounds = array<i64: 1, 64>}, {pipeline_mode = #tpu.pipeline_mode<synchronous>, transform_indices = @transform_8, window_bounds = array<i64: 64, 32>}, {pipeline_mode = #tpu.pipeline_mode<synchronous>, transform_indices = @transform_9, window_bounds = array<i64: 64, 32>}, {pipeline_mode = #tpu.pipeline_mode<synchronous>, transform_indices = @transform_10, window_bounds = array<i64: 1, 32>}, {pipeline_mode = #tpu.pipeline_mode<synchronous>, transform_indices = @transform_11, window_bounds = array<i64: 32, 32>}, {pipeline_mode = #tpu.pipeline_mode<synchronous>, transform_indices = @transform_12, window_bounds = array<i64: 32, 32>}, {pipeline_mode = #tpu.pipeline_mode<synchronous>, transform_indices = @transform_13, window_bounds = array<i64: 1, 32>}, {pipeline_mode = #tpu.pipeline_mode<synchronous>, transform_indices = @transform_14, window_bounds = array<i64: 32, 224>}, {pipeline_mode = #tpu.pipeline_mode<synchronous>, transform_indices = @transform_15, window_bounds = array<i64: 1, 224>}, {pipeline_mode = #tpu.pipeline_mode<synchronous>, transform_indices = @transform_16, window_bounds = array<i64: 224, 128>}, {pipeline_mode = #tpu.pipeline_mode<synchronous>, transform_indices = @transform_17, window_bounds = array<i64: 1, 128>}, {transform_indices = @transform_18, window_bounds = array<i64: 16, 16, 128>}]} {
    %c0 = arith.constant 0 : index
    %c0_0 = arith.constant 0 : index
    %0 = vector.load %arg1[%c0, %c0_0] : memref<16x32xbf16, #tpu.memory_space<vmem>>, vector<16x32xbf16>
    %c0_1 = arith.constant 0 : index
    %c0_2 = arith.constant 0 : index
    %1 = vector.load %arg2[%c0_1, %c0_2] : memref<32x64xbf16, #tpu.memory_space<vmem>>, vector<32x64xbf16>
    %cst = arith.constant dense<0.000000e+00> : vector<16x64xf32>
    %2 = tpu.matmul %0, %1, %cst {dimension_numbers = #tpu.dot_dimension_numbers<[1], [0], [0], [1], [0, 0, 1, 1], [], []>} : vector<16x32xbf16>, vector<32x64xbf16>, vector<16x64xf32> -> vector<16x64xf32>
    %c0_3 = arith.constant 0 : index
    %c0_4 = arith.constant 0 : index
    %3 = vector.load %arg4[%c0_3, %c0_4] : memref<1x64xf32, #tpu.memory_space<vmem>>, vector<1x64xf32>
    %4 = vector.broadcast %3 : vector<1x64xf32> to vector<16x64xf32>
    %5 = arith.addf %2, %4 : vector<16x64xf32>
    %cst_5 = arith.constant 0.000000e+00 : f32
    %6 = vector.broadcast %cst_5 : f32 to vector<16x64xf32>
    %7 = arith.maximumf %5, %6 : vector<16x64xf32>
    %8 = arith.truncf %7 : vector<16x64xf32> to vector<16x64xbf16>
    %c0_6 = arith.constant 0 : index
    %c0_7 = arith.constant 0 : index
    %9 = vector.load %arg20[%c0_6, %c0_7] : memref<32x64xbf16, #tpu.memory_space<vmem>>, vector<16x64xbf16>
    tpu.vector_store %arg20[%c0_6, %c0_7], %8 {strides = array<i32>} : memref<32x64xbf16, #tpu.memory_space<vmem>>, vector<16x64xbf16>,
    %c0_8 = arith.constant 0 : index
    %c0_9 = arith.constant 0 : index
    %10 = vector.load %arg3[%c0_8, %c0_9] : memref<32x64xbf16, #tpu.memory_space<vmem>>, vector<32x64xbf16>
    %cst_10 = arith.constant dense<0.000000e+00> : vector<16x64xf32>
    %11 = tpu.matmul %0, %10, %cst_10 {dimension_numbers = #tpu.dot_dimension_numbers<[1], [0], [0], [1], [0, 0, 1, 1], [], []>} : vector<16x32xbf16>, vector<32x64xbf16>, vector<16x64xf32> -> vector<16x64xf32>
    %c0_11 = arith.constant 0 : index
    %c0_12 = arith.constant 0 : index
    %12 = vector.load %arg5[%c0_11, %c0_12] : memref<1x64xf32, #tpu.memory_space<vmem>>, vector<1x64xf32>
    %13 = vector.broadcast %12 : vector<1x64xf32> to vector<16x64xf32>
    %14 = arith.addf %11, %13 : vector<16x64xf32>
    %cst_13 = arith.constant 0.000000e+00 : f32
    %15 = vector.broadcast %cst_13 : f32 to vector<16x64xf32>
    %16 = arith.maximumf %14, %15 : vector<16x64xf32>
    %17 = arith.truncf %16 : vector<16x64xf32> to vector<16x64xbf16>
    %c16 = arith.constant 16 : index
    %c0_14 = arith.constant 0 : index
    %18 = vector.load %arg20[%c16, %c0_14] : memref<32x64xbf16, #tpu.memory_space<vmem>>, vector<16x64xbf16>
    tpu.vector_store %arg20[%c16, %c0_14], %17 {strides = array<i32>} : memref<32x64xbf16, #tpu.memory_space<vmem>>, vector<16x64xbf16>,
    %c0_15 = arith.constant 0 : index
    %c0_16 = arith.constant 0 : index
    %19 = vector.load %arg20[%c0_15, %c0_16] : memref<32x64xbf16, #tpu.memory_space<vmem>>, vector<32x64xbf16>
    %c0_17 = arith.constant 0 : index
    %c0_18 = arith.constant 0 : index
    %20 = vector.load %arg6[%c0_17, %c0_18] : memref<64x64xbf16, #tpu.memory_space<vmem>>, vector<64x64xbf16>
    %cst_19 = arith.constant dense<0.000000e+00> : vector<32x64xf32>
    %21 = tpu.matmul %19, %20, %cst_19 {dimension_numbers = #tpu.dot_dimension_numbers<[1], [0], [0], [1], [0, 0, 1, 1], [], []>} : vector<32x64xbf16>, vector<64x64xbf16>, vector<32x64xf32> -> vector<32x64xf32>
    %c0_20 = arith.constant 0 : index
    %c0_21 = arith.constant 0 : index
    %22 = vector.load %arg8[%c0_20, %c0_21] : memref<1x64xf32, #tpu.memory_space<vmem>>, vector<1x64xf32>
    %23 = vector.broadcast %22 : vector<1x64xf32> to vector<32x64xf32>
    %24 = arith.addf %21, %23 : vector<32x64xf32>
    %cst_22 = arith.constant 0.000000e+00 : f32
    %25 = vector.broadcast %cst_22 : f32 to vector<32x64xf32>
    %26 = arith.maximumf %24, %25 : vector<32x64xf32>
    %27 = arith.truncf %26 : vector<32x64xf32> to vector<32x64xbf16>
    %c0_23 = arith.constant 0 : index
    %c0_24 = arith.constant 0 : index
    %28 = vector.load %arg21[%c0_23, %c0_24] : memref<64x64xbf16, #tpu.memory_space<vmem>>, vector<32x64xbf16>
    tpu.vector_store %arg21[%c0_23, %c0_24], %27 {strides = array<i32>} : memref<64x64xbf16, #tpu.memory_space<vmem>>, vector<32x64xbf16>,
    %c0_25 = arith.constant 0 : index
    %c0_26 = arith.constant 0 : index
    %29 = vector.load %arg7[%c0_25, %c0_26] : memref<64x64xbf16, #tpu.memory_space<vmem>>, vector<64x64xbf16>
    %cst_27 = arith.constant dense<0.000000e+00> : vector<32x64xf32>
    %30 = tpu.matmul %19, %29, %cst_27 {dimension_numbers = #tpu.dot_dimension_numbers<[1], [0], [0], [1], [0, 0, 1, 1], [], []>} : vector<32x64xbf16>, vector<64x64xbf16>, vector<32x64xf32> -> vector<32x64xf32>
    %c0_28 = arith.constant 0 : index
    %c0_29 = arith.constant 0 : index
    %31 = vector.load %arg8[%c0_28, %c0_29] : memref<1x64xf32, #tpu.memory_space<vmem>>, vector<1x64xf32>
    %32 = vector.broadcast %31 : vector<1x64xf32> to vector<32x64xf32>
    %33 = arith.addf %30, %32 : vector<32x64xf32>
    %cst_30 = arith.constant 0.000000e+00 : f32
    %34 = vector.broadcast %cst_30 : f32 to vector<32x64xf32>
    %35 = arith.maximumf %33, %34 : vector<32x64xf32>
    %36 = arith.truncf %35 : vector<32x64xf32> to vector<32x64xbf16>
    %c32 = arith.constant 32 : index
    %c0_31 = arith.constant 0 : index
    %37 = vector.load %arg21[%c32, %c0_31] : memref<64x64xbf16, #tpu.memory_space<vmem>>, vector<32x64xbf16>
    tpu.vector_store %arg21[%c32, %c0_31], %36 {strides = array<i32>} : memref<64x64xbf16, #tpu.memory_space<vmem>>, vector<32x64xbf16>,
    %c0_32 = arith.constant 0 : index
    %c0_33 = arith.constant 0 : index
    %38 = vector.load %arg21[%c0_32, %c0_33] : memref<64x64xbf16, #tpu.memory_space<vmem>>, vector<64x64xbf16>
    %c0_34 = arith.constant 0 : index
    %c0_35 = arith.constant 0 : index
    %39 = vector.load %arg9[%c0_34, %c0_35] : memref<64x32xbf16, #tpu.memory_space<vmem>>, vector<64x32xbf16>
    %cst_36 = arith.constant dense<0.000000e+00> : vector<64x32xf32>
    %40 = tpu.matmul %38, %39, %cst_36 {dimension_numbers = #tpu.dot_dimension_numbers<[1], [0], [0], [1], [0, 0, 1, 1], [], []>} : vector<64x64xbf16>, vector<64x32xbf16>, vector<64x32xf32> -> vector<64x32xf32>
    %c0_37 = arith.constant 0 : index
    %c0_38 = arith.constant 0 : index
    %41 = vector.load %arg11[%c0_37, %c0_38] : memref<1x32xf32, #tpu.memory_space<vmem>>, vector<1x32xf32>
    %42 = vector.broadcast %41 : vector<1x32xf32> to vector<64x32xf32>
    %43 = arith.addf %40, %42 : vector<64x32xf32>
    %cst_39 = arith.constant 0.000000e+00 : f32
    %44 = vector.broadcast %cst_39 : f32 to vector<64x32xf32>
    %45 = arith.maximumf %43, %44 : vector<64x32xf32>
    %46 = arith.truncf %45 : vector<64x32xf32> to vector<64x32xbf16>
    %c0_40 = arith.constant 0 : index
    %c0_41 = arith.constant 0 : index
    %47 = vector.load %arg22[%c0_40, %c0_41] : memref<128x32xbf16, #tpu.memory_space<vmem>>, vector<64x32xbf16>
    tpu.vector_store %arg22[%c0_40, %c0_41], %46 {strides = array<i32>} : memref<128x32xbf16, #tpu.memory_space<vmem>>, vector<64x32xbf16>,
    %c0_42 = arith.constant 0 : index
    %c0_43 = arith.constant 0 : index
    %48 = vector.load %arg10[%c0_42, %c0_43] : memref<64x32xbf16, #tpu.memory_space<vmem>>, vector<64x32xbf16>
    %cst_44 = arith.constant dense<0.000000e+00> : vector<64x32xf32>
    %49 = tpu.matmul %38, %48, %cst_44 {dimension_numbers = #tpu.dot_dimension_numbers<[1], [0], [0], [1], [0, 0, 1, 1], [], []>} : vector<64x64xbf16>, vector<64x32xbf16>, vector<64x32xf32> -> vector<64x32xf32>
    %c0_45 = arith.constant 0 : index
    %c0_46 = arith.constant 0 : index
    %50 = vector.load %arg11[%c0_45, %c0_46] : memref<1x32xf32, #tpu.memory_space<vmem>>, vector<1x32xf32>
    %51 = vector.broadcast %50 : vector<1x32xf32> to vector<64x32xf32>
    %52 = arith.addf %49, %51 : vector<64x32xf32>
    %cst_47 = arith.constant 0.000000e+00 : f32
    %53 = vector.broadcast %cst_47 : f32 to vector<64x32xf32>
    %54 = arith.maximumf %52, %53 : vector<64x32xf32>
    %55 = arith.truncf %54 : vector<64x32xf32> to vector<64x32xbf16>
    %c64 = arith.constant 64 : index
    %c0_48 = arith.constant 0 : index
    %56 = vector.load %arg22[%c64, %c0_48] : memref<128x32xbf16, #tpu.memory_space<vmem>>, vector<64x32xbf16>
    tpu.vector_store %arg22[%c64, %c0_48], %55 {strides = array<i32>} : memref<128x32xbf16, #tpu.memory_space<vmem>>, vector<64x32xbf16>,
    %c0_49 = arith.constant 0 : index
    %c0_50 = arith.constant 0 : index
    %57 = vector.load %arg22[%c0_49, %c0_50] : memref<128x32xbf16, #tpu.memory_space<vmem>>, vector<128x32xbf16>
    %c0_51 = arith.constant 0 : index
    %c0_52 = arith.constant 0 : index
    %58 = vector.load %arg12[%c0_51, %c0_52] : memref<32x32xbf16, #tpu.memory_space<vmem>>, vector<32x32xbf16>
    %cst_53 = arith.constant dense<0.000000e+00> : vector<128x32xf32>
    %59 = tpu.matmul %57, %58, %cst_53 {dimension_numbers = #tpu.dot_dimension_numbers<[1], [0], [0], [1], [0, 0, 1, 1], [], []>} : vector<128x32xbf16>, vector<32x32xbf16>, vector<128x32xf32> -> vector<128x32xf32>
    %c0_54 = arith.constant 0 : index
    %c0_55 = arith.constant 0 : index
    %60 = vector.load %arg14[%c0_54, %c0_55] : memref<1x32xf32, #tpu.memory_space<vmem>>, vector<1x32xf32>
    %61 = vector.broadcast %60 : vector<1x32xf32> to vector<128x32xf32>
    %62 = arith.addf %59, %61 : vector<128x32xf32>
    %cst_56 = arith.constant 0.000000e+00 : f32
    %63 = vector.broadcast %cst_56 : f32 to vector<128x32xf32>
    %64 = arith.maximumf %62, %63 : vector<128x32xf32>
    %65 = arith.truncf %64 : vector<128x32xf32> to vector<128x32xbf16>
    %c0_57 = arith.constant 0 : index
    %c0_58 = arith.constant 0 : index
    %66 = vector.load %arg23[%c0_57, %c0_58] : memref<256x32xbf16, #tpu.memory_space<vmem>>, vector<128x32xbf16>
    tpu.vector_store %arg23[%c0_57, %c0_58], %65 {strides = array<i32>} : memref<256x32xbf16, #tpu.memory_space<vmem>>, vector<128x32xbf16>,
    %c0_59 = arith.constant 0 : index
    %c0_60 = arith.constant 0 : index
    %67 = vector.load %arg13[%c0_59, %c0_60] : memref<32x32xbf16, #tpu.memory_space<vmem>>, vector<32x32xbf16>
    %cst_61 = arith.constant dense<0.000000e+00> : vector<128x32xf32>
    %68 = tpu.matmul %57, %67, %cst_61 {dimension_numbers = #tpu.dot_dimension_numbers<[1], [0], [0], [1], [0, 0, 1, 1], [], []>} : vector<128x32xbf16>, vector<32x32xbf16>, vector<128x32xf32> -> vector<128x32xf32>
    %c0_62 = arith.constant 0 : index
    %c0_63 = arith.constant 0 : index
    %69 = vector.load %arg14[%c0_62, %c0_63] : memref<1x32xf32, #tpu.memory_space<vmem>>, vector<1x32xf32>
    %70 = vector.broadcast %69 : vector<1x32xf32> to vector<128x32xf32>
    %71 = arith.addf %68, %70 : vector<128x32xf32>
    %cst_64 = arith.constant 0.000000e+00 : f32
    %72 = vector.broadcast %cst_64 : f32 to vector<128x32xf32>
    %73 = arith.maximumf %71, %72 : vector<128x32xf32>
    %74 = arith.truncf %73 : vector<128x32xf32> to vector<128x32xbf16>
    %c128 = arith.constant 128 : index
    %c0_65 = arith.constant 0 : index
    %75 = vector.load %arg23[%c128, %c0_65] : memref<256x32xbf16, #tpu.memory_space<vmem>>, vector<128x32xbf16>
    tpu.vector_store %arg23[%c128, %c0_65], %74 {strides = array<i32>} : memref<256x32xbf16, #tpu.memory_space<vmem>>, vector<128x32xbf16>,
    %c0_66 = arith.constant 0 : index
    %c0_67 = arith.constant 0 : index
    %76 = vector.load %arg23[%c0_66, %c0_67] : memref<256x32xbf16, #tpu.memory_space<vmem>>, vector<16x32xbf16>
    %c0_68 = arith.constant 0 : index
    %c0_69 = arith.constant 0 : index
    %77 = vector.load %arg15[%c0_68, %c0_69] : memref<32x224xbf16, #tpu.memory_space<vmem>>, vector<32x224xbf16>
    %cst_70 = arith.constant dense<0.000000e+00> : vector<16x224xf32>
    %78 = tpu.matmul %76, %77, %cst_70 {dimension_numbers = #tpu.dot_dimension_numbers<[1], [0], [0], [1], [0, 0, 1, 1], [], []>} : vector<16x32xbf16>, vector<32x224xbf16>, vector<16x224xf32> -> vector<16x224xf32>
    %c0_71 = arith.constant 0 : index
    %c0_72 = arith.constant 0 : index
    %79 = vector.load %arg16[%c0_71, %c0_72] : memref<1x224xf32, #tpu.memory_space<vmem>>, vector<1x224xf32>
    %80 = vector.broadcast %79 : vector<1x224xf32> to vector<16x224xf32>
    %81 = arith.addf %78, %80 : vector<16x224xf32>
    %cst_73 = arith.constant 0.000000e+00 : f32
    %82 = vector.broadcast %cst_73 : f32 to vector<16x224xf32>
    %83 = arith.maximumf %81, %82 : vector<16x224xf32>
    %84 = arith.truncf %83 : vector<16x224xf32> to vector<16x224xbf16>
    %c0_74 = arith.constant 0 : index
    %c0_75 = arith.constant 0 : index
    %85 = vector.load %arg17[%c0_74, %c0_75] : memref<224x128xbf16, #tpu.memory_space<vmem>>, vector<224x128xbf16>
    %cst_76 = arith.constant dense<0.000000e+00> : vector<16x128xf32>
    %86 = tpu.matmul %84, %85, %cst_76 {dimension_numbers = #tpu.dot_dimension_numbers<[1], [0], [0], [1], [0, 0, 1, 1], [], []>} : vector<16x224xbf16>, vector<224x128xbf16>, vector<16x128xf32> -> vector<16x128xf32>
    %c0_77 = arith.constant 0 : index
    %c0_78 = arith.constant 0 : index
    %87 = vector.load %arg18[%c0_77, %c0_78] : memref<1x128xf32, #tpu.memory_space<vmem>>, vector<1x128xf32>
    %88 = vector.broadcast %87 : vector<1x128xf32> to vector<16x128xf32>
    %89 = arith.addf %86, %88 : vector<16x128xf32>
    %90 = math.tanh %89 : vector<16x128xf32>
    %91 = arith.truncf %90 : vector<16x128xf32> to vector<16x128xbf16>
    %c0_79 = arith.constant 0 : index
    %c0_80 = arith.constant 0 : index
    %c0_81 = arith.constant 0 : index
    %92 = vector.load %arg19[%c0_79, %c0_80, %c0_81] : memref<16x16x128xbf16, #tpu.memory_space<vmem>>, vector<1x16x128xbf16>
    %93 = vector.shape_cast %92 : vector<1x16x128xbf16> to vector<16x128xbf16>
    %94 = vector.shape_cast %91 : vector<16x128xbf16> to vector<1x16x128xbf16>
    tpu.vector_store %arg19[%c0_79, %c0_80, %c0_81], %94 {strides = array<i32>} : memref<16x16x128xbf16, #tpu.memory_space<vmem>>, vector<1x16x128xbf16>,
    %c16_82 = arith.constant 16 : index
    %c0_83 = arith.constant 0 : index
    %95 = vector.load %arg23[%c16_82, %c0_83] : memref<256x32xbf16, #tpu.memory_space<vmem>>, vector<16x32xbf16>
    %c0_84 = arith.constant 0 : index
    %c0_85 = arith.constant 0 : index
    %96 = vector.load %arg15[%c0_84, %c0_85] : memref<32x224xbf16, #tpu.memory_space<vmem>>, vector<32x224xbf16>
    %cst_86 = arith.constant dense<0.000000e+00> : vector<16x224xf32>
    %97 = tpu.matmul %95, %96, %cst_86 {dimension_numbers = #tpu.dot_dimension_numbers<[1], [0], [0], [1], [0, 0, 1, 1], [], []>} : vector<16x32xbf16>, vector<32x224xbf16>, vector<16x224xf32> -> vector<16x224xf32>
    %c0_87 = arith.constant 0 : index
    %c0_88 = arith.constant 0 : index
    %98 = vector.load %arg16[%c0_87, %c0_88] : memref<1x224xf32, #tpu.memory_space<vmem>>, vector<1x224xf32>
    %99 = vector.broadcast %98 : vector<1x224xf32> to vector<16x224xf32>
    %100 = arith.addf %97, %99 : vector<16x224xf32>
    %cst_89 = arith.constant 0.000000e+00 : f32
    %101 = vector.broadcast %cst_89 : f32 to vector<16x224xf32>
    %102 = arith.maximumf %100, %101 : vector<16x224xf32>
    %103 = arith.truncf %102 : vector<16x224xf32> to vector<16x224xbf16>
    %c0_90 = arith.constant 0 : index
    %c0_91 = arith.constant 0 : index
    %104 = vector.load %arg17[%c0_90, %c0_91] : memref<224x128xbf16, #tpu.memory_space<vmem>>, vector<224x128xbf16>
    %cst_92 = arith.constant dense<0.000000e+00> : vector<16x128xf32>
    %105 = tpu.matmul %103, %104, %cst_92 {dimension_numbers = #tpu.dot_dimension_numbers<[1], [0], [0], [1], [0, 0, 1, 1], [], []>} : vector<16x224xbf16>, vector<224x128xbf16>, vector<16x128xf32> -> vector<16x128xf32>
    %c0_93 = arith.constant 0 : index
    %c0_94 = arith.constant 0 : index
    %106 = vector.load %arg18[%c0_93, %c0_94] : memref<1x128xf32, #tpu.memory_space<vmem>>, vector<1x128xf32>
    %107 = vector.broadcast %106 : vector<1x128xf32> to vector<16x128xf32>
    %108 = arith.addf %105, %107 : vector<16x128xf32>
    %109 = math.tanh %108 : vector<16x128xf32>
    %110 = arith.truncf %109 : vector<16x128xf32> to vector<16x128xbf16>
    %c8 = arith.constant 8 : index
    %c0_95 = arith.constant 0 : index
    %c0_96 = arith.constant 0 : index
    %111 = vector.load %arg19[%c8, %c0_95, %c0_96] : memref<16x16x128xbf16, #tpu.memory_space<vmem>>, vector<1x16x128xbf16>
    %112 = vector.shape_cast %111 : vector<1x16x128xbf16> to vector<16x128xbf16>
    %113 = vector.shape_cast %110 : vector<16x128xbf16> to vector<1x16x128xbf16>
    tpu.vector_store %arg19[%c8, %c0_95, %c0_96], %113 {strides = array<i32>} : memref<16x16x128xbf16, #tpu.memory_space<vmem>>, vector<1x16x128xbf16>,
    %c32_97 = arith.constant 32 : index
    %c0_98 = arith.constant 0 : index
    %114 = vector.load %arg23[%c32_97, %c0_98] : memref<256x32xbf16, #tpu.memory_space<vmem>>, vector<16x32xbf16>
    %c0_99 = arith.constant 0 : index
    %c0_100 = arith.constant 0 : index
    %115 = vector.load %arg15[%c0_99, %c0_100] : memref<32x224xbf16, #tpu.memory_space<vmem>>, vector<32x224xbf16>
    %cst_101 = arith.constant dense<0.000000e+00> : vector<16x224xf32>
    %116 = tpu.matmul %114, %115, %cst_101 {dimension_numbers = #tpu.dot_dimension_numbers<[1], [0], [0], [1], [0, 0, 1, 1], [], []>} : vector<16x32xbf16>, vector<32x224xbf16>, vector<16x224xf32> -> vector<16x224xf32>
    %c0_102 = arith.constant 0 : index
    %c0_103 = arith.constant 0 : index
    %117 = vector.load %arg16[%c0_102, %c0_103] : memref<1x224xf32, #tpu.memory_space<vmem>>, vector<1x224xf32>
    %118 = vector.broadcast %117 : vector<1x224xf32> to vector<16x224xf32>
    %119 = arith.addf %116, %118 : vector<16x224xf32>
    %cst_104 = arith.constant 0.000000e+00 : f32
    %120 = vector.broadcast %cst_104 : f32 to vector<16x224xf32>
    %121 = arith.maximumf %119, %120 : vector<16x224xf32>
    %122 = arith.truncf %121 : vector<16x224xf32> to vector<16x224xbf16>
    %c0_105 = arith.constant 0 : index
    %c0_106 = arith.constant 0 : index
    %123 = vector.load %arg17[%c0_105, %c0_106] : memref<224x128xbf16, #tpu.memory_space<vmem>>, vector<224x128xbf16>
    %cst_107 = arith.constant dense<0.000000e+00> : vector<16x128xf32>
    %124 = tpu.matmul %122, %123, %cst_107 {dimension_numbers = #tpu.dot_dimension_numbers<[1], [0], [0], [1], [0, 0, 1, 1], [], []>} : vector<16x224xbf16>, vector<224x128xbf16>, vector<16x128xf32> -> vector<16x128xf32>
    %c0_108 = arith.constant 0 : index
    %c0_109 = arith.constant 0 : index
    %125 = vector.load %arg18[%c0_108, %c0_109] : memref<1x128xf32, #tpu.memory_space<vmem>>, vector<1x128xf32>
    %126 = vector.broadcast %125 : vector<1x128xf32> to vector<16x128xf32>
    %127 = arith.addf %124, %126 : vector<16x128xf32>
    %128 = math.tanh %127 : vector<16x128xf32>
    %129 = arith.truncf %128 : vector<16x128xf32> to vector<16x128xbf16>
    %c4 = arith.constant 4 : index
    %c0_110 = arith.constant 0 : index
    %c0_111 = arith.constant 0 : index
    %130 = vector.load %arg19[%c4, %c0_110, %c0_111] : memref<16x16x128xbf16, #tpu.memory_space<vmem>>, vector<1x16x128xbf16>
    %131 = vector.shape_cast %130 : vector<1x16x128xbf16> to vector<16x128xbf16>
    %132 = vector.shape_cast %129 : vector<16x128xbf16> to vector<1x16x128xbf16>
    tpu.vector_store %arg19[%c4, %c0_110, %c0_111], %132 {strides = array<i32>} : memref<16x16x128xbf16, #tpu.memory_space<vmem>>, vector<1x16x128xbf16>,
    %c48 = arith.constant 48 : index
    %c0_112 = arith.constant 0 : index
    %133 = vector.load %arg23[%c48, %c0_112] : memref<256x32xbf16, #tpu.memory_space<vmem>>, vector<16x32xbf16>
    %c0_113 = arith.constant 0 : index
    %c0_114 = arith.constant 0 : index
    %134 = vector.load %arg15[%c0_113, %c0_114] : memref<32x224xbf16, #tpu.memory_space<vmem>>, vector<32x224xbf16>
    %cst_115 = arith.constant dense<0.000000e+00> : vector<16x224xf32>
    %135 = tpu.matmul %133, %134, %cst_115 {dimension_numbers = #tpu.dot_dimension_numbers<[1], [0], [0], [1], [0, 0, 1, 1], [], []>} : vector<16x32xbf16>, vector<32x224xbf16>, vector<16x224xf32> -> vector<16x224xf32>
    %c0_116 = arith.constant 0 : index
    %c0_117 = arith.constant 0 : index
    %136 = vector.load %arg16[%c0_116, %c0_117] : memref<1x224xf32, #tpu.memory_space<vmem>>, vector<1x224xf32>
    %137 = vector.broadcast %136 : vector<1x224xf32> to vector<16x224xf32>
    %138 = arith.addf %135, %137 : vector<16x224xf32>
    %cst_118 = arith.constant 0.000000e+00 : f32
    %139 = vector.broadcast %cst_118 : f32 to vector<16x224xf32>
    %140 = arith.maximumf %138, %139 : vector<16x224xf32>
    %141 = arith.truncf %140 : vector<16x224xf32> to vector<16x224xbf16>
    %c0_119 = arith.constant 0 : index
    %c0_120 = arith.constant 0 : index
    %142 = vector.load %arg17[%c0_119, %c0_120] : memref<224x128xbf16, #tpu.memory_space<vmem>>, vector<224x128xbf16>
    %cst_121 = arith.constant dense<0.000000e+00> : vector<16x128xf32>
    %143 = tpu.matmul %141, %142, %cst_121 {dimension_numbers = #tpu.dot_dimension_numbers<[1], [0], [0], [1], [0, 0, 1, 1], [], []>} : vector<16x224xbf16>, vector<224x128xbf16>, vector<16x128xf32> -> vector<16x128xf32>
    %c0_122 = arith.constant 0 : index
    %c0_123 = arith.constant 0 : index
    %144 = vector.load %arg18[%c0_122, %c0_123] : memref<1x128xf32, #tpu.memory_space<vmem>>, vector<1x128xf32>
    %145 = vector.broadcast %144 : vector<1x128xf32> to vector<16x128xf32>
    %146 = arith.addf %143, %145 : vector<16x128xf32>
    %147 = math.tanh %146 : vector<16x128xf32>
    %148 = arith.truncf %147 : vector<16x128xf32> to vector<16x128xbf16>
    %c12 = arith.constant 12 : index
    %c0_124 = arith.constant 0 : index
    %c0_125 = arith.constant 0 : index
    %149 = vector.load %arg19[%c12, %c0_124, %c0_125] : memref<16x16x128xbf16, #tpu.memory_space<vmem>>, vector<1x16x128xbf16>
    %150 = vector.shape_cast %149 : vector<1x16x128xbf16> to vector<16x128xbf16>
    %151 = vector.shape_cast %148 : vector<16x128xbf16> to vector<1x16x128xbf16>
    tpu.vector_store %arg19[%c12, %c0_124, %c0_125], %151 {strides = array<i32>} : memref<16x16x128xbf16, #tpu.memory_space<vmem>>, vector<1x16x128xbf16>,
    %c64_126 = arith.constant 64 : index
    %c0_127 = arith.constant 0 : index
    %152 = vector.load %arg23[%c64_126, %c0_127] : memref<256x32xbf16, #tpu.memory_space<vmem>>, vector<16x32xbf16>
    %c0_128 = arith.constant 0 : index
    %c0_129 = arith.constant 0 : index
    %153 = vector.load %arg15[%c0_128, %c0_129] : memref<32x224xbf16, #tpu.memory_space<vmem>>, vector<32x224xbf16>
    %cst_130 = arith.constant dense<0.000000e+00> : vector<16x224xf32>
    %154 = tpu.matmul %152, %153, %cst_130 {dimension_numbers = #tpu.dot_dimension_numbers<[1], [0], [0], [1], [0, 0, 1, 1], [], []>} : vector<16x32xbf16>, vector<32x224xbf16>, vector<16x224xf32> -> vector<16x224xf32>
    %c0_131 = arith.constant 0 : index
    %c0_132 = arith.constant 0 : index
    %155 = vector.load %arg16[%c0_131, %c0_132] : memref<1x224xf32, #tpu.memory_space<vmem>>, vector<1x224xf32>
    %156 = vector.broadcast %155 : vector<1x224xf32> to vector<16x224xf32>
    %157 = arith.addf %154, %156 : vector<16x224xf32>
    %cst_133 = arith.constant 0.000000e+00 : f32
    %158 = vector.broadcast %cst_133 : f32 to vector<16x224xf32>
    %159 = arith.maximumf %157, %158 : vector<16x224xf32>
    %160 = arith.truncf %159 : vector<16x224xf32> to vector<16x224xbf16>
    %c0_134 = arith.constant 0 : index
    %c0_135 = arith.constant 0 : index
    %161 = vector.load %arg17[%c0_134, %c0_135] : memref<224x128xbf16, #tpu.memory_space<vmem>>, vector<224x128xbf16>
    %cst_136 = arith.constant dense<0.000000e+00> : vector<16x128xf32>
    %162 = tpu.matmul %160, %161, %cst_136 {dimension_numbers = #tpu.dot_dimension_numbers<[1], [0], [0], [1], [0, 0, 1, 1], [], []>} : vector<16x224xbf16>, vector<224x128xbf16>, vector<16x128xf32> -> vector<16x128xf32>
    %c0_137 = arith.constant 0 : index
    %c0_138 = arith.constant 0 : index
    %163 = vector.load %arg18[%c0_137, %c0_138] : memref<1x128xf32, #tpu.memory_space<vmem>>, vector<1x128xf32>
    %164 = vector.broadcast %163 : vector<1x128xf32> to vector<16x128xf32>
    %165 = arith.addf %162, %164 : vector<16x128xf32>
    %166 = math.tanh %165 : vector<16x128xf32>
    %167 = arith.truncf %166 : vector<16x128xf32> to vector<16x128xbf16>
    %c2 = arith.constant 2 : index
    %c0_139 = arith.constant 0 : index
    %c0_140 = arith.constant 0 : index
    %168 = vector.load %arg19[%c2, %c0_139, %c0_140] : memref<16x16x128xbf16, #tpu.memory_space<vmem>>, vector<1x16x128xbf16>
    %169 = vector.shape_cast %168 : vector<1x16x128xbf16> to vector<16x128xbf16>
    %170 = vector.shape_cast %167 : vector<16x128xbf16> to vector<1x16x128xbf16>
    tpu.vector_store %arg19[%c2, %c0_139, %c0_140], %170 {strides = array<i32>} : memref<16x16x128xbf16, #tpu.memory_space<vmem>>, vector<1x16x128xbf16>,
    %c80 = arith.constant 80 : index
    %c0_141 = arith.constant 0 : index
    %171 = vector.load %arg23[%c80, %c0_141] : memref<256x32xbf16, #tpu.memory_space<vmem>>, vector<16x32xbf16>
    %c0_142 = arith.constant 0 : index
    %c0_143 = arith.constant 0 : index
    %172 = vector.load %arg15[%c0_142, %c0_143] : memref<32x224xbf16, #tpu.memory_space<vmem>>, vector<32x224xbf16>
    %cst_144 = arith.constant dense<0.000000e+00> : vector<16x224xf32>
    %173 = tpu.matmul %171, %172, %cst_144 {dimension_numbers = #tpu.dot_dimension_numbers<[1], [0], [0], [1], [0, 0, 1, 1], [], []>} : vector<16x32xbf16>, vector<32x224xbf16>, vector<16x224xf32> -> vector<16x224xf32>
    %c0_145 = arith.constant 0 : index
    %c0_146 = arith.constant 0 : index
    %174 = vector.load %arg16[%c0_145, %c0_146] : memref<1x224xf32, #tpu.memory_space<vmem>>, vector<1x224xf32>
    %175 = vector.broadcast %174 : vector<1x224xf32> to vector<16x224xf32>
    %176 = arith.addf %173, %175 : vector<16x224xf32>
    %cst_147 = arith.constant 0.000000e+00 : f32
    %177 = vector.broadcast %cst_147 : f32 to vector<16x224xf32>
    %178 = arith.maximumf %176, %177 : vector<16x224xf32>
    %179 = arith.truncf %178 : vector<16x224xf32> to vector<16x224xbf16>
    %c0_148 = arith.constant 0 : index
    %c0_149 = arith.constant 0 : index
    %180 = vector.load %arg17[%c0_148, %c0_149] : memref<224x128xbf16, #tpu.memory_space<vmem>>, vector<224x128xbf16>
    %cst_150 = arith.constant dense<0.000000e+00> : vector<16x128xf32>
    %181 = tpu.matmul %179, %180, %cst_150 {dimension_numbers = #tpu.dot_dimension_numbers<[1], [0], [0], [1], [0, 0, 1, 1], [], []>} : vector<16x224xbf16>, vector<224x128xbf16>, vector<16x128xf32> -> vector<16x128xf32>
    %c0_151 = arith.constant 0 : index
    %c0_152 = arith.constant 0 : index
    %182 = vector.load %arg18[%c0_151, %c0_152] : memref<1x128xf32, #tpu.memory_space<vmem>>, vector<1x128xf32>
    %183 = vector.broadcast %182 : vector<1x128xf32> to vector<16x128xf32>
    %184 = arith.addf %181, %183 : vector<16x128xf32>
    %185 = math.tanh %184 : vector<16x128xf32>
    %186 = arith.truncf %185 : vector<16x128xf32> to vector<16x128xbf16>
    %c10 = arith.constant 10 : index
    %c0_153 = arith.constant 0 : index
    %c0_154 = arith.constant 0 : index
    %187 = vector.load %arg19[%c10, %c0_153, %c0_154] : memref<16x16x128xbf16, #tpu.memory_space<vmem>>, vector<1x16x128xbf16>
    %188 = vector.shape_cast %187 : vector<1x16x128xbf16> to vector<16x128xbf16>
    %189 = vector.shape_cast %186 : vector<16x128xbf16> to vector<1x16x128xbf16>
    tpu.vector_store %arg19[%c10, %c0_153, %c0_154], %189 {strides = array<i32>} : memref<16x16x128xbf16, #tpu.memory_space<vmem>>, vector<1x16x128xbf16>,
    %c96 = arith.constant 96 : index
    %c0_155 = arith.constant 0 : index
    %190 = vector.load %arg23[%c96, %c0_155] : memref<256x32xbf16, #tpu.memory_space<vmem>>, vector<16x32xbf16>
    %c0_156 = arith.constant 0 : index
    %c0_157 = arith.constant 0 : index
    %191 = vector.load %arg15[%c0_156, %c0_157] : memref<32x224xbf16, #tpu.memory_space<vmem>>, vector<32x224xbf16>
    %cst_158 = arith.constant dense<0.000000e+00> : vector<16x224xf32>
    %192 = tpu.matmul %190, %191, %cst_158 {dimension_numbers = #tpu.dot_dimension_numbers<[1], [0], [0], [1], [0, 0, 1, 1], [], []>} : vector<16x32xbf16>, vector<32x224xbf16>, vector<16x224xf32> -> vector<16x224xf32>
    %c0_159 = arith.constant 0 : index
    %c0_160 = arith.constant 0 : index
    %193 = vector.load %arg16[%c0_159, %c0_160] : memref<1x224xf32, #tpu.memory_space<vmem>>, vector<1x224xf32>
    %194 = vector.broadcast %193 : vector<1x224xf32> to vector<16x224xf32>
    %195 = arith.addf %192, %194 : vector<16x224xf32>
    %cst_161 = arith.constant 0.000000e+00 : f32
    %196 = vector.broadcast %cst_161 : f32 to vector<16x224xf32>
    %197 = arith.maximumf %195, %196 : vector<16x224xf32>
    %198 = arith.truncf %197 : vector<16x224xf32> to vector<16x224xbf16>
    %c0_162 = arith.constant 0 : index
    %c0_163 = arith.constant 0 : index
    %199 = vector.load %arg17[%c0_162, %c0_163] : memref<224x128xbf16, #tpu.memory_space<vmem>>, vector<224x128xbf16>
    %cst_164 = arith.constant dense<0.000000e+00> : vector<16x128xf32>
    %200 = tpu.matmul %198, %199, %cst_164 {dimension_numbers = #tpu.dot_dimension_numbers<[1], [0], [0], [1], [0, 0, 1, 1], [], []>} : vector<16x224xbf16>, vector<224x128xbf16>, vector<16x128xf32> -> vector<16x128xf32>
    %c0_165 = arith.constant 0 : index
    %c0_166 = arith.constant 0 : index
    %201 = vector.load %arg18[%c0_165, %c0_166] : memref<1x128xf32, #tpu.memory_space<vmem>>, vector<1x128xf32>
    %202 = vector.broadcast %201 : vector<1x128xf32> to vector<16x128xf32>
    %203 = arith.addf %200, %202 : vector<16x128xf32>
    %204 = math.tanh %203 : vector<16x128xf32>
    %205 = arith.truncf %204 : vector<16x128xf32> to vector<16x128xbf16>
    %c6 = arith.constant 6 : index
    %c0_167 = arith.constant 0 : index
    %c0_168 = arith.constant 0 : index
    %206 = vector.load %arg19[%c6, %c0_167, %c0_168] : memref<16x16x128xbf16, #tpu.memory_space<vmem>>, vector<1x16x128xbf16>
    %207 = vector.shape_cast %206 : vector<1x16x128xbf16> to vector<16x128xbf16>
    %208 = vector.shape_cast %205 : vector<16x128xbf16> to vector<1x16x128xbf16>
    tpu.vector_store %arg19[%c6, %c0_167, %c0_168], %208 {strides = array<i32>} : memref<16x16x128xbf16, #tpu.memory_space<vmem>>, vector<1x16x128xbf16>,
    %c112 = arith.constant 112 : index
    %c0_169 = arith.constant 0 : index
    %209 = vector.load %arg23[%c112, %c0_169] : memref<256x32xbf16, #tpu.memory_space<vmem>>, vector<16x32xbf16>
    %c0_170 = arith.constant 0 : index
    %c0_171 = arith.constant 0 : index
    %210 = vector.load %arg15[%c0_170, %c0_171] : memref<32x224xbf16, #tpu.memory_space<vmem>>, vector<32x224xbf16>
    %cst_172 = arith.constant dense<0.000000e+00> : vector<16x224xf32>
    %211 = tpu.matmul %209, %210, %cst_172 {dimension_numbers = #tpu.dot_dimension_numbers<[1], [0], [0], [1], [0, 0, 1, 1], [], []>} : vector<16x32xbf16>, vector<32x224xbf16>, vector<16x224xf32> -> vector<16x224xf32>
    %c0_173 = arith.constant 0 : index
    %c0_174 = arith.constant 0 : index
    %212 = vector.load %arg16[%c0_173, %c0_174] : memref<1x224xf32, #tpu.memory_space<vmem>>, vector<1x224xf32>
    %213 = vector.broadcast %212 : vector<1x224xf32> to vector<16x224xf32>
    %214 = arith.addf %211, %213 : vector<16x224xf32>
    %cst_175 = arith.constant 0.000000e+00 : f32
    %215 = vector.broadcast %cst_175 : f32 to vector<16x224xf32>
    %216 = arith.maximumf %214, %215 : vector<16x224xf32>
    %217 = arith.truncf %216 : vector<16x224xf32> to vector<16x224xbf16>
    %c0_176 = arith.constant 0 : index
    %c0_177 = arith.constant 0 : index
    %218 = vector.load %arg17[%c0_176, %c0_177] : memref<224x128xbf16, #tpu.memory_space<vmem>>, vector<224x128xbf16>
    %cst_178 = arith.constant dense<0.000000e+00> : vector<16x128xf32>
    %219 = tpu.matmul %217, %218, %cst_178 {dimension_numbers = #tpu.dot_dimension_numbers<[1], [0], [0], [1], [0, 0, 1, 1], [], []>} : vector<16x224xbf16>, vector<224x128xbf16>, vector<16x128xf32> -> vector<16x128xf32>
    %c0_179 = arith.constant 0 : index
    %c0_180 = arith.constant 0 : index
    %220 = vector.load %arg18[%c0_179, %c0_180] : memref<1x128xf32, #tpu.memory_space<vmem>>, vector<1x128xf32>
    %221 = vector.broadcast %220 : vector<1x128xf32> to vector<16x128xf32>
    %222 = arith.addf %219, %221 : vector<16x128xf32>
    %223 = math.tanh %222 : vector<16x128xf32>
    %224 = arith.truncf %223 : vector<16x128xf32> to vector<16x128xbf16>
    %c14 = arith.constant 14 : index
    %c0_181 = arith.constant 0 : index
    %c0_182 = arith.constant 0 : index
    %225 = vector.load %arg19[%c14, %c0_181, %c0_182] : memref<16x16x128xbf16, #tpu.memory_space<vmem>>, vector<1x16x128xbf16>
    %226 = vector.shape_cast %225 : vector<1x16x128xbf16> to vector<16x128xbf16>
    %227 = vector.shape_cast %224 : vector<16x128xbf16> to vector<1x16x128xbf16>
    tpu.vector_store %arg19[%c14, %c0_181, %c0_182], %227 {strides = array<i32>} : memref<16x16x128xbf16, #tpu.memory_space<vmem>>, vector<1x16x128xbf16>,
    %c128_183 = arith.constant 128 : index
    %c0_184 = arith.constant 0 : index
    %228 = vector.load %arg23[%c128_183, %c0_184] : memref<256x32xbf16, #tpu.memory_space<vmem>>, vector<16x32xbf16>
    %c0_185 = arith.constant 0 : index
    %c0_186 = arith.constant 0 : index
    %229 = vector.load %arg15[%c0_185, %c0_186] : memref<32x224xbf16, #tpu.memory_space<vmem>>, vector<32x224xbf16>
    %cst_187 = arith.constant dense<0.000000e+00> : vector<16x224xf32>
    %230 = tpu.matmul %228, %229, %cst_187 {dimension_numbers = #tpu.dot_dimension_numbers<[1], [0], [0], [1], [0, 0, 1, 1], [], []>} : vector<16x32xbf16>, vector<32x224xbf16>, vector<16x224xf32> -> vector<16x224xf32>
    %c0_188 = arith.constant 0 : index
    %c0_189 = arith.constant 0 : index
    %231 = vector.load %arg16[%c0_188, %c0_189] : memref<1x224xf32, #tpu.memory_space<vmem>>, vector<1x224xf32>
    %232 = vector.broadcast %231 : vector<1x224xf32> to vector<16x224xf32>
    %233 = arith.addf %230, %232 : vector<16x224xf32>
    %cst_190 = arith.constant 0.000000e+00 : f32
    %234 = vector.broadcast %cst_190 : f32 to vector<16x224xf32>
    %235 = arith.maximumf %233, %234 : vector<16x224xf32>
    %236 = arith.truncf %235 : vector<16x224xf32> to vector<16x224xbf16>
    %c0_191 = arith.constant 0 : index
    %c0_192 = arith.constant 0 : index
    %237 = vector.load %arg17[%c0_191, %c0_192] : memref<224x128xbf16, #tpu.memory_space<vmem>>, vector<224x128xbf16>
    %cst_193 = arith.constant dense<0.000000e+00> : vector<16x128xf32>
    %238 = tpu.matmul %236, %237, %cst_193 {dimension_numbers = #tpu.dot_dimension_numbers<[1], [0], [0], [1], [0, 0, 1, 1], [], []>} : vector<16x224xbf16>, vector<224x128xbf16>, vector<16x128xf32> -> vector<16x128xf32>
    %c0_194 = arith.constant 0 : index
    %c0_195 = arith.constant 0 : index
    %239 = vector.load %arg18[%c0_194, %c0_195] : memref<1x128xf32, #tpu.memory_space<vmem>>, vector<1x128xf32>
    %240 = vector.broadcast %239 : vector<1x128xf32> to vector<16x128xf32>
    %241 = arith.addf %238, %240 : vector<16x128xf32>
    %242 = math.tanh %241 : vector<16x128xf32>
    %243 = arith.truncf %242 : vector<16x128xf32> to vector<16x128xbf16>
    %c1 = arith.constant 1 : index
    %c0_196 = arith.constant 0 : index
    %c0_197 = arith.constant 0 : index
    %244 = vector.load %arg19[%c1, %c0_196, %c0_197] : memref<16x16x128xbf16, #tpu.memory_space<vmem>>, vector<1x16x128xbf16>
    %245 = vector.shape_cast %244 : vector<1x16x128xbf16> to vector<16x128xbf16>
    %246 = vector.shape_cast %243 : vector<16x128xbf16> to vector<1x16x128xbf16>
    tpu.vector_store %arg19[%c1, %c0_196, %c0_197], %246 {strides = array<i32>} : memref<16x16x128xbf16, #tpu.memory_space<vmem>>, vector<1x16x128xbf16>,
    %c144 = arith.constant 144 : index
    %c0_198 = arith.constant 0 : index
    %247 = vector.load %arg23[%c144, %c0_198] : memref<256x32xbf16, #tpu.memory_space<vmem>>, vector<16x32xbf16>
    %c0_199 = arith.constant 0 : index
    %c0_200 = arith.constant 0 : index
    %248 = vector.load %arg15[%c0_199, %c0_200] : memref<32x224xbf16, #tpu.memory_space<vmem>>, vector<32x224xbf16>
    %cst_201 = arith.constant dense<0.000000e+00> : vector<16x224xf32>
    %249 = tpu.matmul %247, %248, %cst_201 {dimension_numbers = #tpu.dot_dimension_numbers<[1], [0], [0], [1], [0, 0, 1, 1], [], []>} : vector<16x32xbf16>, vector<32x224xbf16>, vector<16x224xf32> -> vector<16x224xf32>
    %c0_202 = arith.constant 0 : index
    %c0_203 = arith.constant 0 : index
    %250 = vector.load %arg16[%c0_202, %c0_203] : memref<1x224xf32, #tpu.memory_space<vmem>>, vector<1x224xf32>
    %251 = vector.broadcast %250 : vector<1x224xf32> to vector<16x224xf32>
    %252 = arith.addf %249, %251 : vector<16x224xf32>
    %cst_204 = arith.constant 0.000000e+00 : f32
    %253 = vector.broadcast %cst_204 : f32 to vector<16x224xf32>
    %254 = arith.maximumf %252, %253 : vector<16x224xf32>
    %255 = arith.truncf %254 : vector<16x224xf32> to vector<16x224xbf16>
    %c0_205 = arith.constant 0 : index
    %c0_206 = arith.constant 0 : index
    %256 = vector.load %arg17[%c0_205, %c0_206] : memref<224x128xbf16, #tpu.memory_space<vmem>>, vector<224x128xbf16>
    %cst_207 = arith.constant dense<0.000000e+00> : vector<16x128xf32>
    %257 = tpu.matmul %255, %256, %cst_207 {dimension_numbers = #tpu.dot_dimension_numbers<[1], [0], [0], [1], [0, 0, 1, 1], [], []>} : vector<16x224xbf16>, vector<224x128xbf16>, vector<16x128xf32> -> vector<16x128xf32>
    %c0_208 = arith.constant 0 : index
    %c0_209 = arith.constant 0 : index
    %258 = vector.load %arg18[%c0_208, %c0_209] : memref<1x128xf32, #tpu.memory_space<vmem>>, vector<1x128xf32>
    %259 = vector.broadcast %258 : vector<1x128xf32> to vector<16x128xf32>
    %260 = arith.addf %257, %259 : vector<16x128xf32>
    %261 = math.tanh %260 : vector<16x128xf32>
    %262 = arith.truncf %261 : vector<16x128xf32> to vector<16x128xbf16>
    %c9 = arith.constant 9 : index
    %c0_210 = arith.constant 0 : index
    %c0_211 = arith.constant 0 : index
    %263 = vector.load %arg19[%c9, %c0_210, %c0_211] : memref<16x16x128xbf16, #tpu.memory_space<vmem>>, vector<1x16x128xbf16>
    %264 = vector.shape_cast %263 : vector<1x16x128xbf16> to vector<16x128xbf16>
    %265 = vector.shape_cast %262 : vector<16x128xbf16> to vector<1x16x128xbf16>
    tpu.vector_store %arg19[%c9, %c0_210, %c0_211], %265 {strides = array<i32>} : memref<16x16x128xbf16, #tpu.memory_space<vmem>>, vector<1x16x128xbf16>,
    %c160 = arith.constant 160 : index
    %c0_212 = arith.constant 0 : index
    %266 = vector.load %arg23[%c160, %c0_212] : memref<256x32xbf16, #tpu.memory_space<vmem>>, vector<16x32xbf16>
    %c0_213 = arith.constant 0 : index
    %c0_214 = arith.constant 0 : index
    %267 = vector.load %arg15[%c0_213, %c0_214] : memref<32x224xbf16, #tpu.memory_space<vmem>>, vector<32x224xbf16>
    %cst_215 = arith.constant dense<0.000000e+00> : vector<16x224xf32>
    %268 = tpu.matmul %266, %267, %cst_215 {dimension_numbers = #tpu.dot_dimension_numbers<[1], [0], [0], [1], [0, 0, 1, 1], [], []>} : vector<16x32xbf16>, vector<32x224xbf16>, vector<16x224xf32> -> vector<16x224xf32>
    %c0_216 = arith.constant 0 : index
    %c0_217 = arith.constant 0 : index
    %269 = vector.load %arg16[%c0_216, %c0_217] : memref<1x224xf32, #tpu.memory_space<vmem>>, vector<1x224xf32>
    %270 = vector.broadcast %269 : vector<1x224xf32> to vector<16x224xf32>
    %271 = arith.addf %268, %270 : vector<16x224xf32>
    %cst_218 = arith.constant 0.000000e+00 : f32
    %272 = vector.broadcast %cst_218 : f32 to vector<16x224xf32>
    %273 = arith.maximumf %271, %272 : vector<16x224xf32>
    %274 = arith.truncf %273 : vector<16x224xf32> to vector<16x224xbf16>
    %c0_219 = arith.constant 0 : index
    %c0_220 = arith.constant 0 : index
    %275 = vector.load %arg17[%c0_219, %c0_220] : memref<224x128xbf16, #tpu.memory_space<vmem>>, vector<224x128xbf16>
    %cst_221 = arith.constant dense<0.000000e+00> : vector<16x128xf32>
    %276 = tpu.matmul %274, %275, %cst_221 {dimension_numbers = #tpu.dot_dimension_numbers<[1], [0], [0], [1], [0, 0, 1, 1], [], []>} : vector<16x224xbf16>, vector<224x128xbf16>, vector<16x128xf32> -> vector<16x128xf32>
    %c0_222 = arith.constant 0 : index
    %c0_223 = arith.constant 0 : index
    %277 = vector.load %arg18[%c0_222, %c0_223] : memref<1x128xf32, #tpu.memory_space<vmem>>, vector<1x128xf32>
    %278 = vector.broadcast %277 : vector<1x128xf32> to vector<16x128xf32>
    %279 = arith.addf %276, %278 : vector<16x128xf32>
    %280 = math.tanh %279 : vector<16x128xf32>
    %281 = arith.truncf %280 : vector<16x128xf32> to vector<16x128xbf16>
    %c5 = arith.constant 5 : index
    %c0_224 = arith.constant 0 : index
    %c0_225 = arith.constant 0 : index
    %282 = vector.load %arg19[%c5, %c0_224, %c0_225] : memref<16x16x128xbf16, #tpu.memory_space<vmem>>, vector<1x16x128xbf16>
    %283 = vector.shape_cast %282 : vector<1x16x128xbf16> to vector<16x128xbf16>
    %284 = vector.shape_cast %281 : vector<16x128xbf16> to vector<1x16x128xbf16>
    tpu.vector_store %arg19[%c5, %c0_224, %c0_225], %284 {strides = array<i32>} : memref<16x16x128xbf16, #tpu.memory_space<vmem>>, vector<1x16x128xbf16>,
    %c176 = arith.constant 176 : index
    %c0_226 = arith.constant 0 : index
    %285 = vector.load %arg23[%c176, %c0_226] : memref<256x32xbf16, #tpu.memory_space<vmem>>, vector<16x32xbf16>
    %c0_227 = arith.constant 0 : index
    %c0_228 = arith.constant 0 : index
    %286 = vector.load %arg15[%c0_227, %c0_228] : memref<32x224xbf16, #tpu.memory_space<vmem>>, vector<32x224xbf16>
    %cst_229 = arith.constant dense<0.000000e+00> : vector<16x224xf32>
    %287 = tpu.matmul %285, %286, %cst_229 {dimension_numbers = #tpu.dot_dimension_numbers<[1], [0], [0], [1], [0, 0, 1, 1], [], []>} : vector<16x32xbf16>, vector<32x224xbf16>, vector<16x224xf32> -> vector<16x224xf32>
    %c0_230 = arith.constant 0 : index
    %c0_231 = arith.constant 0 : index
    %288 = vector.load %arg16[%c0_230, %c0_231] : memref<1x224xf32, #tpu.memory_space<vmem>>, vector<1x224xf32>
    %289 = vector.broadcast %288 : vector<1x224xf32> to vector<16x224xf32>
    %290 = arith.addf %287, %289 : vector<16x224xf32>
    %cst_232 = arith.constant 0.000000e+00 : f32
    %291 = vector.broadcast %cst_232 : f32 to vector<16x224xf32>
    %292 = arith.maximumf %290, %291 : vector<16x224xf32>
    %293 = arith.truncf %292 : vector<16x224xf32> to vector<16x224xbf16>
    %c0_233 = arith.constant 0 : index
    %c0_234 = arith.constant 0 : index
    %294 = vector.load %arg17[%c0_233, %c0_234] : memref<224x128xbf16, #tpu.memory_space<vmem>>, vector<224x128xbf16>
    %cst_235 = arith.constant dense<0.000000e+00> : vector<16x128xf32>
    %295 = tpu.matmul %293, %294, %cst_235 {dimension_numbers = #tpu.dot_dimension_numbers<[1], [0], [0], [1], [0, 0, 1, 1], [], []>} : vector<16x224xbf16>, vector<224x128xbf16>, vector<16x128xf32> -> vector<16x128xf32>
    %c0_236 = arith.constant 0 : index
    %c0_237 = arith.constant 0 : index
    %296 = vector.load %arg18[%c0_236, %c0_237] : memref<1x128xf32, #tpu.memory_space<vmem>>, vector<1x128xf32>
    %297 = vector.broadcast %296 : vector<1x128xf32> to vector<16x128xf32>
    %298 = arith.addf %295, %297 : vector<16x128xf32>
    %299 = math.tanh %298 : vector<16x128xf32>
    %300 = arith.truncf %299 : vector<16x128xf32> to vector<16x128xbf16>
    %c13 = arith.constant 13 : index
    %c0_238 = arith.constant 0 : index
    %c0_239 = arith.constant 0 : index
    %301 = vector.load %arg19[%c13, %c0_238, %c0_239] : memref<16x16x128xbf16, #tpu.memory_space<vmem>>, vector<1x16x128xbf16>
    %302 = vector.shape_cast %301 : vector<1x16x128xbf16> to vector<16x128xbf16>
    %303 = vector.shape_cast %300 : vector<16x128xbf16> to vector<1x16x128xbf16>
    tpu.vector_store %arg19[%c13, %c0_238, %c0_239], %303 {strides = array<i32>} : memref<16x16x128xbf16, #tpu.memory_space<vmem>>, vector<1x16x128xbf16>,
    %c192 = arith.constant 192 : index
    %c0_240 = arith.constant 0 : index
    %304 = vector.load %arg23[%c192, %c0_240] : memref<256x32xbf16, #tpu.memory_space<vmem>>, vector<16x32xbf16>
    %c0_241 = arith.constant 0 : index
    %c0_242 = arith.constant 0 : index
    %305 = vector.load %arg15[%c0_241, %c0_242] : memref<32x224xbf16, #tpu.memory_space<vmem>>, vector<32x224xbf16>
    %cst_243 = arith.constant dense<0.000000e+00> : vector<16x224xf32>
    %306 = tpu.matmul %304, %305, %cst_243 {dimension_numbers = #tpu.dot_dimension_numbers<[1], [0], [0], [1], [0, 0, 1, 1], [], []>} : vector<16x32xbf16>, vector<32x224xbf16>, vector<16x224xf32> -> vector<16x224xf32>
    %c0_244 = arith.constant 0 : index
    %c0_245 = arith.constant 0 : index
    %307 = vector.load %arg16[%c0_244, %c0_245] : memref<1x224xf32, #tpu.memory_space<vmem>>, vector<1x224xf32>
    %308 = vector.broadcast %307 : vector<1x224xf32> to vector<16x224xf32>
    %309 = arith.addf %306, %308 : vector<16x224xf32>
    %cst_246 = arith.constant 0.000000e+00 : f32
    %310 = vector.broadcast %cst_246 : f32 to vector<16x224xf32>
    %311 = arith.maximumf %309, %310 : vector<16x224xf32>
    %312 = arith.truncf %311 : vector<16x224xf32> to vector<16x224xbf16>
    %c0_247 = arith.constant 0 : index
    %c0_248 = arith.constant 0 : index
    %313 = vector.load %arg17[%c0_247, %c0_248] : memref<224x128xbf16, #tpu.memory_space<vmem>>, vector<224x128xbf16>
    %cst_249 = arith.constant dense<0.000000e+00> : vector<16x128xf32>
    %314 = tpu.matmul %312, %313, %cst_249 {dimension_numbers = #tpu.dot_dimension_numbers<[1], [0], [0], [1], [0, 0, 1, 1], [], []>} : vector<16x224xbf16>, vector<224x128xbf16>, vector<16x128xf32> -> vector<16x128xf32>
    %c0_250 = arith.constant 0 : index
    %c0_251 = arith.constant 0 : index
    %315 = vector.load %arg18[%c0_250, %c0_251] : memref<1x128xf32, #tpu.memory_space<vmem>>, vector<1x128xf32>
    %316 = vector.broadcast %315 : vector<1x128xf32> to vector<16x128xf32>
    %317 = arith.addf %314, %316 : vector<16x128xf32>
    %318 = math.tanh %317 : vector<16x128xf32>
    %319 = arith.truncf %318 : vector<16x128xf32> to vector<16x128xbf16>
    %c3 = arith.constant 3 : index
    %c0_252 = arith.constant 0 : index
    %c0_253 = arith.constant 0 : index
    %320 = vector.load %arg19[%c3, %c0_252, %c0_253] : memref<16x16x128xbf16, #tpu.memory_space<vmem>>, vector<1x16x128xbf16>
    %321 = vector.shape_cast %320 : vector<1x16x128xbf16> to vector<16x128xbf16>
    %322 = vector.shape_cast %319 : vector<16x128xbf16> to vector<1x16x128xbf16>
    tpu.vector_store %arg19[%c3, %c0_252, %c0_253], %322 {strides = array<i32>} : memref<16x16x128xbf16, #tpu.memory_space<vmem>>, vector<1x16x128xbf16>,
    %c208 = arith.constant 208 : index
    %c0_254 = arith.constant 0 : index
    %323 = vector.load %arg23[%c208, %c0_254] : memref<256x32xbf16, #tpu.memory_space<vmem>>, vector<16x32xbf16>
    %c0_255 = arith.constant 0 : index
    %c0_256 = arith.constant 0 : index
    %324 = vector.load %arg15[%c0_255, %c0_256] : memref<32x224xbf16, #tpu.memory_space<vmem>>, vector<32x224xbf16>
    %cst_257 = arith.constant dense<0.000000e+00> : vector<16x224xf32>
    %325 = tpu.matmul %323, %324, %cst_257 {dimension_numbers = #tpu.dot_dimension_numbers<[1], [0], [0], [1], [0, 0, 1, 1], [], []>} : vector<16x32xbf16>, vector<32x224xbf16>, vector<16x224xf32> -> vector<16x224xf32>
    %c0_258 = arith.constant 0 : index
    %c0_259 = arith.constant 0 : index
    %326 = vector.load %arg16[%c0_258, %c0_259] : memref<1x224xf32, #tpu.memory_space<vmem>>, vector<1x224xf32>
    %327 = vector.broadcast %326 : vector<1x224xf32> to vector<16x224xf32>
    %328 = arith.addf %325, %327 : vector<16x224xf32>
    %cst_260 = arith.constant 0.000000e+00 : f32
    %329 = vector.broadcast %cst_260 : f32 to vector<16x224xf32>
    %330 = arith.maximumf %328, %329 : vector<16x224xf32>
    %331 = arith.truncf %330 : vector<16x224xf32> to vector<16x224xbf16>
    %c0_261 = arith.constant 0 : index
    %c0_262 = arith.constant 0 : index
    %332 = vector.load %arg17[%c0_261, %c0_262] : memref<224x128xbf16, #tpu.memory_space<vmem>>, vector<224x128xbf16>
    %cst_263 = arith.constant dense<0.000000e+00> : vector<16x128xf32>
    %333 = tpu.matmul %331, %332, %cst_263 {dimension_numbers = #tpu.dot_dimension_numbers<[1], [0], [0], [1], [0, 0, 1, 1], [], []>} : vector<16x224xbf16>, vector<224x128xbf16>, vector<16x128xf32> -> vector<16x128xf32>
    %c0_264 = arith.constant 0 : index
    %c0_265 = arith.constant 0 : index
    %334 = vector.load %arg18[%c0_264, %c0_265] : memref<1x128xf32, #tpu.memory_space<vmem>>, vector<1x128xf32>
    %335 = vector.broadcast %334 : vector<1x128xf32> to vector<16x128xf32>
    %336 = arith.addf %333, %335 : vector<16x128xf32>
    %337 = math.tanh %336 : vector<16x128xf32>
    %338 = arith.truncf %337 : vector<16x128xf32> to vector<16x128xbf16>
    %c11 = arith.constant 11 : index
    %c0_266 = arith.constant 0 : index
    %c0_267 = arith.constant 0 : index
    %339 = vector.load %arg19[%c11, %c0_266, %c0_267] : memref<16x16x128xbf16, #tpu.memory_space<vmem>>, vector<1x16x128xbf16>
    %340 = vector.shape_cast %339 : vector<1x16x128xbf16> to vector<16x128xbf16>
    %341 = vector.shape_cast %338 : vector<16x128xbf16> to vector<1x16x128xbf16>
    tpu.vector_store %arg19[%c11, %c0_266, %c0_267], %341 {strides = array<i32>} : memref<16x16x128xbf16, #tpu.memory_space<vmem>>, vector<1x16x128xbf16>,
    %c224 = arith.constant 224 : index
    %c0_268 = arith.constant 0 : index
    %342 = vector.load %arg23[%c224, %c0_268] : memref<256x32xbf16, #tpu.memory_space<vmem>>, vector<16x32xbf16>
    %c0_269 = arith.constant 0 : index
    %c0_270 = arith.constant 0 : index
    %343 = vector.load %arg15[%c0_269, %c0_270] : memref<32x224xbf16, #tpu.memory_space<vmem>>, vector<32x224xbf16>
    %cst_271 = arith.constant dense<0.000000e+00> : vector<16x224xf32>
    %344 = tpu.matmul %342, %343, %cst_271 {dimension_numbers = #tpu.dot_dimension_numbers<[1], [0], [0], [1], [0, 0, 1, 1], [], []>} : vector<16x32xbf16>, vector<32x224xbf16>, vector<16x224xf32> -> vector<16x224xf32>
    %c0_272 = arith.constant 0 : index
    %c0_273 = arith.constant 0 : index
    %345 = vector.load %arg16[%c0_272, %c0_273] : memref<1x224xf32, #tpu.memory_space<vmem>>, vector<1x224xf32>
    %346 = vector.broadcast %345 : vector<1x224xf32> to vector<16x224xf32>
    %347 = arith.addf %344, %346 : vector<16x224xf32>
    %cst_274 = arith.constant 0.000000e+00 : f32
    %348 = vector.broadcast %cst_274 : f32 to vector<16x224xf32>
    %349 = arith.maximumf %347, %348 : vector<16x224xf32>
    %350 = arith.truncf %349 : vector<16x224xf32> to vector<16x224xbf16>
    %c0_275 = arith.constant 0 : index
    %c0_276 = arith.constant 0 : index
    %351 = vector.load %arg17[%c0_275, %c0_276] : memref<224x128xbf16, #tpu.memory_space<vmem>>, vector<224x128xbf16>
    %cst_277 = arith.constant dense<0.000000e+00> : vector<16x128xf32>
    %352 = tpu.matmul %350, %351, %cst_277 {dimension_numbers = #tpu.dot_dimension_numbers<[1], [0], [0], [1], [0, 0, 1, 1], [], []>} : vector<16x224xbf16>, vector<224x128xbf16>, vector<16x128xf32> -> vector<16x128xf32>
    %c0_278 = arith.constant 0 : index
    %c0_279 = arith.constant 0 : index
    %353 = vector.load %arg18[%c0_278, %c0_279] : memref<1x128xf32, #tpu.memory_space<vmem>>, vector<1x128xf32>
    %354 = vector.broadcast %353 : vector<1x128xf32> to vector<16x128xf32>
    %355 = arith.addf %352, %354 : vector<16x128xf32>
    %356 = math.tanh %355 : vector<16x128xf32>
    %357 = arith.truncf %356 : vector<16x128xf32> to vector<16x128xbf16>
    %c7 = arith.constant 7 : index
    %c0_280 = arith.constant 0 : index
    %c0_281 = arith.constant 0 : index
    %358 = vector.load %arg19[%c7, %c0_280, %c0_281] : memref<16x16x128xbf16, #tpu.memory_space<vmem>>, vector<1x16x128xbf16>
    %359 = vector.shape_cast %358 : vector<1x16x128xbf16> to vector<16x128xbf16>
    %360 = vector.shape_cast %357 : vector<16x128xbf16> to vector<1x16x128xbf16>
    tpu.vector_store %arg19[%c7, %c0_280, %c0_281], %360 {strides = array<i32>} : memref<16x16x128xbf16, #tpu.memory_space<vmem>>, vector<1x16x128xbf16>,
    %c240 = arith.constant 240 : index
    %c0_282 = arith.constant 0 : index
    %361 = vector.load %arg23[%c240, %c0_282] : memref<256x32xbf16, #tpu.memory_space<vmem>>, vector<16x32xbf16>
    %c0_283 = arith.constant 0 : index
    %c0_284 = arith.constant 0 : index
    %362 = vector.load %arg15[%c0_283, %c0_284] : memref<32x224xbf16, #tpu.memory_space<vmem>>, vector<32x224xbf16>
    %cst_285 = arith.constant dense<0.000000e+00> : vector<16x224xf32>
    %363 = tpu.matmul %361, %362, %cst_285 {dimension_numbers = #tpu.dot_dimension_numbers<[1], [0], [0], [1], [0, 0, 1, 1], [], []>} : vector<16x32xbf16>, vector<32x224xbf16>, vector<16x224xf32> -> vector<16x224xf32>
    %c0_286 = arith.constant 0 : index
    %c0_287 = arith.constant 0 : index
    %364 = vector.load %arg16[%c0_286, %c0_287] : memref<1x224xf32, #tpu.memory_space<vmem>>, vector<1x224xf32>
    %365 = vector.broadcast %364 : vector<1x224xf32> to vector<16x224xf32>
    %366 = arith.addf %363, %365 : vector<16x224xf32>
    %cst_288 = arith.constant 0.000000e+00 : f32
    %367 = vector.broadcast %cst_288 : f32 to vector<16x224xf32>
    %368 = arith.maximumf %366, %367 : vector<16x224xf32>
    %369 = arith.truncf %368 : vector<16x224xf32> to vector<16x224xbf16>
    %c0_289 = arith.constant 0 : index
    %c0_290 = arith.constant 0 : index
    %370 = vector.load %arg17[%c0_289, %c0_290] : memref<224x128xbf16, #tpu.memory_space<vmem>>, vector<224x128xbf16>
    %cst_291 = arith.constant dense<0.000000e+00> : vector<16x128xf32>
    %371 = tpu.matmul %369, %370, %cst_291 {dimension_numbers = #tpu.dot_dimension_numbers<[1], [0], [0], [1], [0, 0, 1, 1], [], []>} : vector<16x224xbf16>, vector<224x128xbf16>, vector<16x128xf32> -> vector<16x128xf32>
    %c0_292 = arith.constant 0 : index
    %c0_293 = arith.constant 0 : index
    %372 = vector.load %arg18[%c0_292, %c0_293] : memref<1x128xf32, #tpu.memory_space<vmem>>, vector<1x128xf32>
    %373 = vector.broadcast %372 : vector<1x128xf32> to vector<16x128xf32>
    %374 = arith.addf %371, %373 : vector<16x128xf32>
    %375 = math.tanh %374 : vector<16x128xf32>
    %376 = arith.truncf %375 : vector<16x128xf32> to vector<16x128xbf16>
    %c15 = arith.constant 15 : index
    %c0_294 = arith.constant 0 : index
    %c0_295 = arith.constant 0 : index
    %377 = vector.load %arg19[%c15, %c0_294, %c0_295] : memref<16x16x128xbf16, #tpu.memory_space<vmem>>, vector<1x16x128xbf16>
    %378 = vector.shape_cast %377 : vector<1x16x128xbf16> to vector<16x128xbf16>
    %379 = vector.shape_cast %376 : vector<16x128xbf16> to vector<1x16x128xbf16>
    tpu.vector_store %arg19[%c15, %c0_294, %c0_295], %379 {strides = array<i32>} : memref<16x16x128xbf16, #tpu.memory_space<vmem>>, vector<1x16x128xbf16>,
    return
  }
  func.func @transform_0(%arg0: i32) -> (i32, i32) {
    %c0_i32 = arith.constant 0 : i32
    %c0_i32_0 = arith.constant 0 : i32
    return %arg0, %c0_i32 : i32, i32
  }
  func.func @transform_1(%arg0: i32) -> (i32, i32) {
    %c0_i32 = arith.constant 0 : i32
    %c0_i32_0 = arith.constant 0 : i32
    %c0_i32_1 = arith.constant 0 : i32
    return %c0_i32, %c0_i32_0 : i32, i32
  }
  func.func @transform_2(%arg0: i32) -> (i32, i32) {
    %c0_i32 = arith.constant 0 : i32
    %c0_i32_0 = arith.constant 0 : i32
    %c0_i32_1 = arith.constant 0 : i32
    return %c0_i32, %c0_i32_0 : i32, i32
  }
  func.func @transform_3(%arg0: i32) -> (i32, i32) {
    %c0_i32 = arith.constant 0 : i32
    %c0_i32_0 = arith.constant 0 : i32
    %c0_i32_1 = arith.constant 0 : i32
    return %c0_i32, %c0_i32_0 : i32, i32
  }
  func.func @transform_4(%arg0: i32) -> (i32, i32) {
    %c0_i32 = arith.constant 0 : i32
    %c0_i32_0 = arith.constant 0 : i32
    %c0_i32_1 = arith.constant 0 : i32
    return %c0_i32, %c0_i32_0 : i32, i32
  }
  func.func @transform_5(%arg0: i32) -> (i32, i32) {
    %c0_i32 = arith.constant 0 : i32
    %c0_i32_0 = arith.constant 0 : i32
    %c0_i32_1 = arith.constant 0 : i32
    return %c0_i32, %c0_i32_0 : i32, i32
  }
  func.func @transform_6(%arg0: i32) -> (i32, i32) {
    %c0_i32 = arith.constant 0 : i32
    %c0_i32_0 = arith.constant 0 : i32
    %c0_i32_1 = arith.constant 0 : i32
    return %c0_i32, %c0_i32_0 : i32, i32
  }
  func.func @transform_7(%arg0: i32) -> (i32, i32) {
    %c0_i32 = arith.constant 0 : i32
    %c0_i32_0 = arith.constant 0 : i32
    %c0_i32_1 = arith.constant 0 : i32
    return %c0_i32, %c0_i32_0 : i32, i32
  }
  func.func @transform_8(%arg0: i32) -> (i32, i32) {
    %c0_i32 = arith.constant 0 : i32
    %c0_i32_0 = arith.constant 0 : i32
    %c0_i32_1 = arith.constant 0 : i32
    return %c0_i32, %c0_i32_0 : i32, i32
  }
  func.func @transform_9(%arg0: i32) -> (i32, i32) {
    %c0_i32 = arith.constant 0 : i32
    %c0_i32_0 = arith.constant 0 : i32
    %c0_i32_1 = arith.constant 0 : i32
    return %c0_i32, %c0_i32_0 : i32, i32
  }
  func.func @transform_10(%arg0: i32) -> (i32, i32) {
    %c0_i32 = arith.constant 0 : i32
    %c0_i32_0 = arith.constant 0 : i32
    %c0_i32_1 = arith.constant 0 : i32
    return %c0_i32, %c0_i32_0 : i32, i32
  }
  func.func @transform_11(%arg0: i32) -> (i32, i32) {
    %c0_i32 = arith.constant 0 : i32
    %c0_i32_0 = arith.constant 0 : i32
    %c0_i32_1 = arith.constant 0 : i32
    return %c0_i32, %c0_i32_0 : i32, i32
  }
  func.func @transform_12(%arg0: i32) -> (i32, i32) {
    %c0_i32 = arith.constant 0 : i32
    %c0_i32_0 = arith.constant 0 : i32
    %c0_i32_1 = arith.constant 0 : i32
    return %c0_i32, %c0_i32_0 : i32, i32
  }
  func.func @transform_13(%arg0: i32) -> (i32, i32) {
    %c0_i32 = arith.constant 0 : i32
    %c0_i32_0 = arith.constant 0 : i32
    %c0_i32_1 = arith.constant 0 : i32
    return %c0_i32, %c0_i32_0 : i32, i32
  }
  func.func @transform_14(%arg0: i32) -> (i32, i32) {
    %c0_i32 = arith.constant 0 : i32
    %c0_i32_0 = arith.constant 0 : i32
    %c0_i32_1 = arith.constant 0 : i32
    return %c0_i32, %c0_i32_0 : i32, i32
  }
  func.func @transform_15(%arg0: i32) -> (i32, i32) {
    %c0_i32 = arith.constant 0 : i32
    %c0_i32_0 = arith.constant 0 : i32
    %c0_i32_1 = arith.constant 0 : i32
    return %c0_i32, %c0_i32_0 : i32, i32
  }
  func.func @transform_16(%arg0: i32) -> (i32, i32) {
    %c0_i32 = arith.constant 0 : i32
    %c0_i32_0 = arith.constant 0 : i32
    %c0_i32_1 = arith.constant 0 : i32
    return %c0_i32, %c0_i32_0 : i32, i32
  }
  func.func @transform_17(%arg0: i32) -> (i32, i32) {
    %c0_i32 = arith.constant 0 : i32
    %c0_i32_0 = arith.constant 0 : i32
    %c0_i32_1 = arith.constant 0 : i32
    return %c0_i32, %c0_i32_0 : i32, i32
  }
  func.func @transform_18(%arg0: i32) -> (i32, i32, i32) {
    %c0_i32 = arith.constant 0 : i32
    %c0_i32_0 = arith.constant 0 : i32
    %c0_i32_1 = arith.constant 0 : i32
    return %c0_i32, %arg0, %c0_i32_0 : i32, i32, i32
  }
}

</mosaic_0001>

<bundles_post_ra>
// kernel: tile.8
= control target key start
LH: loop header
LB: loop body
LE: loop exit
PB: predicated region body
PF: predicated region fallthrough
CT: control target
= control target key end

     0   :  { %s22_s0 = inlined_call_operand.vmem [shape: f32[32], index: 0, kind: input, shape index: {}]   ;;  %s23_s1 = inlined_call_operand.vmem [shape: f32[7,32], index: 1, kind: output, shape index: {}]  }
   0x1   :  { %v4_v0 = vld [vmem:[%s22_s0] ss:$0 sm:$0xff] }
   0x2   :  { %5 = vst [vmem:[%s23_s1] sm:$0xff] %v4_v0 }

// kernel: tile.9
= control target key start
LH: loop header
LB: loop body
LE: loop exit
PB: predicated region body
PF: predicated region fallthrough
CT: control target
= control target key end

     0   :  { %s13_s8 = smov 3  ;;  %s44_s9 = smov 96   ;;  %vm4_vm0 = vcmask 261120   ;;  %vm10_vm1 = vcmask 1048320   ;;  %vm17_vm2 = vcmask 785920   ;;  %vm24_vm3 = vcmask 523520   ;;  %s75_s0 = inlined_call_operand.vmem [shape: f32[7,32], index: 0, kind: input, shape index: {}]   ;;  %s76_s1 = inlined_call_operand.vmem [shape: f32[1,224], index: 1, kind: output, shape index: {}]  }
   0x1   :  { %v37_v0 = vld [vmem:[%s75_s0 + $0x3] sm:$0x1]   ;;  %s20_s10 = smov 3  ;;  %v38_v1 = vld [vmem:[%s75_s0 + $0x2] ss:$4 sm:%s13_s8]   ;;  %s2_s15 = smov 3 }
   0x2   :  { %8 = vrot.lane.b32.xlu0 %v37_v0, %s44_s9  ;;  %v39_v2 = vld [vmem:[%s75_s0 + $0x1] ss:$4 sm:%s20_s10]   ;;  %s45_s16 = smov 32  }
   0x3   :  { %22 = vrot.lane.b32.xlu1 %v39_v2, %s45_s16  ;;  %v3_v3 = vld [vmem:[%s75_s0] ss:$4 sm:%s2_s15]   ;;  %s46_s0 = smov 64  }
   0x4   :  { %5 = vst.msk [vmem:[#allocation0] ss:$8 sm:$0x3] %vm4_vm0, %v3_v3  }
   0x6   :  { %15 = vrot.lane.b32.xlu0 %v38_v1, %s46_s0 }
  0x74   :  { %v9_v4 = vpop.permute.xlu0 %8  }
  0x75   :  { %11 = vst.msk [vmem:[#allocation0] sm:$0x1] %vm10_vm1, %v9_v4   ;;  %v23_v5 = vpop.permute.xlu1 %22  }
  0x78   :  { %v16_v6 = vpop.permute.xlu0 %15  }
  0x79   :  { %18 = vst.msk [vmem:[#allocation0] ss:$8 sm:$0x3] %vm17_vm2, %v16_v6  }
  0x7a   :  { %25 = vst.msk [vmem:[#allocation0] ss:$8 sm:$0x3] %vm24_vm3, %v23_v5  }
  0x81   :  { %v29_v7 = vld [vmem:[#allocation0] sm:$0x1]  ;;  %v33_v8 = vld [vmem:[#allocation0 + $0x8] sm:$0x1] }
  0x82   :  { %31 = vst [vmem:[%s76_s1] sm:$0x1] %v29_v7  ;;  %40 = vst [vmem:[%s76_s1 + $0x1] sm:$0x1] %v33_v8 }

// kernel: _lambda_.1
= control target key start
LH: loop header
LB: loop body
LE: loop exit
PB: predicated region body
PF: predicated region fallthrough
CT: control target
= control target key end

     0   :  { %v6336_v0 = vmov 0.0   ;;  %vm6337_vm0 = vmmov 0   ;;  %vm90_vm1 = vcmask 261120   ;;  %vm138_vm2 = vcmask 523264   ;;  %s7887_s1 = inlined_call_operand.vmem [shape: bf16[32,64], index: 1, kind: input, shape index: {}]   ;;  %s7888_s2 = inlined_call_operand.vmem [shape: bf16[32,64], index: 2, kind: input, shape index: {}]   ;;  %s7889_s0 = inlined_call_operand.vmem [shape: bf16[16,32], index: 0, kind: input, shape index: {}]   ;;  %s7890_s5 = inlined_call_operand.vmem [shape: bf16[64,64], index: 5, kind: input, shape index: {}]   ;;  %s7891_s6 = inlined_call_operand.vmem [shape: bf16[64,64], index: 6, kind: input, shape index: {}]   ;;  %s7892_s3 = inlined_call_operand.vmem [shape: f32[1,64], index: 3, kind: input, shape index: {}]   ;;  %s7893_s4 = inlined_call_operand.vmem [shape: f32[1,64], index: 4, kind: input, shape index: {}]   ;;  %s7894_s8 = inlined_call_operand.vmem [shape: bf16[64,32], index: 8, kind: input, shape index: {}]   ;;  %s7895_s9 = inlined_call_operand.vmem [shape: bf16[64,32], index: 9, kind: input, shape index: {}]   ;;  %s7896_s7 = inlined_call_operand.vmem [shape: f32[1,64], index: 7, kind: input, shape index: {}]   ;;  %s7897_s11 = inlined_call_operand.vmem [shape: bf16[32,32], index: 11, kind: input, shape index: {}]   ;;  %s7898_s12 = inlined_call_operand.vmem [shape: bf16[32,32], index: 12, kind: input, shape index: {}]   ;;  %s7899_s14 = inlined_call_operand.vmem [shape: bf16[32,224], index: 14, kind: input, shape index: {}]   ;;  %s7900_s10 = inlined_call_operand.vmem [shape: f32[1,32], index: 10, kind: input, shape index: {}]   ;;  %s7901_s16 = inlined_call_operand.vmem [shape: bf16[224,128], index: 16, kind: input, shape index: {}]   ;;  %s7902_s13 = inlined_call_operand.vmem [shape: f32[1,32], index: 13, kind: input, shape index: {}]   ;;  %s7903_s15 = inlined_call_operand.vmem [shape: f32[1,224], index: 15, kind: input, shape index: {}]   ;;  %s7904_s17 = inlined_call_operand.vmem [shape: f32[1,128], index: 17, kind: input, shape index: {}]   ;;  %s7905_s18 = inlined_call_operand.vmem [shape: bf16[16,16,128], index: 18, kind: output, shape index: {}]  }
   0x1   :  { %7908 = sst [smem:[#allocation6_spill]] %s7887_s1  ;;  %5886 = vmatprep.subr.bf16.mxu0 %v6336_v0  ;;  %5894 = vmatprep.subr.bf16.mxu1 %v6336_v0  ;;  %v6006_v6 = vld [vmem:[%s7890_s5] sm:$0xff]   ;;  %v6008_v8 = vld [vmem:[%s7890_s5 + $0x8] sm:$0xff]   ;;  %v6010_v10 = vld [vmem:[%s7890_s5 + $0x10] sm:$0xff]   ;;  %vm1208_vm3 = vcmask 785408  }
   0x2   :  { %7909 = sst [smem:[#allocation7_spill]] %s7888_s2  ;;  %s7911_s29 = sld [smem:[#allocation6_spill]]  ;;  %5890 = vmatprep.mubr.msk.bf16.mxu0 %vm6337_vm0, %v6336_v0  ;;  %5898 = vmatprep.mubr.msk.bf16.mxu1 %vm6337_vm0, %v6336_v0  ;;  %v6007_v7 = vld [vmem:[%s7891_s6] sm:$0xff]   ;;  %v6009_v9 = vld [vmem:[%s7891_s6 + $0x8] sm:$0xff]   ;;  %v6011_v11 = vld [vmem:[%s7891_s6 + $0x10] sm:$0xff]  }
   0x3   :  { %7910 = sst [smem:[#allocation8_spill]] %s7889_s0  ;;  %s7912_s19 = sld [smem:[#allocation7_spill]]  ;;  %v6012_v12 = vld [vmem:[%s7890_s5 + $0x18] sm:$0xff]   ;;  %v5244_v14 = vld [vmem:[%s7892_s3] ss:$0 sm:$0xff]  ;;  %v6015_v37 = vld [vmem:[%s7894_s8 + $0x8] sm:$0xff]  }
   0x4   :  { %s7913_s24 = sld [smem:[#allocation8_spill]]  ;;  %v6013_v13 = vld [vmem:[%s7891_s6 + $0x18] sm:$0xff]   ;;  %v5249_v15 = vld [vmem:[%s7893_s4] ss:$0 sm:$0xff]  ;;  %v6016_v38 = vld [vmem:[%s7894_s8 + $0x10] sm:$0xff]  }
   0x5   :  { %v6014_v36 = vld [vmem:[%s7894_s8] sm:$0xff]   ;;  %v6017_v39 = vld [vmem:[%s7894_s8 + $0x18] sm:$0xff]  }
   0x6   :  { %v6018_v40 = vld [vmem:[%s7895_s9] sm:$0xff]  }
   0x7   :  { %v5253_v41 = vld [vmem:[%s7896_s7] ss:$0 sm:$0xff] }
   0x8   :  { %v6001_v1 = vld [vmem:[%s7911_s29] sm:$0xff]   ;;  %v6003_v3 = vld [vmem:[%s7911_s29 + $0x8] sm:$0xff]  }
   0x9   :  { %v6002_v2 = vld [vmem:[%s7912_s19] sm:$0xff]   ;;  %5887 = vmatpush3.bf16.msra.mxu0 %v6001_v1  ;;  %v6004_v4 = vld [vmem:[%s7912_s19 + $0x8] sm:$0xff]  }
   0xa   :  { %5895 = vmatpush3.bf16.msra.mxu1 %v6002_v2  ;;  %5888 = vmatprep.subr.bf16.mxu0 %v6336_v0  ;;  %v6005_v5 = vld [vmem:[%s7913_s24] sm:$0xff]  }
   0xb   :  { %5896 = vmatprep.subr.bf16.mxu1 %v6336_v0 }
   0xd   :  { %5889 = vmatpush3.bf16.msra.mxu0 %v6003_v3 }
   0xe   :  { %5897 = vmatpush3.bf16.msra.mxu1 %v6004_v4  ;;  %5902 = vmatprep.subr.bf16.mxu0 %v6006_v6 }
   0xf   :  { %5914 = vmatprep.subr.bf16.mxu1 %v6007_v7 }
  0x10   :  { %5891 = vmatmul.mubr.msk.bf16.vlgmr.msra.gmra.mrb[0].mxu0 %vm90_vm1, %v6005_v5 }
  0x11   :  { %5899 = vmatmul.mubr.msk.bf16.vlgmr.msra.gmra.mrb[0].mxu1 %vm90_vm1, %v6005_v5  ;;  %5903 = vmatpush3.bf16.msra.mxu0 %v6006_v6 }
  0x12   :  { %5915 = vmatpush3.bf16.msra.mxu1 %v6007_v7  ;;  %5904 = vmatprep.subr.bf16.mxu0 %v6008_v8  ;;  %v6019_v7 = vld [vmem:[%s7895_s9 + $0x8] sm:$0xff]  }
  0x13   :  { %5916 = vmatprep.subr.bf16.mxu1 %v6009_v9 }
  0x15   :  { %5905 = vmatpush3.bf16.msra.mxu0 %v6008_v8 }
  0x16   :  { %5917 = vmatpush3.bf16.msra.mxu1 %v6009_v9  ;;  %5906 = vmatprep.subr.bf16.mxu0 %v6010_v10 }
  0x17   :  { %5918 = vmatprep.subr.bf16.mxu1 %v6011_v11 }
  0x19   :  { %5907 = vmatpush3.bf16.msra.mxu0 %v6010_v10  ;;  %v6020_v10 = vld [vmem:[%s7895_s9 + $0x10] sm:$0xff]  }
  0x1a   :  { %5908 = vmatprep.subr.bf16.mxu0 %v6012_v12  ;;  %5919 = vmatpush3.bf16.msra.mxu1 %v6011_v11  ;;  %v6021_v11 = vld [vmem:[%s7895_s9 + $0x18] sm:$0xff]  }
  0x1b   :  { %5920 = vmatprep.subr.bf16.mxu1 %v6013_v13 }
  0x1d   :  { %5909 = vmatpush3.bf16.msra.mxu0 %v6012_v12 }
  0x1e   :  { %5921 = vmatpush3.bf16.msra.mxu1 %v6013_v13  ;;  %v6022_v13 = vld [vmem:[%s7897_s11] sm:$0xff]  }
  0x1f   :  { %5926 = vmatprep.subr.bf16.mxu1 %v6014_v36  ;;  %5958 = vmatprep.subr.bf16.mxu0 %v6022_v13 }
  0xe3   :  { %v128_v16 = vpop.f32.mrb[0].mxu0 }
  0xe4   :  { %v129_v17 = vadd.f32 %v5244_v14, %v128_v16  ;;  %v197_v18 = vpop.f32.mrb[0].mxu1  ;;  %v5892_v19 = vpop.f32.mrb[1].mxu0  ;;  %v6025_v16 = vld [vmem:[%s7898_s12 + $0x8] sm:$0xff]  }
  0xe5   :  { %v198_v20 = vadd.f32 %v5249_v15, %v197_v18  ;;  %v5900_v21 = vpop.f32.mrb[1].mxu1  ;;  %v131_v22 = vpop.f32.mrb[2].mxu0  ;;  %v6547_v18 = vld [vmem:[%s7900_s10] ss:$0 sm:$0xff] }
  0xe6   :  { %v132_v23 = vadd.f32 %v5244_v14, %v131_v22  ;;  %v200_v24 = vpop.f32.mrb[2].mxu1  ;;  %v5893_v25 = vpop.f32.mrb[3].mxu0  ;;  %v135_v29 = vmax.f32 %v129_v17, 0.0  ;;  %v6023_v14 = vld [vmem:[%s7898_s12] sm:$0xff]  }
  0xe7   :  { %v204_v26 = vmax.f32 %v198_v20, 0.0  ;;  %v201_v27 = vadd.f32 %v5249_v15, %v200_v24  ;;  %v5901_v28 = vpop.f32.mrb[3].mxu1  ;;  %v6024_v15 = vld [vmem:[%s7897_s11 + $0x8] sm:$0xff]  }
  0xe8   :  { %v136_v30 = vmax.f32 %v132_v23, 0.0  ;;  %v6541_v17 = vld [vmem:[%s7899_s14 + $0x4] ss:$8 sps:$4 sm:$0xff]  }
  0xe9   :  { %v205_v31 = vmax.f32 %v201_v27, 0.0 }
  0xea   :  { %v137_v32 = vpack.c.bf16 %v136_v30, %v135_v29 }
  0xeb   :  { %v206_v33 = vpack.c.bf16 %v205_v31, %v204_v26 }
  0xec   :  { %139 = vst.msk [vmem:[#allocation2] sm:$0xff] %vm138_vm2, %v137_v32 }
  0xed   :  { %207 = vst.msk [vmem:[#allocation2 + $0x8] sm:$0xff] %vm138_vm2, %v206_v33 }
  0xf3   :  { %v208_v34 = vld [vmem:[#allocation2] sm:$0xff] }
  0xf4   :  { %5910 = vmatprep.mubr.msk.bf16.mxu0 %vm138_vm2, %v208_v34  ;;  %5922 = vmatprep.mubr.msk.bf16.mxu1 %vm138_vm2, %v208_v34  ;;  %v209_v35 = vld [vmem:[#allocation2 + $0x8] sm:$0xff] }
  0xf5   :  { %5911 = vmatmul.mubr.msk.bf16.vlgmr.msra.gmra.mrb[4].mxu0 %vm138_vm2, %v209_v35  ;;  %5923 = vmatmul.mubr.msk.bf16.vlgmr.msra.gmra.mrb[4].mxu1 %vm138_vm2, %v209_v35 }
  0xf6   :  { %5927 = vmatpush3.bf16.msra.mxu1 %v6014_v36  ;;  %5959 = vmatpush3.bf16.msra.mxu0 %v6022_v13 }
  0xf7   :  { %5928 = vmatprep.subr.bf16.mxu1 %v6015_v37  ;;  %5960 = vmatprep.subr.bf16.mxu0 %v6024_v15 }
  0xfa   :  { %5929 = vmatpush3.bf16.msra.mxu1 %v6015_v37  ;;  %5961 = vmatpush3.bf16.msra.mxu0 %v6024_v15 }
  0xfb   :  { %5930 = vmatprep.subr.bf16.mxu1 %v6016_v38  ;;  %1040 = vmatprep.subr.bf16.mxu0 %v6541_v17 }
  0xfe   :  { %5931 = vmatpush3.bf16.msra.mxu1 %v6016_v38 }
  0xff   :  { %5932 = vmatprep.subr.bf16.mxu1 %v6017_v39 }
 0x102   :  { %5933 = vmatpush3.bf16.msra.mxu1 %v6017_v39 }
 0x103   :  { %5942 = vmatprep.subr.bf16.mxu1 %v6018_v40 }
 0x1c8   :  { %v5912_v42 = vpop.f32.mrb[4].mxu0  ;;  %v5924_v43 = vpop.f32.mrb[4].mxu1 }
 0x1c9   :  { %v298_v44 = vadd.f32 %v5912_v42, %v5253_v41  ;;  %v394_v45 = vadd.f32 %v5924_v43, %v5253_v41  ;;  %v289_v46 = vpop.f32.mrb[5].mxu0  ;;  %v385_v47 = vpop.f32.mrb[5].mxu1 }
 0x1ca   :  { %v290_v48 = vadd.f32 %v5253_v41, %v289_v46  ;;  %v386_v49 = vadd.f32 %v5253_v41, %v385_v47  ;;  %v5913_v50 = vpop.f32.mrb[6].mxu0  ;;  %v5925_v51 = vpop.f32.mrb[6].mxu1 }
 0x1cb   :  { %v301_v52 = vadd.f32 %v5913_v50, %v5253_v41  ;;  %v397_v53 = vadd.f32 %v5925_v51, %v5253_v41  ;;  %v292_v54 = vpop.f32.mrb[7].mxu0  ;;  %v388_v55 = vpop.f32.mrb[7].mxu1  ;;  %v306_v58 = vmax.f32 %v298_v44, 0.0  ;;  %v402_v59 = vmax.f32 %v394_v45, 0.0 }
 0x1cc   :  { %v293_v56 = vadd.f32 %v5253_v41, %v292_v54  ;;  %v389_v57 = vadd.f32 %v5253_v41, %v388_v55  ;;  %v304_v62 = vmax.f32 %v290_v48, 0.0  ;;  %v400_v63 = vmax.f32 %v386_v49, 0.0  ;;  %v6562_v48 = vld [vmem:[%s7899_s14] ss:$8 sps:$4 sm:$0xff]  }
 0x1cd   :  { %v307_v60 = vmax.f32 %v301_v52, 0.0  ;;  %v403_v61 = vmax.f32 %v397_v53, 0.0 }
 0x1ce   :  { %v305_v0 = vmax.f32 %v293_v56, 0.0  ;;  %v401_v1 = vmax.f32 %v389_v57, 0.0 }
 0x1cf   :  { %v309_v2 = vpack.c.bf16 %v307_v60, %v306_v58  ;;  %v405_v3 = vpack.c.bf16 %v403_v61, %v402_v59 }
 0x1d0   :  { %v308_v4 = vpack.c.bf16 %v305_v0, %v304_v62  ;;  %v404_v5 = vpack.c.bf16 %v401_v1, %v400_v63 }
 0x1d1   :  { %311 = vst.msk [vmem:[#allocation3 + $0x8] sm:$0xff] %vm138_vm2, %v309_v2  ;;  %407 = vst.msk [vmem:[#allocation3 + $0x18] sm:$0xff] %vm138_vm2, %v405_v3 }
 0x1d2   :  { %310 = vst.msk [vmem:[#allocation3] sm:$0xff] %vm138_vm2, %v308_v4  ;;  %406 = vst.msk [vmem:[#allocation3 + $0x10] sm:$0xff] %vm138_vm2, %v404_v5 }
 0x1d8   :  { %v409_v8 = vld [vmem:[#allocation3 + $0x8] sm:$0xff]  ;;  %v411_v12 = vld [vmem:[#allocation3 + $0x18] sm:$0xff] }
 0x1d9   :  { %v408_v6 = vld [vmem:[#allocation3] sm:$0xff]  ;;  %v410_v9 = vld [vmem:[#allocation3 + $0x10] sm:$0xff] }
 0x1da   :  { %5934 = vmatprep.mubr.msk.bf16.mxu1 %vm138_vm2, %v408_v6 }
 0x1db   :  { %5935 = vmatmul.mubr.msk.bf16.vlgmr.msra.gmra.mrb[8].mxu1 %vm138_vm2, %v409_v8 }
 0x1dc   :  { %5938 = vmatprep.mubr.msk.bf16.mxu1 %vm138_vm2, %v410_v9  ;;  %5943 = vmatpush3.bf16.msra.mxu1 %v6018_v40 }
 0x1dd   :  { %5944 = vmatprep.subr.bf16.mxu1 %v6019_v7 }
 0x1e0   :  { %5945 = vmatpush3.bf16.msra.mxu1 %v6019_v7 }
 0x1e1   :  { %5946 = vmatprep.subr.bf16.mxu1 %v6020_v10 }
 0x1e3   :  { %5939 = vmatmul.mubr.msk.bf16.gmra.mrb[12].mxu1 %vm138_vm2, %v411_v12 }
 0x1e4   :  { %5947 = vmatpush3.bf16.msra.mxu1 %v6020_v10  ;;  %5950 = vmatprep.mubr.msk.bf16.mxu1 %vm138_vm2, %v408_v6 }
 0x1e5   :  { %5948 = vmatprep.subr.bf16.mxu1 %v6021_v11 }
 0x1e8   :  { %5949 = vmatpush3.bf16.msra.mxu1 %v6021_v11 }
 0x1e9   :  { %5978 = vmatprep.subr.bf16.mxu1 %v6023_v14 }
 0x1eb   :  { %5951 = vmatmul.mubr.msk.bf16.vlgmr.msra.gmra.mrb[16].mxu1 %vm138_vm2, %v409_v8 }
 0x1ec   :  { %5954 = vmatprep.mubr.msk.bf16.mxu1 %vm138_vm2, %v410_v9  ;;  %5979 = vmatpush3.bf16.msra.mxu1 %v6023_v14 }
 0x1ed   :  { %5980 = vmatprep.subr.bf16.mxu1 %v6025_v16 }
 0x1f0   :  { %5981 = vmatpush3.bf16.msra.mxu1 %v6025_v16 }
 0x1f3   :  { %5955 = vmatmul.mubr.msk.bf16.gmra.mrb[20].mxu1 %vm138_vm2, %v411_v12 }
 0x2ae   :  { %v5936_v19 = vpop.f32.mrb[8].mxu1 }
 0x2af   :  { %v506_v20 = vadd.f32 %v5936_v19, %v6547_v18  ;;  %v497_v21 = vpop.f32.mrb[9].mxu1 }
 0x2b0   :  { %v498_v22 = vadd.f32 %v6547_v18, %v497_v21  ;;  %v5937_v23 = vpop.f32.mrb[10].mxu1  ;;  %v6598_v21 = vld [vmem:[%s7899_s14 + $0x10] ss:$8 sps:$4 sm:$0xff]  }
 0x2b1   :  { %v509_v24 = vadd.f32 %v5937_v23, %v6547_v18  ;;  %v500_v25 = vpop.f32.mrb[11].mxu1  ;;  %v530_v27 = vmax.f32 %v506_v20, 0.0  ;;  %v6338_v23 = vmov 0  }
 0x2b2   :  { %v501_v26 = vadd.f32 %v6547_v18, %v500_v25  ;;  %v528_v29 = vmax.f32 %v498_v22, 0.0  ;;  %v6603_v22 = vld [vmem:[%s7899_s14 + $0x14] ss:$8 sps:$4 sm:$0xff]   ;;  %1212 = vmatprep.subr.bf16.mxu1 %v6338_v23  ;;  %v6033_v25 = vld [vmem:[%s7901_s16 + $0x8] sm:$0xff]  }
 0x2b3   :  { %v531_v28 = vmax.f32 %v509_v24, 0.0  ;;  %v6032_v24 = vld [vmem:[%s7901_s16] sm:$0xff]  }
 0x2b4   :  { %v529_v30 = vmax.f32 %v501_v26, 0.0  ;;  %v6037_v26 = vld [vmem:[%s7901_s16 + $0x18] sm:$0xff]  }
 0x2b5   :  { %v537_v31 = vpack.c.bf16 %v531_v28, %v530_v27  ;;  %v6039_v27 = vld [vmem:[%s7901_s16 + $0x20] sm:$0xff]   ;;  %v6041_v28 = vld [vmem:[%s7901_s16 + $0x28] sm:$0xff]  }
 0x2b6   :  { %v536_v32 = vpack.c.bf16 %v529_v30, %v528_v29  ;;  %v5940_v33 = vpop.f32.mrb[12].mxu1  ;;  %v6043_v29 = vld [vmem:[%s7901_s16 + $0x30] sm:$0xff]   ;;  %v6045_v30 = vld [vmem:[%s7901_s16 + $0x38] sm:$0xff]  }
 0x2b7   :  { %541 = vst.msk [vmem:[#allocation4 + $0x8] sm:$0xff] %vm90_vm1, %v537_v31  ;;  %v522_v34 = vadd.f32 %v5940_v33, %v6547_v18  ;;  %v513_v35 = vpop.f32.mrb[13].mxu1  ;;  %v6047_v31 = vld [vmem:[%s7901_s16 + $0x40] sm:$0xff]   ;;  %v6051_v33 = vld [vmem:[%s7901_s16 + $0x50] sm:$0xff]  }
 0x2b8   :  { %540 = vst.msk [vmem:[#allocation4] sm:$0xff] %vm90_vm1, %v536_v32  ;;  %v514_v36 = vadd.f32 %v6547_v18, %v513_v35  ;;  %v5941_v37 = vpop.f32.mrb[14].mxu1  ;;  %v6049_v32 = vld [vmem:[%s7901_s16 + $0x48] sm:$0xff]  }
 0x2b9   :  { %v525_v38 = vadd.f32 %v5941_v37, %v6547_v18  ;;  %v516_v39 = vpop.f32.mrb[15].mxu1  ;;  %v534_v41 = vmax.f32 %v522_v34, 0.0  ;;  %v6657_v34 = vld [vmem:[%s7902_s13] ss:$0 sm:$0xff] }
 0x2ba   :  { %v517_v40 = vadd.f32 %v6547_v18, %v516_v39  ;;  %v532_v43 = vmax.f32 %v514_v36, 0.0 }
 0x2bb   :  { %v535_v42 = vmax.f32 %v525_v38, 0.0 }
 0x2bc   :  { %v533_v44 = vmax.f32 %v517_v40, 0.0 }
 0x2bd   :  { %v539_v45 = vpack.c.bf16 %v535_v42, %v534_v41 }
 0x2be   :  { %v538_v46 = vpack.c.bf16 %v533_v44, %v532_v43  ;;  %v5952_v47 = vpop.f32.mrb[16].mxu1  ;;  %v665_v54 = vld [vmem:[#allocation4 + $0x8] sm:$0xff] }
 0x2bf   :  { %543 = vst.msk [vmem:[#allocation4 + $0x18] sm:$0xff] %vm90_vm1, %v539_v45  ;;  %v626_v49 = vadd.f32 %v5952_v47, %v6547_v18  ;;  %v617_v50 = vpop.f32.mrb[17].mxu1  ;;  %v664_v51 = vld [vmem:[#allocation4] sm:$0xff] }
 0x2c0   :  { %542 = vst.msk [vmem:[#allocation4 + $0x10] sm:$0xff] %vm90_vm1, %v538_v46  ;;  %v618_v52 = vadd.f32 %v6547_v18, %v617_v50  ;;  %v5953_v53 = vpop.f32.mrb[18].mxu1  ;;  %5962 = vmatprep.mubr.msk.bf16.mxu0 %vm90_vm1, %v664_v51  ;;  %5982 = vmatprep.mubr.msk.bf16.mxu1 %vm90_vm1, %v664_v51 }
 0x2c1   :  { %v629_v55 = vadd.f32 %v5953_v53, %v6547_v18  ;;  %v620_v56 = vpop.f32.mrb[19].mxu1  ;;  %5963 = vmatmul.mubr.msk.bf16.vlgmr.msra.gmra.mrb[8].mxu0 %vm90_vm1, %v665_v54  ;;  %5983 = vmatmul.mubr.msk.bf16.vlgmr.msra.gmra.mrb[24].mxu1 %vm90_vm1, %v665_v54  ;;  %v650_v58 = vmax.f32 %v626_v49, 0.0 }
 0x2c2   :  { %v621_v57 = vadd.f32 %v6547_v18, %v620_v56  ;;  %1041 = vmatpush1.bf16.msra.mxu0 %v6562_v48  ;;  %v648_v60 = vmax.f32 %v618_v52, 0.0  ;;  %1213 = vmatpush1.bf16.msra.mxu1 %v6032_v24 }
 0x2c3   :  { %v651_v59 = vmax.f32 %v629_v55, 0.0  ;;  %1042 = vmatprep.subr.bf16.mxu0 %v6603_v22  ;;  %1214 = vmatprep.subr.bf16.mxu1 %v6338_v23 }
 0x2c4   :  { %v649_v61 = vmax.f32 %v621_v57, 0.0 }
 0x2c5   :  { %v657_v62 = vpack.c.bf16 %v651_v59, %v650_v58 }
 0x2c6   :  { %v656_v63 = vpack.c.bf16 %v649_v61, %v648_v60  ;;  %v5956_v0 = vpop.f32.mrb[20].mxu1  ;;  %v667_v6 = vld [vmem:[#allocation4 + $0x18] sm:$0xff]  ;;  %1043 = vmatpush1.bf16.msra.mxu0 %v6598_v21  ;;  %1215 = vmatpush1.bf16.msra.mxu1 %v6033_v25 }
 0x2c7   :  { %661 = vst.msk [vmem:[#allocation4 + $0x28] sm:$0xff] %vm90_vm1, %v657_v62  ;;  %v642_v1 = vadd.f32 %v5956_v0, %v6547_v18  ;;  %v633_v2 = vpop.f32.mrb[21].mxu1  ;;  %v666_v3 = vld [vmem:[#allocation4 + $0x10] sm:$0xff]  ;;  %1305 = vmatprep.subr.bf16.mxu0 %v6541_v17  ;;  %v6035_v17 = vld [vmem:[%s7901_s16 + $0x10] sm:$0xff]   ;;  %1216 = vmatprep.subr.bf16.mxu1 %v6338_v23 }
 0x2c8   :  { %660 = vst.msk [vmem:[#allocation4 + $0x20] sm:$0xff] %vm90_vm1, %v656_v63  ;;  %v634_v4 = vadd.f32 %v6547_v18, %v633_v2  ;;  %v5957_v5 = vpop.f32.mrb[22].mxu1  ;;  %5966 = vmatprep.mubr.msk.bf16.mxu0 %vm90_vm1, %v666_v3  ;;  %5986 = vmatprep.mubr.msk.bf16.mxu1 %vm90_vm1, %v666_v3 }
 0x2c9   :  { %v645_v7 = vadd.f32 %v5957_v5, %v6547_v18  ;;  %v636_v8 = vpop.f32.mrb[23].mxu1  ;;  %5967 = vmatmul.mubr.msk.bf16.gmra.mrb[12].mxu0 %vm90_vm1, %v667_v6  ;;  %5987 = vmatmul.mubr.msk.bf16.gmra.mrb[28].mxu1 %vm90_vm1, %v667_v6  ;;  %v654_v10 = vmax.f32 %v642_v1, 0.0 }
 0x2ca   :  { %v637_v9 = vadd.f32 %v6547_v18, %v636_v8  ;;  %v652_v12 = vmax.f32 %v634_v4, 0.0  ;;  %1217 = vmatpush1.bf16.msra.mxu1 %v6035_v17 }
 0x2cb   :  { %v655_v11 = vmax.f32 %v645_v7, 0.0  ;;  %1218 = vmatprep.subr.bf16.mxu1 %v6338_v23 }
 0x2cc   :  { %v653_v13 = vmax.f32 %v637_v9, 0.0 }
 0x2cd   :  { %v659_v14 = vpack.c.bf16 %v655_v11, %v654_v10 }
 0x2ce   :  { %v658_v15 = vpack.c.bf16 %v653_v13, %v652_v12  ;;  %v669_v19 = vld [vmem:[#allocation4 + $0x28] sm:$0xff]  ;;  %1219 = vmatpush1.bf16.msra.mxu1 %v6037_v26 }
 0x2cf   :  { %663 = vst.msk [vmem:[#allocation4 + $0x38] sm:$0xff] %vm90_vm1, %v659_v14  ;;  %v668_v16 = vld [vmem:[#allocation4 + $0x20] sm:$0xff]  ;;  %1220 = vmatprep.subr.bf16.mxu1 %v6338_v23 }
 0x2d0   :  { %662 = vst.msk [vmem:[#allocation4 + $0x30] sm:$0xff] %vm90_vm1, %v658_v15  ;;  %5970 = vmatprep.mubr.msk.bf16.mxu0 %vm90_vm1, %v668_v16  ;;  %5990 = vmatprep.mubr.msk.bf16.mxu1 %vm90_vm1, %v668_v16 }
 0x2d1   :  { %5971 = vmatmul.mubr.msk.bf16.gmra.mrb[16].mxu0 %vm90_vm1, %v669_v19  ;;  %5991 = vmatmul.mubr.msk.bf16.gmra.mrb[32].mxu1 %vm90_vm1, %v669_v19 }
 0x2d2   :  { %1221 = vmatpush1.bf16.msra.mxu1 %v6039_v27 }
 0x2d3   :  { %1222 = vmatprep.subr.bf16.mxu1 %v6338_v23 }
 0x2d6   :  { %v671_v20 = vld [vmem:[#allocation4 + $0x38] sm:$0xff]  ;;  %1223 = vmatpush1.bf16.msra.mxu1 %v6041_v28 }
 0x2d7   :  { %v670_v18 = vld [vmem:[#allocation4 + $0x30] sm:$0xff]  ;;  %1224 = vmatprep.subr.bf16.mxu1 %v6338_v23 }
 0x2d8   :  { %5974 = vmatprep.mubr.msk.bf16.mxu0 %vm90_vm1, %v670_v18  ;;  %5994 = vmatprep.mubr.msk.bf16.mxu1 %vm90_vm1, %v670_v18 }
 0x2d9   :  { %5975 = vmatmul.mubr.msk.bf16.gmra.mrb[20].mxu0 %vm90_vm1, %v671_v20  ;;  %5995 = vmatmul.mubr.msk.bf16.gmra.mrb[36].mxu1 %vm90_vm1, %v671_v20 }
 0x2da   :  { %1072 = vmatprep.mubr.bf16.mxu0 %v6338_v23  ;;  %1225 = vmatpush1.bf16.msra.mxu1 %v6043_v29 }
 0x2db   :  { %1226 = vmatprep.subr.bf16.mxu1 %v6338_v23 }
 0x2de   :  { %1227 = vmatpush1.bf16.msra.mxu1 %v6045_v30 }
 0x2df   :  { %1228 = vmatprep.subr.bf16.mxu1 %v6338_v23 }
 0x2e2   :  { %1229 = vmatpush1.bf16.msra.mxu1 %v6047_v31 }
 0x2e3   :  { %1230 = vmatprep.subr.bf16.mxu1 %v6338_v23 }
 0x2e6   :  { %1231 = vmatpush1.bf16.msra.mxu1 %v6049_v32 }
 0x2e7   :  { %1232 = vmatprep.subr.bf16.mxu1 %v6338_v23 }
 0x2ea   :  { %1233 = vmatpush1.bf16.msra.mxu1 %v6051_v33 }
 0x2eb   :  { %1234 = vmatprep.subr.bf16.mxu1 %v6338_v23 }
 0x394   :  { %v5964_v35 = vpop.f32.mrb[8].mxu0  ;;  %v5984_v36 = vpop.f32.mrb[24].mxu1 }
 0x395   :  { %v762_v37 = vadd.f32 %v5964_v35, %v6657_v34  ;;  %v914_v38 = vadd.f32 %v5984_v36, %v6657_v34  ;;  %v753_v39 = vpop.f32.mrb[9].mxu0  ;;  %v905_v40 = vpop.f32.mrb[25].mxu1 }
 0x396   :  { %v754_v41 = vadd.f32 %v6657_v34, %v753_v39  ;;  %v906_v42 = vadd.f32 %v6657_v34, %v905_v40  ;;  %v5965_v43 = vpop.f32.mrb[10].mxu0  ;;  %v5985_v44 = vpop.f32.mrb[26].mxu1 }
 0x397   :  { %v818_v45 = vmax.f32 %v762_v37, 0.0  ;;  %v970_v46 = vmax.f32 %v914_v38, 0.0  ;;  %v765_v47 = vadd.f32 %v5965_v43, %v6657_v34  ;;  %v917_v49 = vadd.f32 %v5985_v44, %v6657_v34  ;;  %v756_v50 = vpop.f32.mrb[11].mxu0  ;;  %v908_v51 = vpop.f32.mrb[27].mxu1 }
 0x398   :  { %v816_v52 = vmax.f32 %v754_v41, 0.0  ;;  %v968_v53 = vmax.f32 %v906_v42, 0.0  ;;  %v757_v54 = vadd.f32 %v6657_v34, %v756_v50  ;;  %v909_v55 = vadd.f32 %v6657_v34, %v908_v51 }
 0x399   :  { %v819_v56 = vmax.f32 %v765_v47, 0.0  ;;  %v971_v57 = vmax.f32 %v917_v49, 0.0 }
 0x39a   :  { %v817_v58 = vmax.f32 %v757_v54, 0.0  ;;  %v969_v59 = vmax.f32 %v909_v55, 0.0 }
 0x39b   :  { %v833_v60 = vpack.c.bf16 %v819_v56, %v818_v45  ;;  %v985_v61 = vpack.c.bf16 %v971_v57, %v970_v46  ;;  %v6034_v56 = vld [vmem:[%s7901_s16] sm:$0xff]  }
 0x39c   :  { %v832_v62 = vpack.c.bf16 %v817_v58, %v816_v52  ;;  %v984_v63 = vpack.c.bf16 %v969_v59, %v968_v53  ;;  %v5968_v0 = vpop.f32.mrb[12].mxu0  ;;  %v5988_v1 = vpop.f32.mrb[28].mxu1 }
 0x39d   :  { %841 = vst.msk [vmem:[#allocation5 + $0x8] sm:$0xff] %vm90_vm1, %v833_v60  ;;  %993 = vst.msk [vmem:[#allocation5 + $0x48] sm:$0xff] %vm90_vm1, %v985_v61  ;;  %v778_v2 = vadd.f32 %v5968_v0, %v6657_v34  ;;  %v930_v3 = vadd.f32 %v5988_v1, %v6657_v34  ;;  %v769_v4 = vpop.f32.mrb[13].mxu0  ;;  %v921_v5 = vpop.f32.mrb[29].mxu1 }
 0x39e   :  { %840 = vst.msk [vmem:[#allocation5] sm:$0xff] %vm90_vm1, %v832_v62  ;;  %992 = vst.msk [vmem:[#allocation5 + $0x40] sm:$0xff] %vm90_vm1, %v984_v63  ;;  %v770_v6 = vadd.f32 %v6657_v34, %v769_v4  ;;  %v922_v7 = vadd.f32 %v6657_v34, %v921_v5  ;;  %v5969_v8 = vpop.f32.mrb[14].mxu0  ;;  %v5989_v9 = vpop.f32.mrb[30].mxu1 }
 0x39f   :  { %v822_v10 = vmax.f32 %v778_v2, 0.0  ;;  %v974_v11 = vmax.f32 %v930_v3, 0.0  ;;  %v781_v12 = vadd.f32 %v5969_v8, %v6657_v34  ;;  %v933_v13 = vadd.f32 %v5989_v9, %v6657_v34  ;;  %v772_v14 = vpop.f32.mrb[15].mxu0  ;;  %v924_v15 = vpop.f32.mrb[31].mxu1 }
 0x3a0   :  { %v820_v16 = vmax.f32 %v770_v6, 0.0  ;;  %v972_v19 = vmax.f32 %v922_v7, 0.0  ;;  %v773_v18 = vadd.f32 %v6657_v34, %v772_v14  ;;  %v925_v20 = vadd.f32 %v6657_v34, %v924_v15 }
 0x3a1   :  { %v823_v24 = vmax.f32 %v781_v12, 0.0  ;;  %v975_v25 = vmax.f32 %v933_v13, 0.0 }
 0x3a2   :  { %v821_v17 = vmax.f32 %v773_v18, 0.0  ;;  %v973_v26 = vmax.f32 %v925_v20, 0.0 }
 0x3a3   :  { %v835_v27 = vpack.c.bf16 %v823_v24, %v822_v10  ;;  %v987_v28 = vpack.c.bf16 %v975_v25, %v974_v11  ;;  %v6038_v24 = vld [vmem:[%s7901_s16 + $0x10] sm:$0xff]  }
 0x3a4   :  { %v834_v29 = vpack.c.bf16 %v821_v17, %v820_v16  ;;  %v986_v30 = vpack.c.bf16 %v973_v26, %v972_v19  ;;  %v5972_v31 = vpop.f32.mrb[16].mxu0  ;;  %v5992_v32 = vpop.f32.mrb[32].mxu1  ;;  %v1265_v3 = vld [vmem:[#allocation5 + $0x8] sm:$0xff] }
 0x3a5   :  { %843 = vst.msk [vmem:[#allocation5 + $0x18] sm:$0xff] %vm90_vm1, %v835_v27  ;;  %995 = vst.msk [vmem:[#allocation5 + $0x58] sm:$0xff] %vm90_vm1, %v987_v28  ;;  %v794_v33 = vadd.f32 %v5972_v31, %v6657_v34  ;;  %v946_v35 = vadd.f32 %v5992_v32, %v6657_v34  ;;  %v785_v36 = vpop.f32.mrb[17].mxu0  ;;  %v937_v37 = vpop.f32.mrb[33].mxu1  ;;  %v1000_v38 = vld [vmem:[#allocation5] sm:$0xff]  ;;  %v6044_v31 = vld [vmem:[%s7901_s16 + $0x28] sm:$0xff]  }
 0x3a6   :  { %842 = vst.msk [vmem:[#allocation5 + $0x10] sm:$0xff] %vm90_vm1, %v834_v29  ;;  %994 = vst.msk [vmem:[#allocation5 + $0x50] sm:$0xff] %vm90_vm1, %v986_v30  ;;  %v786_v39 = vadd.f32 %v6657_v34, %v785_v36  ;;  %v938_v40 = vadd.f32 %v6657_v34, %v937_v37  ;;  %v5973_v41 = vpop.f32.mrb[18].mxu0  ;;  %v5993_v42 = vpop.f32.mrb[34].mxu1  ;;  %5311 = vmatmul.mubr.msk.bf16.vlgmr.msra.gmra.mrb[24].mxu0 %vm90_vm1, %v1000_v38  ;;  %v6042_v30 = vld [vmem:[%s7901_s16 + $0x20] sm:$0xff]   ;;  %v6046_v32 = vld [vmem:[%s7901_s16 + $0x30] sm:$0xff]  }
 0x3a7   :  { %v826_v43 = vmax.f32 %v794_v33, 0.0  ;;  %v978_v44 = vmax.f32 %v946_v35, 0.0  ;;  %v797_v45 = vadd.f32 %v5973_v41, %v6657_v34  ;;  %v949_v46 = vadd.f32 %v5993_v42, %v6657_v34  ;;  %1306 = vmatpush1.bf16.msra.mxu0 %v6562_v48  ;;  %v788_v47 = vpop.f32.mrb[19].mxu0  ;;  %v940_v49 = vpop.f32.mrb[35].mxu1  ;;  %1337 = vmatprep.mubr.bf16.mxu0 %v6338_v23  ;;  %v6048_v33 = vld [vmem:[%s7901_s16 + $0x38] sm:$0xff]   ;;  %v6050_v35 = vld [vmem:[%s7901_s16 + $0x40] sm:$0xff]  }
 0x3a8   :  { %v824_v50 = vmax.f32 %v786_v39, 0.0  ;;  %v976_v51 = vmax.f32 %v938_v40, 0.0  ;;  %v789_v52 = vadd.f32 %v6657_v34, %v788_v47  ;;  %v941_v53 = vadd.f32 %v6657_v34, %v940_v49  ;;  %1307 = vmatprep.subr.bf16.mxu0 %v6603_v22  ;;  %v6052_v36 = vld [vmem:[%s7901_s16 + $0x48] sm:$0xff]   ;;  %v6053_v37 = vld [vmem:[%s7901_s16 + $0x58] sm:$0xff]   ;;  %v6054_v38 = vld [vmem:[%s7901_s16 + $0x50] sm:$0xff]  }
 0x3a9   :  { %v827_v54 = vmax.f32 %v797_v45, 0.0  ;;  %v979_v55 = vmax.f32 %v949_v46, 0.0  ;;  %1235 = vmatpush1.bf16.msra.mxu1 %v6053_v37  ;;  %v6055_v39 = vld [vmem:[%s7901_s16 + $0x60] sm:$0xff]   ;;  %v6056_v40 = vld [vmem:[%s7901_s16 + $0x58] sm:$0xff]   ;;  %v6057_v41 = vld [vmem:[%s7901_s16 + $0x68] sm:$0xff]   ;;  %v1007_v45 = vlaneseq }
 0x3aa   :  { %v825_v57 = vmax.f32 %v789_v52, 0.0  ;;  %v977_v48 = vmax.f32 %v941_v53, 0.0  ;;  %1236 = vmatprep.subr.bf16.mxu1 %v6338_v23  ;;  %v6332_v42 = vld [vmem:[%s7899_s14 + $0x4] ss:$8 sps:$4 sm:$0xff]   ;;  %v1005_v49 = vld [vmem:[%s7903_s15] sm:$0x3] }
 0x3ab   :  { %v837_v58 = vpack.c.bf16 %v827_v54, %v826_v43  ;;  %v989_v59 = vpack.c.bf16 %v979_v55, %v978_v44  ;;  %1308 = vmatpush1.bf16.msra.mxu0 %v6598_v21  ;;  %v6036_v21 = vld [vmem:[%s7901_s16 + $0x8] sm:$0xff]   ;;  %v6058_v43 = vld [vmem:[%s7901_s16 + $0x60] sm:$0xff]   ;;  %v1008_v46 = vshrl.u32 %v1007_v45, 7 }
 0x3ac   :  { %v836_v60 = vpack.c.bf16 %v825_v57, %v824_v50  ;;  %v988_v61 = vpack.c.bf16 %v977_v48, %v976_v51  ;;  %v5976_v62 = vpop.f32.mrb[20].mxu0  ;;  %v5996_v63 = vpop.f32.mrb[36].mxu1  ;;  %1476 = vmatprep.subr.bf16.mxu0 %v6338_v23  ;;  %v6059_v44 = vld [vmem:[%s7901_s16 + $0x68] sm:$0xff]   ;;  %v1270_v48 = vld [vmem:[%s7903_s15] sm:$0x3] }
 0x3ad   :  { %845 = vst.msk [vmem:[#allocation5 + $0x28] sm:$0xff] %vm90_vm1, %v837_v58  ;;  %997 = vst.msk [vmem:[#allocation5 + $0x68] sm:$0xff] %vm90_vm1, %v989_v59  ;;  %v810_v22 = vadd.f32 %v5976_v62, %v6657_v34  ;;  %v962_v0 = vadd.f32 %v5996_v63, %v6657_v34  ;;  %v801_v1 = vpop.f32.mrb[21].mxu0  ;;  %v953_v2 = vpop.f32.mrb[37].mxu1  ;;  %1237 = vmatpush1.bf16.msra.mxu1 %v6055_v39  ;;  %v6783_v47 = vsub.s32 0, %v1008_v46  ;;  %v6788_v50 = vsub.s32 1, %v1008_v46 }
 0x3ae   :  { %844 = vst.msk [vmem:[#allocation5 + $0x20] sm:$0xff] %vm90_vm1, %v836_v60  ;;  %996 = vst.msk [vmem:[#allocation5 + $0x60] sm:$0xff] %vm90_vm1, %v988_v61  ;;  %v802_v4 = vadd.f32 %v6657_v34, %v801_v1  ;;  %v954_v5 = vadd.f32 %v6657_v34, %v953_v2  ;;  %v5977_v6 = vpop.f32.mrb[22].mxu0  ;;  %v5997_v7 = vpop.f32.mrb[38].mxu1  ;;  %5334 = vmatmul.mubr.msk.bf16.vlgmr.msra.gmra.mrb[28].mxu0 %vm90_vm1, %v1265_v3  ;;  %1238 = vmatprep.subr.bf16.mxu1 %v6338_v23  ;;  %v6072_v37 = vld [vmem:[%s7901_s16 + $0x28] sm:$0xff]   ;;  %v6074_v39 = vld [vmem:[%s7901_s16 + $0x30] sm:$0xff]  }
 0x3af   :  { %v830_v8 = vmax.f32 %v810_v22, 0.0  ;;  %v982_v9 = vmax.f32 %v962_v0, 0.0  ;;  %v813_v10 = vadd.f32 %v5977_v6, %v6657_v34  ;;  %v965_v11 = vadd.f32 %v5997_v7, %v6657_v34  ;;  %v804_v12 = vpop.f32.mrb[23].mxu0  ;;  %v956_v13 = vpop.f32.mrb[39].mxu1  ;;  %1477 = vmatpush1.bf16.msra.mxu0 %v6034_v56  ;;  %v6080_v45 = vld [vmem:[%s7901_s16 + $0x48] sm:$0xff]   ;;  %v6081_v46 = vld [vmem:[%s7901_s16 + $0x58] sm:$0xff]  }
 0x3b0   :  { %v828_v14 = vmax.f32 %v802_v4, 0.0  ;;  %v980_v15 = vmax.f32 %v954_v5, 0.0  ;;  %v805_v16 = vadd.f32 %v6657_v34, %v804_v12  ;;  %v957_v19 = vadd.f32 %v6657_v34, %v956_v13  ;;  %1478 = vmatprep.subr.bf16.mxu0 %v6338_v23  ;;  %v6040_v34 = vld [vmem:[%s7901_s16 + $0x18] sm:$0xff]  }
 0x3b1   :  { %v831_v18 = vmax.f32 %v813_v10, 0.0  ;;  %v983_v20 = vmax.f32 %v965_v11, 0.0  ;;  %1239 = vmatpush1.bf16.msra.mxu1 %v6057_v41  ;;  %v1010_v51 = vrot.slane %v1005_v49, %v6783_v47  ;;  %v1014_v52 = vrot.slane %v1005_v49, %v6788_v50  ;;  %v6333_v11 = vld [vmem:[%s7899_s14] ss:$8 sps:$4 sm:$0xff]   ;;  %v6076_v41 = vld [vmem:[%s7901_s16 + $0x38] sm:$0xff]   ;;  %v6082_v49 = vld [vmem:[%s7901_s16 + $0x50] sm:$0xff]  }
 0x3b2   :  { %v829_v25 = vmax.f32 %v805_v16, 0.0  ;;  %v981_v17 = vmax.f32 %v957_v19, 0.0  ;;  %1570 = vmatprep.subr.bf16.mxu1 %v6332_v42  ;;  %v1275_v63 = vrot.slane %v1270_v48, %v6783_v47  ;;  %v1279_v1 = vrot.slane %v1270_v48, %v6788_v50 }
 0x3b3   :  { %v839_v26 = vpack.c.bf16 %v831_v18, %v830_v8  ;;  %v991_v27 = vpack.c.bf16 %v983_v20, %v982_v9  ;;  %1479 = vmatpush1.bf16.msra.mxu0 %v6036_v21  ;;  %v6335_v20 = vld [vmem:[%s7899_s14 + $0x10] ss:$8 sps:$4 sm:$0xff]  }
 0x3b4   :  { %v838_v28 = vpack.c.bf16 %v829_v25, %v828_v14  ;;  %v990_v29 = vpack.c.bf16 %v981_v17, %v980_v15  ;;  %1480 = vmatprep.subr.bf16.mxu0 %v6338_v23  ;;  %v6334_v14 = vld [vmem:[%s7899_s14 + $0x14] ss:$8 sps:$4 sm:$0xff]   ;;  %v1530_v25 = vld [vmem:[#allocation5 + $0x10] sm:$0xff]  ;;  %v6061_v17 = vld [vmem:[%s7901_s16 + $0x8] sm:$0xff]  }
 0x3b5   :  { %847 = vst.msk [vmem:[#allocation5 + $0x38] sm:$0xff] %vm90_vm1, %v839_v26  ;;  %999 = vst.msk [vmem:[#allocation5 + $0x78] sm:$0xff] %vm90_vm1, %v991_v27  ;;  %v6062_v26 = vld [vmem:[%s7901_s16] sm:$0xff]   ;;  %v6063_v27 = vld [vmem:[%s7901_s16 + $0x10] sm:$0xff]  }
 0x3b6   :  { %846 = vst.msk [vmem:[#allocation5 + $0x30] sm:$0xff] %vm90_vm1, %v838_v28  ;;  %998 = vst.msk [vmem:[#allocation5 + $0x70] sm:$0xff] %vm90_vm1, %v990_v29  ;;  %v1795_v28 = vld [vmem:[#allocation5 + $0x18] sm:$0xff] }
 0x3b7   :  { %1481 = vmatpush1.bf16.msra.mxu0 %v6038_v24  ;;  %v6060_v24 = vld [vmem:[%s7901_s16] sm:$0xff]   ;;  %v6064_v29 = vld [vmem:[%s7901_s16 + $0x8] sm:$0xff]  }
 0x3b8   :  { %1482 = vmatprep.subr.bf16.mxu0 %v6338_v23 }
 0x3bb   :  { %1483 = vmatpush1.bf16.msra.mxu0 %v6040_v34  ;;  %v6065_v34 = vld [vmem:[%s7901_s16 + $0x18] sm:$0xff]  }
 0x3bc   :  { %1484 = vmatprep.subr.bf16.mxu0 %v6338_v23 }
 0x3bf   :  { %1485 = vmatpush1.bf16.msra.mxu0 %v6042_v30  ;;  %v6066_v30 = vld [vmem:[%s7901_s16 + $0x10] sm:$0xff]  }
 0x3c0   :  { %1486 = vmatprep.subr.bf16.mxu0 %v6338_v23 }
 0x3c3   :  { %1487 = vmatpush1.bf16.msra.mxu0 %v6044_v31  ;;  %v6067_v31 = vld [vmem:[%s7901_s16 + $0x20] sm:$0xff]  }
 0x3c4   :  { %1488 = vmatprep.subr.bf16.mxu0 %v6338_v23 }
 0x3c7   :  { %1489 = vmatpush1.bf16.msra.mxu0 %v6046_v32  ;;  %v6068_v32 = vld [vmem:[%s7901_s16 + $0x18] sm:$0xff]  }
 0x3c8   :  { %1490 = vmatprep.subr.bf16.mxu0 %v6338_v23 }
 0x3cb   :  { %1491 = vmatpush1.bf16.msra.mxu0 %v6048_v33  ;;  %v6069_v33 = vld [vmem:[%s7901_s16 + $0x28] sm:$0xff]  }
 0x3cc   :  { %1492 = vmatprep.subr.bf16.mxu0 %v6338_v23 }
 0x3cf   :  { %1493 = vmatpush1.bf16.msra.mxu0 %v6050_v35  ;;  %v6070_v35 = vld [vmem:[%s7901_s16 + $0x20] sm:$0xff]  }
 0x3d0   :  { %1494 = vmatprep.subr.bf16.mxu0 %v6338_v23 }
 0x3d3   :  { %1495 = vmatpush1.bf16.msra.mxu0 %v6052_v36  ;;  %v6071_v36 = vld [vmem:[%s7901_s16 + $0x30] sm:$0xff]  }
 0x3d4   :  { %1496 = vmatprep.subr.bf16.mxu0 %v6338_v23 }
 0x3d7   :  { %1497 = vmatpush1.bf16.msra.mxu0 %v6054_v38  ;;  %v6073_v38 = vld [vmem:[%s7901_s16 + $0x38] sm:$0xff]  }
 0x3d8   :  { %1498 = vmatprep.subr.bf16.mxu0 %v6338_v23 }
 0x3db   :  { %1499 = vmatpush1.bf16.msra.mxu0 %v6056_v40  ;;  %v6075_v40 = vld [vmem:[%s7901_s16 + $0x40] sm:$0xff]  }
 0x3dc   :  { %1500 = vmatprep.subr.bf16.mxu0 %v6338_v23 }
 0x3df   :  { %1501 = vmatpush1.bf16.msra.mxu0 %v6058_v43  ;;  %v6078_v43 = vld [vmem:[%s7901_s16 + $0x40] sm:$0xff]  }
 0x3e0   :  { %1502 = vmatprep.subr.bf16.mxu0 %v6338_v23 }
 0x3e3   :  { %1503 = vmatpush1.bf16.msra.mxu0 %v6059_v44  ;;  %v6079_v44 = vld [vmem:[%s7901_s16 + $0x50] sm:$0xff]  }
 0x3e4   :  { %1835 = vmatprep.subr.bf16.mxu0 %v6332_v42  ;;  %v6077_v42 = vld [vmem:[%s7901_s16 + $0x48] sm:$0xff]  }
 0x479   :  { %v1074_v53 = vpop.f32.mrb[24].mxu0 }
 0x47a   :  { %v1075_v54 = vadd.f32 %v1074_v53, %v1010_v51  ;;  %v1076_v55 = vpop.f32.mrb[25].mxu0  ;;  %v6085_v53 = vld [vmem:[%s7901_s16 + $0x68] sm:$0xff]  }
 0x47b   :  { %v1077_v56 = vadd.f32 %v1076_v55, %v1014_v52  ;;  %v1078_v57 = vpop.f32.mrb[26].mxu0  ;;  %v6086_v55 = vld [vmem:[%s7901_s16 + $0x60] sm:$0xff]  }
 0x47c   :  { %v1079_v58 = vadd.f32 %v1078_v57, %v1010_v51  ;;  %v1080_v59 = vpop.f32.mrb[27].mxu0  ;;  %v1083_v61 = vmax.f32 %v1075_v54, 0.0  ;;  %v6083_v51 = vld [vmem:[%s7901_s16 + $0x60] sm:$0xff]  }
 0x47d   :  { %v1081_v60 = vadd.f32 %v1080_v59, %v1014_v52  ;;  %v1084_v22 = vmax.f32 %v1077_v56, 0.0  ;;  %v6084_v52 = vld [vmem:[%s7901_s16 + $0x58] sm:$0xff]   ;;  %v6920_v54 = vld [vmem:[%s7899_s14 + $0x4] ss:$8 sps:$4 sm:$0xff]   ;;  %v6934_v57 = vld [vmem:[%s7904_s17] ss:$0 sm:$0xff] }
 0x47e   :  { %v1085_v62 = vmax.f32 %v1079_v58, 0.0  ;;  %v6090_v56 = vld [vmem:[%s7901_s16 + $0x68] sm:$0xff]  }
 0x47f   :  { %v1086_v0 = vmax.f32 %v1081_v60, 0.0 }
 0x480   :  { %v1087_v2 = vpack.c.bf16 %v1085_v62, %v1083_v61  ;;  %v1535_v61 = vld [vmem:[%s7903_s15] sm:$0x3] }
 0x481   :  { %v1088_v3 = vpack.c.bf16 %v1086_v0, %v1084_v22  ;;  %v1339_v21 = vpop.f32.mrb[28].mxu0  ;;  %v1540_v22 = vrot.slane %v1535_v61, %v6783_v47  ;;  %v1544_v0 = vrot.slane %v1535_v61, %v6788_v50  ;;  %v6100_v61 = vld [vmem:[%s7901_s16 + $0x10] sm:$0xff]  }
 0x482   :  { %v1340_v4 = vadd.f32 %v1339_v21, %v1275_v63  ;;  %v1341_v5 = vpop.f32.mrb[29].mxu0 }
 0x483   :  { %v1342_v6 = vadd.f32 %v1341_v5, %v1279_v1  ;;  %5327 = vmatprep.mubr.msk.bf16.mxu1 %vm1208_vm3, %v1088_v3  ;;  %v1343_v7 = vpop.f32.mrb[30].mxu0 }
 0x484   :  { %v1344_v8 = vadd.f32 %v1343_v7, %v1275_v63  ;;  %1245 = vmatmul.mubr.bf16.vlgmr.msra.gmra.mrb[40].mxu1 %v1087_v2  ;;  %v1345_v9 = vpop.f32.mrb[31].mxu0  ;;  %v1348_v12 = vmax.f32 %v1340_v4, 0.0 }
 0x485   :  { %v1346_v10 = vadd.f32 %v1345_v9, %v1279_v1  ;;  %1571 = vmatpush1.bf16.msra.mxu1 %v6333_v11  ;;  %1602 = vmatprep.mubr.bf16.mxu1 %v6338_v23  ;;  %v1349_v15 = vmax.f32 %v1342_v6, 0.0  ;;  %v1800_v9 = vld [vmem:[%s7903_s15] sm:$0x3] }
 0x486   :  { %v1350_v13 = vmax.f32 %v1344_v8, 0.0  ;;  %1572 = vmatprep.subr.bf16.mxu1 %v6334_v14 }
 0x487   :  { %v1351_v16 = vmax.f32 %v1346_v10, 0.0 }
 0x488   :  { %v1352_v19 = vpack.c.bf16 %v1350_v13, %v1348_v12 }
 0x489   :  { %v1353_v18 = vpack.c.bf16 %v1351_v16, %v1349_v15  ;;  %1573 = vmatpush1.bf16.msra.mxu1 %v6335_v20 }
 0x48a   :  { %1741 = vmatprep.subr.bf16.mxu1 %v6338_v23 }
 0x48b   :  { %5350 = vmatprep.mubr.msk.bf16.mxu0 %vm1208_vm3, %v1353_v18 }
 0x48c   :  { %1509 = vmatmul.mubr.bf16.vlgmr.msra.gmra.mrb[32].mxu0 %v1352_v19  ;;  %5359 = vmatmul.mubr.msk.bf16.vlgmr.msra.gmra.mrb[44].mxu1 %vm90_vm1, %v1530_v25  ;;  %v1805_v19 = vrot.slane %v1800_v9, %v6783_v47  ;;  %v1809_v25 = vrot.slane %v1800_v9, %v6788_v50  ;;  %v6114_v9 = vld [vmem:[%s7901_s16 + $0x48] sm:$0xff]  }
 0x48d   :  { %1836 = vmatpush1.bf16.msra.mxu0 %v6333_v11  ;;  %1867 = vmatprep.mubr.bf16.mxu0 %v6338_v23 }
 0x48e   :  { %1837 = vmatprep.subr.bf16.mxu0 %v6334_v14  ;;  %1742 = vmatpush1.bf16.msra.mxu1 %v6060_v24 }
 0x48f   :  { %1743 = vmatprep.subr.bf16.mxu1 %v6338_v23 }
 0x491   :  { %1838 = vmatpush1.bf16.msra.mxu0 %v6335_v20 }
 0x492   :  { %1744 = vmatpush1.bf16.msra.mxu1 %v6061_v17  ;;  %2006 = vmatprep.subr.bf16.mxu0 %v6338_v23 }
 0x493   :  { %1745 = vmatprep.subr.bf16.mxu1 %v6338_v23 }
 0x494   :  { %5384 = vmatmul.mubr.msk.bf16.vlgmr.msra.gmra.mrb[36].mxu0 %vm90_vm1, %v1795_v28 }
 0x495   :  { %2007 = vmatpush1.bf16.msra.mxu0 %v6062_v26 }
 0x496   :  { %1746 = vmatpush1.bf16.msra.mxu1 %v6063_v27  ;;  %2008 = vmatprep.subr.bf16.mxu0 %v6338_v23 }
 0x497   :  { %1747 = vmatprep.subr.bf16.mxu1 %v6338_v23 }
 0x499   :  { %2009 = vmatpush1.bf16.msra.mxu0 %v6064_v29 }
 0x49a   :  { %1748 = vmatpush1.bf16.msra.mxu1 %v6065_v34  ;;  %2010 = vmatprep.subr.bf16.mxu0 %v6338_v23  ;;  %v6953_v34 = vld [vmem:[%s7899_s14] ss:$8 sps:$4 sm:$0xff]  }
 0x49b   :  { %1749 = vmatprep.subr.bf16.mxu1 %v6338_v23 }
 0x49d   :  { %2011 = vmatpush1.bf16.msra.mxu0 %v6066_v30 }
 0x49e   :  { %1750 = vmatpush1.bf16.msra.mxu1 %v6067_v31  ;;  %2012 = vmatprep.subr.bf16.mxu0 %v6338_v23 }
 0x49f   :  { %1751 = vmatprep.subr.bf16.mxu1 %v6338_v23 }
 0x4a1   :  { %2013 = vmatpush1.bf16.msra.mxu0 %v6068_v32  ;;  %v6958_v32 = vld [vmem:[%s7899_s14 + $0x14] ss:$8 sps:$4 sm:$0xff]  }
 0x4a2   :  { %1752 = vmatpush1.bf16.msra.mxu1 %v6069_v33  ;;  %2014 = vmatprep.subr.bf16.mxu0 %v6338_v23 }
 0x4a3   :  { %1753 = vmatprep.subr.bf16.mxu1 %v6338_v23 }
 0x4a5   :  { %2015 = vmatpush1.bf16.msra.mxu0 %v6070_v35 }
 0x4a6   :  { %1754 = vmatpush1.bf16.msra.mxu1 %v6071_v36  ;;  %2016 = vmatprep.subr.bf16.mxu0 %v6338_v23 }
 0x4a7   :  { %1755 = vmatprep.subr.bf16.mxu1 %v6338_v23 }
 0x4a9   :  { %2017 = vmatpush1.bf16.msra.mxu0 %v6072_v37 }
 0x4aa   :  { %1756 = vmatpush1.bf16.msra.mxu1 %v6073_v38  ;;  %2018 = vmatprep.subr.bf16.mxu0 %v6338_v23 }
 0x4ab   :  { %1757 = vmatprep.subr.bf16.mxu1 %v6338_v23 }
 0x4ad   :  { %2019 = vmatpush1.bf16.msra.mxu0 %v6074_v39  ;;  %v6968_v39 = vld [vmem:[%s7899_s14 + $0x10] ss:$8 sps:$4 sm:$0xff]  }
 0x4ae   :  { %1758 = vmatpush1.bf16.msra.mxu1 %v6075_v40  ;;  %2020 = vmatprep.subr.bf16.mxu0 %v6338_v23 }
 0x4af   :  { %1759 = vmatprep.subr.bf16.mxu1 %v6338_v23 }
 0x4b1   :  { %2021 = vmatpush1.bf16.msra.mxu0 %v6076_v41 }
 0x4b2   :  { %2022 = vmatprep.subr.bf16.mxu0 %v6338_v23  ;;  %1760 = vmatpush1.bf16.msra.mxu1 %v6077_v42 }
 0x4b3   :  { %1761 = vmatprep.subr.bf16.mxu1 %v6338_v23 }
 0x4b5   :  { %2023 = vmatpush1.bf16.msra.mxu0 %v6078_v43 }
 0x4b6   :  { %1762 = vmatpush1.bf16.msra.mxu1 %v6079_v44  ;;  %2024 = vmatprep.subr.bf16.mxu0 %v6338_v23 }
 0x4b7   :  { %1763 = vmatprep.subr.bf16.mxu1 %v6338_v23 }
 0x4b9   :  { %2025 = vmatpush1.bf16.msra.mxu0 %v6080_v45 }
 0x4ba   :  { %1764 = vmatpush1.bf16.msra.mxu1 %v6081_v46  ;;  %2026 = vmatprep.subr.bf16.mxu0 %v6338_v23 }
 0x4bb   :  { %1765 = vmatprep.subr.bf16.mxu1 %v6338_v23 }
 0x4bd   :  { %2027 = vmatpush1.bf16.msra.mxu0 %v6082_v49 }
 0x4be   :  { %1766 = vmatpush1.bf16.msra.mxu1 %v6083_v51  ;;  %2028 = vmatprep.subr.bf16.mxu0 %v6338_v23 }
 0x4bf   :  { %1767 = vmatprep.subr.bf16.mxu1 %v6338_v23 }
 0x4c1   :  { %2029 = vmatpush1.bf16.msra.mxu0 %v6084_v52  ;;  %v6094_v52 = vld [vmem:[%s7901_s16] sm:$0xff]  }
 0x4c2   :  { %1768 = vmatpush1.bf16.msra.mxu1 %v6085_v53  ;;  %2030 = vmatprep.subr.bf16.mxu0 %v6338_v23  ;;  %v2060_v53 = vld [vmem:[#allocation5 + $0x20] sm:$0xff] }
 0x4c3   :  { %2100 = vmatprep.subr.bf16.mxu1 %v6920_v54 }
 0x4c5   :  { %2031 = vmatpush1.bf16.msra.mxu0 %v6086_v55  ;;  %v6095_v55 = vld [vmem:[%s7901_s16 + $0x8] sm:$0xff]  }
 0x4c6   :  { %2032 = vmatprep.subr.bf16.mxu0 %v6338_v23 }
 0x4c9   :  { %2033 = vmatpush1.bf16.msra.mxu0 %v6090_v56  ;;  %v6096_v56 = vld [vmem:[%s7901_s16] sm:$0xff]  }
 0x4ca   :  { %2365 = vmatprep.subr.bf16.mxu0 %v6920_v54 }
 0x557   :  { %v1246_v48 = vpop.f32.mrb[40].mxu1 }
 0x558   :  { %v1247_v58 = vadd.f32 %v6934_v57, %v1246_v48  ;;  %v1248_v59 = vpop.f32.mrb[41].mxu1  ;;  %v6097_v48 = vld [vmem:[%s7901_s16 + $0x10] sm:$0xff]  }
 0x559   :  { %v1249_v60 = vpop.f32.mrb[42].mxu1  ;;  %v6098_v59 = vld [vmem:[%s7901_s16 + $0x8] sm:$0xff]  }
 0x55a   :  { %v1250_v62 = vadd.f32 %v6934_v57, %v1249_v60  ;;  %v1251_v63 = vpop.f32.mrb[43].mxu1  ;;  %6268 = vtanh.f32 %v1247_v58  ;;  %v2325_v58 = vld [vmem:[#allocation5 + $0x28] sm:$0xff] }
 0x55b   :  { %v6099_v60 = vld [vmem:[%s7901_s16 + $0x18] sm:$0xff]  }
 0x55c   :  { %6270 = vtanh.f32 %v1250_v62  ;;  %v6101_v62 = vld [vmem:[%s7901_s16 + $0x20] sm:$0xff]   ;;  %v6102_v63 = vld [vmem:[%s7901_s16 + $0x18] sm:$0xff]  }
 0x55f   :  { %v1510_v1 = vpop.f32.mrb[32].mxu0  ;;  %v1604_v2 = vpop.f32.mrb[44].mxu1 }
 0x560   :  { %v1511_v3 = vadd.f32 %v6934_v57, %v1510_v1  ;;  %v1605_v21 = vadd.f32 %v1604_v2, %v1540_v22  ;;  %v1512_v4 = vpop.f32.mrb[33].mxu0  ;;  %v1606_v5 = vpop.f32.mrb[45].mxu1  ;;  %v6105_v1 = vld [vmem:[%s7901_s16 + $0x30] sm:$0xff]   ;;  %v6106_v2 = vld [vmem:[%s7901_s16 + $0x28] sm:$0xff]  }
 0x561   :  { %v1607_v6 = vadd.f32 %v1606_v5, %v1544_v0  ;;  %v1513_v7 = vpop.f32.mrb[34].mxu0  ;;  %v1608_v8 = vpop.f32.mrb[46].mxu1  ;;  %v6109_v4 = vld [vmem:[%s7901_s16 + $0x40] sm:$0xff]   ;;  %v6110_v5 = vld [vmem:[%s7901_s16 + $0x38] sm:$0xff]  }
 0x562   :  { %v1514_v10 = vadd.f32 %v6934_v57, %v1513_v7  ;;  %v1609_v11 = vadd.f32 %v1608_v8, %v1540_v22  ;;  %v1515_v12 = vpop.f32.mrb[35].mxu0  ;;  %v1610_v13 = vpop.f32.mrb[47].mxu1  ;;  %6272 = vtanh.f32 %v1511_v3  ;;  %v1613_v15 = vmax.f32 %v1605_v21, 0.0  ;;  %v6103_v22 = vld [vmem:[%s7901_s16 + $0x28] sm:$0xff]   ;;  %v6107_v3 = vld [vmem:[%s7901_s16 + $0x38] sm:$0xff]   ;;  %v6108_v21 = vld [vmem:[%s7901_s16 + $0x30] sm:$0xff]  }
 0x563   :  { %v1611_v14 = vadd.f32 %v1610_v13, %v1544_v0  ;;  %v1614_v20 = vmax.f32 %v1607_v6, 0.0  ;;  %v6104_v0 = vld [vmem:[%s7901_s16 + $0x20] sm:$0xff]   ;;  %v6111_v6 = vld [vmem:[%s7901_s16 + $0x48] sm:$0xff]   ;;  %v6113_v8 = vld [vmem:[%s7901_s16 + $0x50] sm:$0xff]  }
 0x564   :  { %6274 = vtanh.f32 %v1514_v10  ;;  %v1615_v16 = vmax.f32 %v1609_v11, 0.0  ;;  %v6269_v18 = vpop.eup %6268  ;;  %v6112_v7 = vld [vmem:[%s7901_s16 + $0x40] sm:$0xff]   ;;  %v6115_v10 = vld [vmem:[%s7901_s16 + $0x58] sm:$0xff]   ;;  %v6116_v11 = vld [vmem:[%s7901_s16 + $0x50] sm:$0xff]  }
 0x565   :  { %v1616_v24 = vmax.f32 %v1611_v14, 0.0  ;;  %v6117_v12 = vld [vmem:[%s7901_s16 + $0x60] sm:$0xff]   ;;  %v6118_v13 = vld [vmem:[%s7901_s16 + $0x58] sm:$0xff]   ;;  %v6119_v14 = vld [vmem:[%s7901_s16 + $0x68] sm:$0xff]  }
 0x566   :  { %v6271_v17 = vpop.eup %6270  ;;  %v1617_v26 = vpack.c.bf16 %v1615_v16, %v1613_v15  ;;  %v6120_v15 = vld [vmem:[%s7901_s16 + $0x60] sm:$0xff]   ;;  %v6121_v16 = vld [vmem:[%s7901_s16 + $0x68] sm:$0xff]  }
 0x567   :  { %v5740_v27 = vpack.c.bf16 %v6271_v17, %v6269_v18  ;;  %v1618_v28 = vpack.c.bf16 %v1616_v24, %v1614_v20  ;;  %v1869_v29 = vpop.f32.mrb[36].mxu0 }
 0x568   :  { %v1870_v30 = vadd.f32 %v1869_v29, %v1805_v19  ;;  %v1871_v31 = vpop.f32.mrb[37].mxu0 }
 0x569   :  { %5741 = vst [vmem:[%s7905_s18] sm:$0xff] %v5740_v27   ;;  %v1872_v33 = vadd.f32 %v1871_v31, %v1809_v25  ;;  %5375 = vmatprep.mubr.msk.bf16.mxu1 %vm1208_vm3, %v1618_v28  ;;  %v1873_v35 = vpop.f32.mrb[38].mxu0 }
 0x56a   :  { %v1874_v36 = vadd.f32 %v1873_v35, %v1805_v19  ;;  %1774 = vmatmul.mubr.bf16.vlgmr.msra.gmra.mrb[48].mxu1 %v1617_v26  ;;  %v1875_v37 = vpop.f32.mrb[39].mxu0  ;;  %v1878_v40 = vmax.f32 %v1870_v30, 0.0 }
 0x56b   :  { %v1876_v38 = vadd.f32 %v1875_v37, %v1809_v25  ;;  %2101 = vmatpush1.bf16.msra.mxu1 %v6953_v34  ;;  %2132 = vmatprep.mubr.bf16.mxu1 %v6338_v23  ;;  %v1879_v43 = vmax.f32 %v1872_v33, 0.0  ;;  %v2065_v25 = vld [vmem:[%s7903_s15] sm:$0x3] }
 0x56c   :  { %v1880_v41 = vmax.f32 %v1874_v36, 0.0  ;;  %2102 = vmatprep.subr.bf16.mxu1 %v6958_v32  ;;  %v6273_v42 = vpop.eup %6272  ;;  %v2070_v27 = vrot.slane %v2065_v25, %v6783_v47  ;;  %v2074_v28 = vrot.slane %v2065_v25, %v6788_v50  ;;  %v6128_v25 = vld [vmem:[%s7901_s16 + $0x10] sm:$0xff]  }
 0x56d   :  { %v1881_v44 = vmax.f32 %v1876_v38, 0.0 }
 0x56e   :  { %v6275_v45 = vpop.eup %6274  ;;  %v1882_v46 = vpack.c.bf16 %v1880_v41, %v1878_v40  ;;  %v2330_v41 = vld [vmem:[%s7903_s15] sm:$0x3] }
 0x56f   :  { %v5745_v49 = vpack.c.bf16 %v6275_v45, %v6273_v42  ;;  %v1883_v51 = vpack.c.bf16 %v1881_v44, %v1879_v43  ;;  %2103 = vmatpush1.bf16.msra.mxu1 %v6968_v39 }
 0x570   :  { %2271 = vmatprep.subr.bf16.mxu1 %v6338_v23 }
 0x571   :  { %5817 = vst [vmem:[%s7905_s18 + $0x40] sm:$0xff] %v5745_v49   ;;  %5400 = vmatprep.mubr.msk.bf16.mxu0 %vm1208_vm3, %v1883_v51 }
 0x572   :  { %2039 = vmatmul.mubr.bf16.vlgmr.msra.gmra.mrb[40].mxu0 %v1882_v46  ;;  %5409 = vmatmul.mubr.msk.bf16.vlgmr.msra.gmra.mrb[52].mxu1 %vm90_vm1, %v2060_v53 }
 0x573   :  { %2366 = vmatpush1.bf16.msra.mxu0 %v6953_v34  ;;  %2397 = vmatprep.mubr.bf16.mxu0 %v6338_v23 }
 0x574   :  { %2367 = vmatprep.subr.bf16.mxu0 %v6958_v32  ;;  %2272 = vmatpush1.bf16.msra.mxu1 %v6094_v52  ;;  %v2335_v52 = vrot.slane %v2330_v41, %v6783_v47 }
 0x575   :  { %2273 = vmatprep.subr.bf16.mxu1 %v6338_v23 }
 0x577   :  { %2368 = vmatpush1.bf16.msra.mxu0 %v6968_v39 }
 0x578   :  { %2274 = vmatpush1.bf16.msra.mxu1 %v6095_v55  ;;  %2536 = vmatprep.subr.bf16.mxu0 %v6338_v23 }
 0x579   :  { %2275 = vmatprep.subr.bf16.mxu1 %v6338_v23 }
 0x57a   :  { %5434 = vmatmul.mubr.msk.bf16.vlgmr.msra.gmra.mrb[44].mxu0 %vm90_vm1, %v2325_v58 }
 0x57b   :  { %2537 = vmatpush1.bf16.msra.mxu0 %v6096_v56 }
 0x57c   :  { %2276 = vmatpush1.bf16.msra.mxu1 %v6097_v48  ;;  %2538 = vmatprep.subr.bf16.mxu0 %v6338_v23  ;;  %v2339_v48 = vrot.slane %v2330_v41, %v6788_v50  ;;  %v6142_v41 = vld [vmem:[%s7901_s16 + $0x48] sm:$0xff]  }
 0x57d   :  { %2277 = vmatprep.subr.bf16.mxu1 %v6338_v23 }
 0x57f   :  { %2539 = vmatpush1.bf16.msra.mxu0 %v6098_v59 }
 0x580   :  { %2278 = vmatpush1.bf16.msra.mxu1 %v6099_v60  ;;  %2540 = vmatprep.subr.bf16.mxu0 %v6338_v23 }
 0x581   :  { %2279 = vmatprep.subr.bf16.mxu1 %v6338_v23 }
 0x583   :  { %2541 = vmatpush1.bf16.msra.mxu0 %v6100_v61 }
 0x584   :  { %2280 = vmatpush1.bf16.msra.mxu1 %v6101_v62  ;;  %2542 = vmatprep.subr.bf16.mxu0 %v6338_v23 }
 0x585   :  { %2281 = vmatprep.subr.bf16.mxu1 %v6338_v23 }
 0x587   :  { %2543 = vmatpush1.bf16.msra.mxu0 %v6102_v63 }
 0x588   :  { %2282 = vmatpush1.bf16.msra.mxu1 %v6103_v22  ;;  %2544 = vmatprep.subr.bf16.mxu0 %v6338_v23 }
 0x589   :  { %2283 = vmatprep.subr.bf16.mxu1 %v6338_v23 }
 0x58b   :  { %2545 = vmatpush1.bf16.msra.mxu0 %v6104_v0 }
 0x58c   :  { %2284 = vmatpush1.bf16.msra.mxu1 %v6105_v1  ;;  %2546 = vmatprep.subr.bf16.mxu0 %v6338_v23 }
 0x58d   :  { %2285 = vmatprep.subr.bf16.mxu1 %v6338_v23 }
 0x58f   :  { %2547 = vmatpush1.bf16.msra.mxu0 %v6106_v2 }
 0x590   :  { %2286 = vmatpush1.bf16.msra.mxu1 %v6107_v3  ;;  %2548 = vmatprep.subr.bf16.mxu0 %v6338_v23 }
 0x591   :  { %2287 = vmatprep.subr.bf16.mxu1 %v6338_v23 }
 0x593   :  { %2549 = vmatpush1.bf16.msra.mxu0 %v6108_v21 }
 0x594   :  { %2288 = vmatpush1.bf16.msra.mxu1 %v6109_v4  ;;  %2550 = vmatprep.subr.bf16.mxu0 %v6338_v23 }
 0x595   :  { %2289 = vmatprep.subr.bf16.mxu1 %v6338_v23 }
 0x597   :  { %2551 = vmatpush1.bf16.msra.mxu0 %v6110_v5 }
 0x598   :  { %2552 = vmatprep.subr.bf16.mxu0 %v6338_v23  ;;  %2290 = vmatpush1.bf16.msra.mxu1 %v6111_v6 }
 0x599   :  { %2291 = vmatprep.subr.bf16.mxu1 %v6338_v23 }
 0x59b   :  { %2553 = vmatpush1.bf16.msra.mxu0 %v6112_v7 }
 0x59c   :  { %2292 = vmatpush1.bf16.msra.mxu1 %v6113_v8  ;;  %2554 = vmatprep.subr.bf16.mxu0 %v6338_v23 }
 0x59d   :  { %2293 = vmatprep.subr.bf16.mxu1 %v6338_v23 }
 0x59f   :  { %2555 = vmatpush1.bf16.msra.mxu0 %v6114_v9 }
 0x5a0   :  { %2294 = vmatpush1.bf16.msra.mxu1 %v6115_v10  ;;  %2556 = vmatprep.subr.bf16.mxu0 %v6338_v23 }
 0x5a1   :  { %2295 = vmatprep.subr.bf16.mxu1 %v6338_v23 }
 0x5a3   :  { %2557 = vmatpush1.bf16.msra.mxu0 %v6116_v11 }
 0x5a4   :  { %2296 = vmatpush1.bf16.msra.mxu1 %v6117_v12  ;;  %2558 = vmatprep.subr.bf16.mxu0 %v6338_v23 }
 0x5a5   :  { %2297 = vmatprep.subr.bf16.mxu1 %v6338_v23 }
 0x5a7   :  { %2559 = vmatpush1.bf16.msra.mxu0 %v6118_v13  ;;  %v6122_v13 = vld [vmem:[%s7901_s16] sm:$0xff]  }
 0x5a8   :  { %2298 = vmatpush1.bf16.msra.mxu1 %v6119_v14  ;;  %2560 = vmatprep.subr.bf16.mxu0 %v6338_v23  ;;  %v2590_v14 = vld [vmem:[#allocation5 + $0x30] sm:$0xff] }
 0x5a9   :  { %2630 = vmatprep.subr.bf16.mxu1 %v6920_v54 }
 0x5ab   :  { %2561 = vmatpush1.bf16.msra.mxu0 %v6120_v15  ;;  %v6123_v15 = vld [vmem:[%s7901_s16 + $0x8] sm:$0xff]  }
 0x5ac   :  { %2562 = vmatprep.subr.bf16.mxu0 %v6338_v23 }
 0x5af   :  { %2563 = vmatpush1.bf16.msra.mxu0 %v6121_v16  ;;  %v6124_v16 = vld [vmem:[%s7901_s16] sm:$0xff]  }
 0x5b0   :  { %2895 = vmatprep.subr.bf16.mxu0 %v6920_v54 }
 0x63d   :  { %v1775_v19 = vpop.f32.mrb[48].mxu1 }
 0x63e   :  { %v1776_v18 = vadd.f32 %v6934_v57, %v1775_v19  ;;  %v1777_v20 = vpop.f32.mrb[49].mxu1  ;;  %v6125_v19 = vld [vmem:[%s7901_s16 + $0x10] sm:$0xff]  }
 0x63f   :  { %v1778_v24 = vpop.f32.mrb[50].mxu1  ;;  %v6126_v20 = vld [vmem:[%s7901_s16 + $0x8] sm:$0xff]  }
 0x640   :  { %v1779_v17 = vadd.f32 %v6934_v57, %v1778_v24  ;;  %v1780_v26 = vpop.f32.mrb[51].mxu1  ;;  %6276 = vtanh.f32 %v1776_v18  ;;  %v2855_v18 = vld [vmem:[#allocation5 + $0x38] sm:$0xff]  ;;  %v6127_v24 = vld [vmem:[%s7901_s16 + $0x18] sm:$0xff]  }
 0x641   :  { %v6130_v26 = vld [vmem:[%s7901_s16 + $0x18] sm:$0xff]  }
 0x642   :  { %6278 = vtanh.f32 %v1779_v17  ;;  %v6129_v17 = vld [vmem:[%s7901_s16 + $0x20] sm:$0xff]  }
 0x645   :  { %v2040_v29 = vpop.f32.mrb[40].mxu0  ;;  %v2134_v30 = vpop.f32.mrb[52].mxu1 }
 0x646   :  { %v2041_v31 = vadd.f32 %v6934_v57, %v2040_v29  ;;  %v2135_v33 = vadd.f32 %v2134_v30, %v2070_v27  ;;  %v2042_v35 = vpop.f32.mrb[41].mxu0  ;;  %v2136_v36 = vpop.f32.mrb[53].mxu1  ;;  %v6133_v29 = vld [vmem:[%s7901_s16 + $0x30] sm:$0xff]   ;;  %v6134_v30 = vld [vmem:[%s7901_s16 + $0x28] sm:$0xff]  }
 0x647   :  { %v2137_v37 = vadd.f32 %v2136_v36, %v2074_v28  ;;  %v2043_v38 = vpop.f32.mrb[42].mxu0  ;;  %v2138_v40 = vpop.f32.mrb[54].mxu1  ;;  %v6137_v35 = vld [vmem:[%s7901_s16 + $0x40] sm:$0xff]   ;;  %v6138_v36 = vld [vmem:[%s7901_s16 + $0x38] sm:$0xff]  }
 0x648   :  { %v2044_v42 = vadd.f32 %v6934_v57, %v2043_v38  ;;  %v2139_v43 = vadd.f32 %v2138_v40, %v2070_v27  ;;  %v2045_v44 = vpop.f32.mrb[43].mxu0  ;;  %v2140_v45 = vpop.f32.mrb[55].mxu1  ;;  %6280 = vtanh.f32 %v2041_v31  ;;  %v2143_v49 = vmax.f32 %v2135_v33, 0.0  ;;  %v6131_v27 = vld [vmem:[%s7901_s16 + $0x28] sm:$0xff]   ;;  %v6135_v31 = vld [vmem:[%s7901_s16 + $0x38] sm:$0xff]   ;;  %v6136_v33 = vld [vmem:[%s7901_s16 + $0x30] sm:$0xff]  }
 0x649   :  { %v2141_v46 = vadd.f32 %v2140_v45, %v2074_v28  ;;  %v2144_v55 = vmax.f32 %v2137_v37, 0.0  ;;  %v6132_v28 = vld [vmem:[%s7901_s16 + $0x20] sm:$0xff]   ;;  %v6139_v37 = vld [vmem:[%s7901_s16 + $0x48] sm:$0xff]   ;;  %v6141_v40 = vld [vmem:[%s7901_s16 + $0x50] sm:$0xff]  }
 0x64a   :  { %6282 = vtanh.f32 %v2044_v42  ;;  %v2145_v51 = vmax.f32 %v2139_v43, 0.0  ;;  %v6277_v53 = vpop.eup %6276  ;;  %v6140_v38 = vld [vmem:[%s7901_s16 + $0x40] sm:$0xff]   ;;  %v6143_v42 = vld [vmem:[%s7901_s16 + $0x58] sm:$0xff]   ;;  %v6144_v43 = vld [vmem:[%s7901_s16 + $0x50] sm:$0xff]  }
 0x64b   :  { %v2146_v56 = vmax.f32 %v2141_v46, 0.0  ;;  %v6145_v44 = vld [vmem:[%s7901_s16 + $0x60] sm:$0xff]   ;;  %v6146_v45 = vld [vmem:[%s7901_s16 + $0x58] sm:$0xff]   ;;  %v6147_v46 = vld [vmem:[%s7901_s16 + $0x68] sm:$0xff]  }
 0x64c   :  { %v6279_v58 = vpop.eup %6278  ;;  %v2147_v59 = vpack.c.bf16 %v2145_v51, %v2143_v49  ;;  %v6148_v49 = vld [vmem:[%s7901_s16 + $0x60] sm:$0xff]   ;;  %v6149_v51 = vld [vmem:[%s7901_s16 + $0x68] sm:$0xff]  }
 0x64d   :  { %v5750_v60 = vpack.c.bf16 %v6279_v58, %v6277_v53  ;;  %v2148_v61 = vpack.c.bf16 %v2146_v56, %v2144_v55  ;;  %v2399_v62 = vpop.f32.mrb[44].mxu0 }
 0x64e   :  { %v2400_v63 = vadd.f32 %v2399_v62, %v2335_v52  ;;  %v2401_v22 = vpop.f32.mrb[45].mxu0 }
 0x64f   :  { %5818 = vst [vmem:[%s7905_s18 + $0x20] sm:$0xff] %v5750_v60   ;;  %v2402_v0 = vadd.f32 %v2401_v22, %v2339_v48  ;;  %5425 = vmatprep.mubr.msk.bf16.mxu1 %vm1208_vm3, %v2148_v61  ;;  %v2403_v1 = vpop.f32.mrb[46].mxu0 }
 0x650   :  { %v2404_v2 = vadd.f32 %v2403_v1, %v2335_v52  ;;  %2304 = vmatmul.mubr.bf16.vlgmr.msra.gmra.mrb[56].mxu1 %v2147_v59  ;;  %v2405_v3 = vpop.f32.mrb[47].mxu0  ;;  %v2408_v4 = vmax.f32 %v2400_v63, 0.0 }
 0x651   :  { %v2406_v21 = vadd.f32 %v2405_v3, %v2339_v48  ;;  %2631 = vmatpush1.bf16.msra.mxu1 %v6953_v34  ;;  %2662 = vmatprep.mubr.bf16.mxu1 %v6338_v23  ;;  %v2409_v7 = vmax.f32 %v2402_v0, 0.0  ;;  %v2595_v48 = vld [vmem:[%s7903_s15] sm:$0x3] }
 0x652   :  { %v2410_v5 = vmax.f32 %v2404_v2, 0.0  ;;  %2632 = vmatprep.subr.bf16.mxu1 %v6958_v32  ;;  %v6281_v6 = vpop.eup %6280  ;;  %v2600_v60 = vrot.slane %v2595_v48, %v6783_v47  ;;  %v2604_v61 = vrot.slane %v2595_v48, %v6788_v50  ;;  %v6161_v48 = vld [vmem:[%s7901_s16 + $0x30] sm:$0xff]  }
 0x653   :  { %v2411_v8 = vmax.f32 %v2406_v21, 0.0 }
 0x654   :  { %v6283_v9 = vpop.eup %6282  ;;  %v2412_v10 = vpack.c.bf16 %v2410_v5, %v2408_v4  ;;  %v2860_v4 = vld [vmem:[%s7903_s15] sm:$0x3] }
 0x655   :  { %v5755_v11 = vpack.c.bf16 %v6283_v9, %v6281_v6  ;;  %v2413_v12 = vpack.c.bf16 %v2411_v8, %v2409_v7  ;;  %2633 = vmatpush1.bf16.msra.mxu1 %v6968_v39 }
 0x656   :  { %2801 = vmatprep.subr.bf16.mxu1 %v6338_v23 }
 0x657   :  { %5819 = vst [vmem:[%s7905_s18 + $0x60] sm:$0xff] %v5755_v11   ;;  %5450 = vmatprep.mubr.msk.bf16.mxu0 %vm1208_vm3, %v2413_v12  ;;  %v2865_v12 = vrot.slane %v2860_v4, %v6783_v47 }
 0x658   :  { %2569 = vmatmul.mubr.bf16.vlgmr.msra.gmra.mrb[48].mxu0 %v2412_v10  ;;  %5459 = vmatmul.mubr.msk.bf16.vlgmr.msra.gmra.mrb[60].mxu1 %vm90_vm1, %v2590_v14 }
 0x659   :  { %2896 = vmatpush1.bf16.msra.mxu0 %v6953_v34  ;;  %2927 = vmatprep.mubr.bf16.mxu0 %v6338_v23 }
 0x65a   :  { %2897 = vmatprep.subr.bf16.mxu0 %v6958_v32  ;;  %2802 = vmatpush1.bf16.msra.mxu1 %v6122_v13 }
 0x65b   :  { %2803 = vmatprep.subr.bf16.mxu1 %v6338_v23 }
 0x65d   :  { %2898 = vmatpush1.bf16.msra.mxu0 %v6968_v39 }
 0x65e   :  { %2804 = vmatpush1.bf16.msra.mxu1 %v6123_v15  ;;  %3066 = vmatprep.subr.bf16.mxu0 %v6338_v23 }
 0x65f   :  { %2805 = vmatprep.subr.bf16.mxu1 %v6338_v23 }
 0x660   :  { %5484 = vmatmul.mubr.msk.bf16.vlgmr.msra.gmra.mrb[52].mxu0 %vm90_vm1, %v2855_v18 }
 0x661   :  { %3067 = vmatpush1.bf16.msra.mxu0 %v6124_v16  ;;  %v2869_v16 = vrot.slane %v2860_v4, %v6788_v50  ;;  %v6175_v4 = vld [vmem:[%s7901_s16 + $0x68] sm:$0xff]  }
 0x662   :  { %2806 = vmatpush1.bf16.msra.mxu1 %v6125_v19  ;;  %3068 = vmatprep.subr.bf16.mxu0 %v6338_v23 }
 0x663   :  { %2807 = vmatprep.subr.bf16.mxu1 %v6338_v23 }
 0x665   :  { %3069 = vmatpush1.bf16.msra.mxu0 %v6126_v20 }
 0x666   :  { %2808 = vmatpush1.bf16.msra.mxu1 %v6127_v24  ;;  %3070 = vmatprep.subr.bf16.mxu0 %v6338_v23 }
 0x667   :  { %2809 = vmatprep.subr.bf16.mxu1 %v6338_v23 }
 0x669   :  { %3071 = vmatpush1.bf16.msra.mxu0 %v6128_v25 }
 0x66a   :  { %2810 = vmatpush1.bf16.msra.mxu1 %v6129_v17  ;;  %3072 = vmatprep.subr.bf16.mxu0 %v6338_v23 }
 0x66b   :  { %2811 = vmatprep.subr.bf16.mxu1 %v6338_v23 }
 0x66d   :  { %3073 = vmatpush1.bf16.msra.mxu0 %v6130_v26 }
 0x66e   :  { %2812 = vmatpush1.bf16.msra.mxu1 %v6131_v27  ;;  %3074 = vmatprep.subr.bf16.mxu0 %v6338_v23 }
 0x66f   :  { %2813 = vmatprep.subr.bf16.mxu1 %v6338_v23 }
 0x671   :  { %3075 = vmatpush1.bf16.msra.mxu0 %v6132_v28 }
 0x672   :  { %2814 = vmatpush1.bf16.msra.mxu1 %v6133_v29  ;;  %3076 = vmatprep.subr.bf16.mxu0 %v6338_v23 }
 0x673   :  { %2815 = vmatprep.subr.bf16.mxu1 %v6338_v23 }
 0x675   :  { %3077 = vmatpush1.bf16.msra.mxu0 %v6134_v30 }
 0x676   :  { %2816 = vmatpush1.bf16.msra.mxu1 %v6135_v31  ;;  %3078 = vmatprep.subr.bf16.mxu0 %v6338_v23 }
 0x677   :  { %2817 = vmatprep.subr.bf16.mxu1 %v6338_v23 }
 0x679   :  { %3079 = vmatpush1.bf16.msra.mxu0 %v6136_v33 }
 0x67a   :  { %2818 = vmatpush1.bf16.msra.mxu1 %v6137_v35  ;;  %3080 = vmatprep.subr.bf16.mxu0 %v6338_v23 }
 0x67b   :  { %2819 = vmatprep.subr.bf16.mxu1 %v6338_v23 }
 0x67d   :  { %3081 = vmatpush1.bf16.msra.mxu0 %v6138_v36 }
 0x67e   :  { %3082 = vmatprep.subr.bf16.mxu0 %v6338_v23  ;;  %2820 = vmatpush1.bf16.msra.mxu1 %v6139_v37 }
 0x67f   :  { %2821 = vmatprep.subr.bf16.mxu1 %v6338_v23 }
 0x681   :  { %3083 = vmatpush1.bf16.msra.mxu0 %v6140_v38 }
 0x682   :  { %2822 = vmatpush1.bf16.msra.mxu1 %v6141_v40  ;;  %3084 = vmatprep.subr.bf16.mxu0 %v6338_v23 }
 0x683   :  { %2823 = vmatprep.subr.bf16.mxu1 %v6338_v23 }
 0x685   :  { %3085 = vmatpush1.bf16.msra.mxu0 %v6142_v41 }
 0x686   :  { %2824 = vmatpush1.bf16.msra.mxu1 %v6143_v42  ;;  %3086 = vmatprep.subr.bf16.mxu0 %v6338_v23 }
 0x687   :  { %2825 = vmatprep.subr.bf16.mxu1 %v6338_v23 }
 0x689   :  { %3087 = vmatpush1.bf16.msra.mxu0 %v6144_v43  ;;  %v6150_v43 = vld [vmem:[%s7901_s16] sm:$0xff]  }
 0x68a   :  { %2826 = vmatpush1.bf16.msra.mxu1 %v6145_v44  ;;  %3088 = vmatprep.subr.bf16.mxu0 %v6338_v23  ;;  %v3120_v44 = vld [vmem:[#allocation5 + $0x40] sm:$0xff] }
 0x68b   :  { %2827 = vmatprep.subr.bf16.mxu1 %v6338_v23 }
 0x68d   :  { %3089 = vmatpush1.bf16.msra.mxu0 %v6146_v45  ;;  %v6151_v45 = vld [vmem:[%s7901_s16 + $0x8] sm:$0xff]  }
 0x68e   :  { %2828 = vmatpush1.bf16.msra.mxu1 %v6147_v46  ;;  %3090 = vmatprep.subr.bf16.mxu0 %v6338_v23  ;;  %v6152_v46 = vld [vmem:[%s7901_s16] sm:$0xff]  }
 0x68f   :  { %3160 = vmatprep.subr.bf16.mxu1 %v6920_v54 }
 0x691   :  { %3091 = vmatpush1.bf16.msra.mxu0 %v6148_v49  ;;  %v6155_v49 = vld [vmem:[%s7901_s16 + $0x18] sm:$0xff]  }
 0x692   :  { %3092 = vmatprep.subr.bf16.mxu0 %v6338_v23 }
 0x695   :  { %3093 = vmatpush1.bf16.msra.mxu0 %v6149_v51  ;;  %v6156_v51 = vld [vmem:[%s7901_s16 + $0x10] sm:$0xff]  }
 0x696   :  { %3425 = vmatprep.subr.bf16.mxu0 %v6920_v54 }
 0x723   :  { %v2305_v52 = vpop.f32.mrb[56].mxu1 }
 0x724   :  { %v2306_v53 = vadd.f32 %v6934_v57, %v2305_v52  ;;  %v2307_v55 = vpop.f32.mrb[57].mxu1  ;;  %v6157_v52 = vld [vmem:[%s7901_s16 + $0x20] sm:$0xff]  }
 0x725   :  { %v2308_v56 = vpop.f32.mrb[58].mxu1  ;;  %v6159_v55 = vld [vmem:[%s7901_s16 + $0x28] sm:$0xff]  }
 0x726   :  { %v2309_v58 = vadd.f32 %v6934_v57, %v2308_v56  ;;  %v2310_v59 = vpop.f32.mrb[59].mxu1  ;;  %6284 = vtanh.f32 %v2306_v53  ;;  %v6158_v53 = vld [vmem:[%s7901_s16 + $0x18] sm:$0xff]   ;;  %v6160_v56 = vld [vmem:[%s7901_s16 + $0x20] sm:$0xff]  }
 0x727   :  { %v6163_v59 = vld [vmem:[%s7901_s16 + $0x38] sm:$0xff]  }
 0x728   :  { %6286 = vtanh.f32 %v2309_v58  ;;  %v6162_v58 = vld [vmem:[%s7901_s16 + $0x28] sm:$0xff]  }
 0x72b   :  { %v2570_v62 = vpop.f32.mrb[48].mxu0  ;;  %v2664_v54 = vpop.f32.mrb[60].mxu1 }
 0x72c   :  { %v2571_v63 = vadd.f32 %v6934_v57, %v2570_v62  ;;  %v2665_v22 = vadd.f32 %v2664_v54, %v2600_v60  ;;  %v2572_v0 = vpop.f32.mrb[49].mxu0  ;;  %v2666_v1 = vpop.f32.mrb[61].mxu1  ;;  %v6166_v62 = vld [vmem:[%s7901_s16 + $0x38] sm:$0xff]   ;;  %v6167_v54 = vld [vmem:[%s7901_s16 + $0x48] sm:$0xff]  }
 0x72d   :  { %v2667_v2 = vadd.f32 %v2666_v1, %v2604_v61  ;;  %v2573_v3 = vpop.f32.mrb[50].mxu0  ;;  %v2668_v21 = vpop.f32.mrb[62].mxu1  ;;  %v6170_v0 = vld [vmem:[%s7901_s16 + $0x48] sm:$0xff]   ;;  %v6171_v1 = vld [vmem:[%s7901_s16 + $0x58] sm:$0xff]  }
 0x72e   :  { %v2574_v5 = vadd.f32 %v6934_v57, %v2573_v3  ;;  %v2669_v6 = vadd.f32 %v2668_v21, %v2600_v60  ;;  %v2575_v7 = vpop.f32.mrb[51].mxu0  ;;  %v2670_v8 = vpop.f32.mrb[63].mxu1  ;;  %6288 = vtanh.f32 %v2571_v63  ;;  %v2673_v10 = vmax.f32 %v2665_v22, 0.0  ;;  %v6164_v60 = vld [vmem:[%s7901_s16 + $0x30] sm:$0xff]   ;;  %v6168_v63 = vld [vmem:[%s7901_s16 + $0x40] sm:$0xff]   ;;  %v6174_v21 = vld [vmem:[%s7901_s16 + $0x58] sm:$0xff]  }
 0x72f   :  { %v2671_v9 = vadd.f32 %v2670_v8, %v2604_v61  ;;  %v2674_v14 = vmax.f32 %v2667_v2, 0.0  ;;  %v6165_v61 = vld [vmem:[%s7901_s16 + $0x40] sm:$0xff]   ;;  %v6169_v22 = vld [vmem:[%s7901_s16 + $0x50] sm:$0xff]   ;;  %v6180_v7 = vld [vmem:[%s7901_s16 + $0x68] sm:$0xff]  }
 0x730   :  { %6290 = vtanh.f32 %v2574_v5  ;;  %v2675_v11 = vmax.f32 %v2669_v6, 0.0  ;;  %v6285_v13 = vpop.eup %6284  ;;  %v6172_v2 = vld [vmem:[%s7901_s16 + $0x50] sm:$0xff]   ;;  %v6173_v3 = vld [vmem:[%s7901_s16 + $0x60] sm:$0xff]  }
 0x731   :  { %v2676_v15 = vmax.f32 %v2671_v9, 0.0  ;;  %v7383_v5 = vld [vmem:[%s7899_s14 + $0x4] ss:$8 sps:$4 sm:$0xff]   ;;  %v7397_v8 = vld [vmem:[%s7904_s17] ss:$0 sm:$0xff] }
 0x732   :  { %v6287_v19 = vpop.eup %6286  ;;  %v2677_v18 = vpack.c.bf16 %v2675_v11, %v2673_v10  ;;  %v6176_v6 = vld [vmem:[%s7901_s16 + $0x60] sm:$0xff]  }
 0x733   :  { %v5760_v20 = vpack.c.bf16 %v6287_v19, %v6285_v13  ;;  %v2678_v24 = vpack.c.bf16 %v2676_v15, %v2674_v14  ;;  %v2929_v57 = vpop.f32.mrb[52].mxu0  ;;  %v3125_v13 = vld [vmem:[%s7903_s15] sm:$0x3] }
 0x734   :  { %v2930_v25 = vadd.f32 %v2929_v57, %v2865_v12  ;;  %v2931_v17 = vpop.f32.mrb[53].mxu0  ;;  %v3134_v19 = vrot.slane %v3125_v13, %v6788_v50 }
 0x735   :  { %5820 = vst [vmem:[%s7905_s18 + $0x10] sm:$0xff] %v5760_v20   ;;  %v2932_v26 = vadd.f32 %v2931_v17, %v2869_v16  ;;  %5475 = vmatprep.mubr.msk.bf16.mxu1 %vm1208_vm3, %v2678_v24  ;;  %v2933_v27 = vpop.f32.mrb[54].mxu0 }
 0x736   :  { %v2934_v28 = vadd.f32 %v2933_v27, %v2865_v12  ;;  %2834 = vmatmul.mubr.bf16.vlgmr.msra.gmra.mrb[64].mxu1 %v2677_v18  ;;  %v2935_v29 = vpop.f32.mrb[55].mxu0  ;;  %v2938_v31 = vmax.f32 %v2930_v25, 0.0 }
 0x737   :  { %v2936_v30 = vadd.f32 %v2935_v29, %v2869_v16  ;;  %3161 = vmatpush1.bf16.msra.mxu1 %v6953_v34  ;;  %3192 = vmatprep.mubr.bf16.mxu1 %v6338_v23  ;;  %v2939_v36 = vmax.f32 %v2932_v26, 0.0  ;;  %v3130_v16 = vrot.slane %v3125_v13, %v6783_v47  ;;  %v3390_v29 = vld [vmem:[%s7903_s15] sm:$0x3]  ;;  %v6190_v13 = vld [vmem:[%s7901_s16 + $0x10] sm:$0xff]  }
 0x738   :  { %v2940_v33 = vmax.f32 %v2934_v28, 0.0  ;;  %3162 = vmatprep.subr.bf16.mxu1 %v6958_v32  ;;  %v6289_v35 = vpop.eup %6288 }
 0x739   :  { %v2941_v37 = vmax.f32 %v2936_v30, 0.0 }
 0x73a   :  { %v6291_v38 = vpop.eup %6290  ;;  %v2942_v40 = vpack.c.bf16 %v2940_v33, %v2938_v31 }
 0x73b   :  { %v5765_v41 = vpack.c.bf16 %v6291_v38, %v6289_v35  ;;  %v2943_v42 = vpack.c.bf16 %v2941_v37, %v2939_v36  ;;  %3163 = vmatpush1.bf16.msra.mxu1 %v6968_v39 }
 0x73c   :  { %3331 = vmatprep.subr.bf16.mxu1 %v6338_v23 }
 0x73d   :  { %5821 = vst [vmem:[%s7905_s18 + $0x50] sm:$0xff] %v5765_v41   ;;  %5500 = vmatprep.mubr.msk.bf16.mxu0 %vm1208_vm3, %v2943_v42 }
 0x73e   :  { %3099 = vmatmul.mubr.bf16.vlgmr.msra.gmra.mrb[56].mxu0 %v2942_v40  ;;  %5509 = vmatmul.mubr.msk.bf16.vlgmr.msra.gmra.mrb[68].mxu1 %vm90_vm1, %v3120_v44  ;;  %v3395_v40 = vrot.slane %v3390_v29, %v6783_v47  ;;  %v3399_v44 = vrot.slane %v3390_v29, %v6788_v50  ;;  %v6204_v29 = vld [vmem:[%s7901_s16 + $0x48] sm:$0xff]  }
 0x73f   :  { %3426 = vmatpush1.bf16.msra.mxu0 %v6953_v34  ;;  %3457 = vmatprep.mubr.bf16.mxu0 %v6338_v23  ;;  %v6153_v34 = vld [vmem:[%s7901_s16 + $0x10] sm:$0xff]  }
 0x740   :  { %3427 = vmatprep.subr.bf16.mxu0 %v6958_v32  ;;  %3332 = vmatpush1.bf16.msra.mxu1 %v6150_v43  ;;  %v3385_v32 = vld [vmem:[#allocation5 + $0x48] sm:$0xff] }
 0x741   :  { %3333 = vmatprep.subr.bf16.mxu1 %v6338_v23 }
 0x743   :  { %3428 = vmatpush1.bf16.msra.mxu0 %v6968_v39  ;;  %v6154_v39 = vld [vmem:[%s7901_s16 + $0x8] sm:$0xff]  }
 0x744   :  { %3334 = vmatpush1.bf16.msra.mxu1 %v6151_v45  ;;  %3596 = vmatprep.subr.bf16.mxu0 %v6338_v23 }
 0x745   :  { %3335 = vmatprep.subr.bf16.mxu1 %v6338_v23 }
 0x746   :  { %5534 = vmatmul.mubr.msk.bf16.vlgmr.msra.gmra.mrb[60].mxu0 %vm90_vm1, %v3385_v32 }
 0x747   :  { %3597 = vmatpush1.bf16.msra.mxu0 %v6152_v46 }
 0x748   :  { %3336 = vmatpush1.bf16.msra.mxu1 %v6153_v34  ;;  %3598 = vmatprep.subr.bf16.mxu0 %v6338_v23 }
 0x749   :  { %3337 = vmatprep.subr.bf16.mxu1 %v6338_v23 }
 0x74b   :  { %3599 = vmatpush1.bf16.msra.mxu0 %v6154_v39 }
 0x74c   :  { %3338 = vmatpush1.bf16.msra.mxu1 %v6155_v49  ;;  %3600 = vmatprep.subr.bf16.mxu0 %v6338_v23  ;;  %v7416_v49 = vld [vmem:[%s7899_s14] ss:$8 sps:$4 sm:$0xff]  }
 0x74d   :  { %3339 = vmatprep.subr.bf16.mxu1 %v6338_v23 }
 0x74f   :  { %3601 = vmatpush1.bf16.msra.mxu0 %v6156_v51 }
 0x750   :  { %3340 = vmatpush1.bf16.msra.mxu1 %v6157_v52  ;;  %3602 = vmatprep.subr.bf16.mxu0 %v6338_v23 }
 0x751   :  { %3341 = vmatprep.subr.bf16.mxu1 %v6338_v23 }
 0x753   :  { %3603 = vmatpush1.bf16.msra.mxu0 %v6158_v53  ;;  %v7421_v53 = vld [vmem:[%s7899_s14 + $0x14] ss:$8 sps:$4 sm:$0xff]  }
 0x754   :  { %3342 = vmatpush1.bf16.msra.mxu1 %v6159_v55  ;;  %3604 = vmatprep.subr.bf16.mxu0 %v6338_v23 }
 0x755   :  { %3343 = vmatprep.subr.bf16.mxu1 %v6338_v23 }
 0x757   :  { %3605 = vmatpush1.bf16.msra.mxu0 %v6160_v56 }
 0x758   :  { %3344 = vmatpush1.bf16.msra.mxu1 %v6161_v48  ;;  %3606 = vmatprep.subr.bf16.mxu0 %v6338_v23 }
 0x759   :  { %3345 = vmatprep.subr.bf16.mxu1 %v6338_v23 }
 0x75b   :  { %3607 = vmatpush1.bf16.msra.mxu0 %v6162_v58 }
 0x75c   :  { %3346 = vmatpush1.bf16.msra.mxu1 %v6163_v59  ;;  %3608 = vmatprep.subr.bf16.mxu0 %v6338_v23 }
 0x75d   :  { %3347 = vmatprep.subr.bf16.mxu1 %v6338_v23 }
 0x75f   :  { %3609 = vmatpush1.bf16.msra.mxu0 %v6164_v60  ;;  %v7431_v60 = vld [vmem:[%s7899_s14 + $0x10] ss:$8 sps:$4 sm:$0xff]  }
 0x760   :  { %3348 = vmatpush1.bf16.msra.mxu1 %v6165_v61  ;;  %3610 = vmatprep.subr.bf16.mxu0 %v6338_v23 }
 0x761   :  { %3349 = vmatprep.subr.bf16.mxu1 %v6338_v23 }
 0x763   :  { %3611 = vmatpush1.bf16.msra.mxu0 %v6166_v62 }
 0x764   :  { %3612 = vmatprep.subr.bf16.mxu0 %v6338_v23  ;;  %3350 = vmatpush1.bf16.msra.mxu1 %v6167_v54 }
 0x765   :  { %3351 = vmatprep.subr.bf16.mxu1 %v6338_v23 }
 0x767   :  { %3613 = vmatpush1.bf16.msra.mxu0 %v6168_v63 }
 0x768   :  { %3352 = vmatpush1.bf16.msra.mxu1 %v6169_v22  ;;  %3614 = vmatprep.subr.bf16.mxu0 %v6338_v23 }
 0x769   :  { %3353 = vmatprep.subr.bf16.mxu1 %v6338_v23 }
 0x76b   :  { %3615 = vmatpush1.bf16.msra.mxu0 %v6170_v0 }
 0x76c   :  { %3354 = vmatpush1.bf16.msra.mxu1 %v6171_v1  ;;  %3616 = vmatprep.subr.bf16.mxu0 %v6338_v23 }
 0x76d   :  { %3355 = vmatprep.subr.bf16.mxu1 %v6338_v23 }
 0x76f   :  { %3617 = vmatpush1.bf16.msra.mxu0 %v6172_v2 }
 0x770   :  { %3356 = vmatpush1.bf16.msra.mxu1 %v6173_v3  ;;  %3618 = vmatprep.subr.bf16.mxu0 %v6338_v23 }
 0x771   :  { %3357 = vmatprep.subr.bf16.mxu1 %v6338_v23 }
 0x773   :  { %3619 = vmatpush1.bf16.msra.mxu0 %v6174_v21  ;;  %v6184_v21 = vld [vmem:[%s7901_s16] sm:$0xff]  }
 0x774   :  { %3358 = vmatpush1.bf16.msra.mxu1 %v6175_v4  ;;  %3620 = vmatprep.subr.bf16.mxu0 %v6338_v23  ;;  %v3650_v4 = vld [vmem:[#allocation5 + $0x50] sm:$0xff] }
 0x775   :  { %3690 = vmatprep.subr.bf16.mxu1 %v7383_v5 }
 0x777   :  { %3621 = vmatpush1.bf16.msra.mxu0 %v6176_v6  ;;  %v6185_v6 = vld [vmem:[%s7901_s16 + $0x8] sm:$0xff]  }
 0x778   :  { %3622 = vmatprep.subr.bf16.mxu0 %v6338_v23 }
 0x77b   :  { %3623 = vmatpush1.bf16.msra.mxu0 %v6180_v7  ;;  %v6186_v7 = vld [vmem:[%s7901_s16] sm:$0xff]  }
 0x77c   :  { %3955 = vmatprep.subr.bf16.mxu0 %v7383_v5 }
 0x809   :  { %v2835_v9 = vpop.f32.mrb[64].mxu1 }
 0x80a   :  { %v2836_v10 = vadd.f32 %v7397_v8, %v2835_v9  ;;  %v2837_v11 = vpop.f32.mrb[65].mxu1  ;;  %v6187_v9 = vld [vmem:[%s7901_s16 + $0x10] sm:$0xff]  }
 0x80b   :  { %v2838_v12 = vpop.f32.mrb[66].mxu1  ;;  %v6188_v11 = vld [vmem:[%s7901_s16 + $0x8] sm:$0xff]  }
 0x80c   :  { %v2839_v14 = vadd.f32 %v7397_v8, %v2838_v12  ;;  %v2840_v15 = vpop.f32.mrb[67].mxu1  ;;  %6292 = vtanh.f32 %v2836_v10  ;;  %v3915_v10 = vld [vmem:[#allocation5 + $0x58] sm:$0xff]  ;;  %v6189_v12 = vld [vmem:[%s7901_s16 + $0x18] sm:$0xff]  }
 0x80d   :  { %v6192_v15 = vld [vmem:[%s7901_s16 + $0x18] sm:$0xff]  }
 0x80e   :  { %6294 = vtanh.f32 %v2839_v14  ;;  %v6191_v14 = vld [vmem:[%s7901_s16 + $0x20] sm:$0xff]  }
 0x811   :  { %v3100_v18 = vpop.f32.mrb[56].mxu0  ;;  %v3194_v20 = vpop.f32.mrb[68].mxu1 }
 0x812   :  { %v3101_v24 = vadd.f32 %v7397_v8, %v3100_v18  ;;  %v3195_v57 = vadd.f32 %v3194_v20, %v3130_v16  ;;  %v3102_v25 = vpop.f32.mrb[57].mxu0  ;;  %v3196_v17 = vpop.f32.mrb[69].mxu1  ;;  %v6195_v18 = vld [vmem:[%s7901_s16 + $0x30] sm:$0xff]   ;;  %v6196_v20 = vld [vmem:[%s7901_s16 + $0x28] sm:$0xff]  }
 0x813   :  { %v3197_v26 = vadd.f32 %v3196_v17, %v3134_v19  ;;  %v3103_v27 = vpop.f32.mrb[58].mxu0  ;;  %v3198_v28 = vpop.f32.mrb[70].mxu1  ;;  %v6199_v25 = vld [vmem:[%s7901_s16 + $0x40] sm:$0xff]   ;;  %v6200_v17 = vld [vmem:[%s7901_s16 + $0x38] sm:$0xff]  }
 0x814   :  { %v3104_v30 = vadd.f32 %v7397_v8, %v3103_v27  ;;  %v3199_v31 = vadd.f32 %v3198_v28, %v3130_v16  ;;  %v3105_v33 = vpop.f32.mrb[59].mxu0  ;;  %v3200_v35 = vpop.f32.mrb[71].mxu1  ;;  %6296 = vtanh.f32 %v3101_v24  ;;  %v3203_v37 = vmax.f32 %v3195_v57, 0.0  ;;  %v6193_v16 = vld [vmem:[%s7901_s16 + $0x28] sm:$0xff]   ;;  %v6197_v24 = vld [vmem:[%s7901_s16 + $0x38] sm:$0xff]   ;;  %v6198_v57 = vld [vmem:[%s7901_s16 + $0x30] sm:$0xff]  }
 0x815   :  { %v3201_v36 = vadd.f32 %v3200_v35, %v3134_v19  ;;  %v3204_v42 = vmax.f32 %v3197_v26, 0.0  ;;  %v6194_v19 = vld [vmem:[%s7901_s16 + $0x20] sm:$0xff]   ;;  %v6201_v26 = vld [vmem:[%s7901_s16 + $0x48] sm:$0xff]   ;;  %v6203_v28 = vld [vmem:[%s7901_s16 + $0x50] sm:$0xff]  }
 0x816   :  { %6298 = vtanh.f32 %v3104_v30  ;;  %v3205_v38 = vmax.f32 %v3199_v31, 0.0  ;;  %v6293_v41 = vpop.eup %6292  ;;  %v6202_v27 = vld [vmem:[%s7901_s16 + $0x40] sm:$0xff]   ;;  %v6205_v30 = vld [vmem:[%s7901_s16 + $0x58] sm:$0xff]   ;;  %v6206_v31 = vld [vmem:[%s7901_s16 + $0x50] sm:$0xff]  }
 0x817   :  { %v3206_v43 = vmax.f32 %v3201_v36, 0.0  ;;  %v6207_v33 = vld [vmem:[%s7901_s16 + $0x60] sm:$0xff]   ;;  %v6208_v35 = vld [vmem:[%s7901_s16 + $0x58] sm:$0xff]   ;;  %v6209_v36 = vld [vmem:[%s7901_s16 + $0x68] sm:$0xff]  }
 0x818   :  { %v6295_v45 = vpop.eup %6294  ;;  %v3207_v46 = vpack.c.bf16 %v3205_v38, %v3203_v37  ;;  %v6210_v37 = vld [vmem:[%s7901_s16 + $0x60] sm:$0xff]   ;;  %v6211_v38 = vld [vmem:[%s7901_s16 + $0x68] sm:$0xff]  }
 0x819   :  { %v5770_v34 = vpack.c.bf16 %v6295_v45, %v6293_v41  ;;  %v3208_v32 = vpack.c.bf16 %v3206_v43, %v3204_v42  ;;  %v3459_v39 = vpop.f32.mrb[60].mxu0 }
 0x81a   :  { %v3460_v51 = vadd.f32 %v3459_v39, %v3395_v40  ;;  %v3461_v52 = vpop.f32.mrb[61].mxu0 }
 0x81b   :  { %5822 = vst [vmem:[%s7905_s18 + $0x30] sm:$0xff] %v5770_v34   ;;  %v3462_v55 = vadd.f32 %v3461_v52, %v3399_v44  ;;  %5525 = vmatprep.mubr.msk.bf16.mxu1 %vm1208_vm3, %v3208_v32  ;;  %v3463_v56 = vpop.f32.mrb[62].mxu0 }
 0x81c   :  { %v3464_v48 = vadd.f32 %v3463_v56, %v3395_v40  ;;  %3364 = vmatmul.mubr.bf16.vlgmr.msra.gmra.mrb[72].mxu1 %v3207_v46  ;;  %v3465_v58 = vpop.f32.mrb[63].mxu0  ;;  %v3468_v61 = vmax.f32 %v3460_v51, 0.0 }
 0x81d   :  { %v3466_v59 = vadd.f32 %v3465_v58, %v3399_v44  ;;  %3691 = vmatpush1.bf16.msra.mxu1 %v7416_v49  ;;  %3722 = vmatprep.mubr.bf16.mxu1 %v6338_v23  ;;  %v3469_v63 = vmax.f32 %v3462_v55, 0.0  ;;  %v3655_v44 = vld [vmem:[%s7903_s15] sm:$0x3] }
 0x81e   :  { %v3470_v62 = vmax.f32 %v3464_v48, 0.0  ;;  %3692 = vmatprep.subr.bf16.mxu1 %v7421_v53  ;;  %v6297_v54 = vpop.eup %6296  ;;  %v3660_v34 = vrot.slane %v3655_v44, %v6783_v47  ;;  %v3664_v32 = vrot.slane %v3655_v44, %v6788_v50  ;;  %v6218_v44 = vld [vmem:[%s7901_s16 + $0x10] sm:$0xff]  }
 0x81f   :  { %v3471_v22 = vmax.f32 %v3466_v59, 0.0 }
 0x820   :  { %v6299_v0 = vpop.eup %6298  ;;  %v3472_v1 = vpack.c.bf16 %v3470_v62, %v3468_v61  ;;  %v3920_v62 = vld [vmem:[%s7903_s15] sm:$0x3] }
 0x821   :  { %v5775_v2 = vpack.c.bf16 %v6299_v0, %v6297_v54  ;;  %v3473_v3 = vpack.c.bf16 %v3471_v22, %v3469_v63  ;;  %3693 = vmatpush1.bf16.msra.mxu1 %v7431_v60 }
 0x822   :  { %3861 = vmatprep.subr.bf16.mxu1 %v6338_v23 }
 0x823   :  { %5823 = vst [vmem:[%s7905_s18 + $0x70] sm:$0xff] %v5775_v2   ;;  %5550 = vmatprep.mubr.msk.bf16.mxu0 %vm1208_vm3, %v3473_v3 }
 0x824   :  { %3629 = vmatmul.mubr.bf16.vlgmr.msra.gmra.mrb[64].mxu0 %v3472_v1  ;;  %5559 = vmatmul.mubr.msk.bf16.vlgmr.msra.gmra.mrb[76].mxu1 %vm90_vm1, %v3650_v4 }
 0x825   :  { %3956 = vmatpush1.bf16.msra.mxu0 %v7416_v49  ;;  %3987 = vmatprep.mubr.bf16.mxu0 %v6338_v23 }
 0x826   :  { %3957 = vmatprep.subr.bf16.mxu0 %v7421_v53  ;;  %3862 = vmatpush1.bf16.msra.mxu1 %v6184_v21  ;;  %v3925_v21 = vrot.slane %v3920_v62, %v6783_v47 }
 0x827   :  { %3863 = vmatprep.subr.bf16.mxu1 %v6338_v23 }
 0x829   :  { %3958 = vmatpush1.bf16.msra.mxu0 %v7431_v60 }
 0x82a   :  { %3864 = vmatpush1.bf16.msra.mxu1 %v6185_v6  ;;  %4126 = vmatprep.subr.bf16.mxu0 %v6338_v23 }
 0x82b   :  { %3865 = vmatprep.subr.bf16.mxu1 %v6338_v23 }
 0x82c   :  { %5584 = vmatmul.mubr.msk.bf16.vlgmr.msra.gmra.mrb[68].mxu0 %vm90_vm1, %v3915_v10 }
 0x82d   :  { %4127 = vmatpush1.bf16.msra.mxu0 %v6186_v7 }
 0x82e   :  { %3866 = vmatpush1.bf16.msra.mxu1 %v6187_v9  ;;  %4128 = vmatprep.subr.bf16.mxu0 %v6338_v23  ;;  %v3929_v9 = vrot.slane %v3920_v62, %v6788_v50  ;;  %v6232_v62 = vld [vmem:[%s7901_s16 + $0x48] sm:$0xff]  }
 0x82f   :  { %3867 = vmatprep.subr.bf16.mxu1 %v6338_v23 }
 0x831   :  { %4129 = vmatpush1.bf16.msra.mxu0 %v6188_v11 }
 0x832   :  { %3868 = vmatpush1.bf16.msra.mxu1 %v6189_v12  ;;  %4130 = vmatprep.subr.bf16.mxu0 %v6338_v23 }
 0x833   :  { %3869 = vmatprep.subr.bf16.mxu1 %v6338_v23 }
 0x835   :  { %4131 = vmatpush1.bf16.msra.mxu0 %v6190_v13 }
 0x836   :  { %3870 = vmatpush1.bf16.msra.mxu1 %v6191_v14  ;;  %4132 = vmatprep.subr.bf16.mxu0 %v6338_v23 }
 0x837   :  { %3871 = vmatprep.subr.bf16.mxu1 %v6338_v23 }
 0x839   :  { %4133 = vmatpush1.bf16.msra.mxu0 %v6192_v15 }
 0x83a   :  { %3872 = vmatpush1.bf16.msra.mxu1 %v6193_v16  ;;  %4134 = vmatprep.subr.bf16.mxu0 %v6338_v23 }
 0x83b   :  { %3873 = vmatprep.subr.bf16.mxu1 %v6338_v23 }
 0x83d   :  { %4135 = vmatpush1.bf16.msra.mxu0 %v6194_v19 }
 0x83e   :  { %3874 = vmatpush1.bf16.msra.mxu1 %v6195_v18  ;;  %4136 = vmatprep.subr.bf16.mxu0 %v6338_v23 }
 0x83f   :  { %3875 = vmatprep.subr.bf16.mxu1 %v6338_v23 }
 0x841   :  { %4137 = vmatpush1.bf16.msra.mxu0 %v6196_v20 }
 0x842   :  { %3876 = vmatpush1.bf16.msra.mxu1 %v6197_v24  ;;  %4138 = vmatprep.subr.bf16.mxu0 %v6338_v23 }
 0x843   :  { %3877 = vmatprep.subr.bf16.mxu1 %v6338_v23 }
 0x845   :  { %4139 = vmatpush1.bf16.msra.mxu0 %v6198_v57 }
 0x846   :  { %3878 = vmatpush1.bf16.msra.mxu1 %v6199_v25  ;;  %4140 = vmatprep.subr.bf16.mxu0 %v6338_v23 }
 0x847   :  { %3879 = vmatprep.subr.bf16.mxu1 %v6338_v23 }
 0x849   :  { %4141 = vmatpush1.bf16.msra.mxu0 %v6200_v17 }
 0x84a   :  { %4142 = vmatprep.subr.bf16.mxu0 %v6338_v23  ;;  %3880 = vmatpush1.bf16.msra.mxu1 %v6201_v26 }
 0x84b   :  { %3881 = vmatprep.subr.bf16.mxu1 %v6338_v23 }
 0x84d   :  { %4143 = vmatpush1.bf16.msra.mxu0 %v6202_v27 }
 0x84e   :  { %3882 = vmatpush1.bf16.msra.mxu1 %v6203_v28  ;;  %4144 = vmatprep.subr.bf16.mxu0 %v6338_v23 }
 0x84f   :  { %3883 = vmatprep.subr.bf16.mxu1 %v6338_v23 }
 0x851   :  { %4145 = vmatpush1.bf16.msra.mxu0 %v6204_v29 }
 0x852   :  { %3884 = vmatpush1.bf16.msra.mxu1 %v6205_v30  ;;  %4146 = vmatprep.subr.bf16.mxu0 %v6338_v23 }
 0x853   :  { %3885 = vmatprep.subr.bf16.mxu1 %v6338_v23 }
 0x855   :  { %4147 = vmatpush1.bf16.msra.mxu0 %v6206_v31 }
 0x856   :  { %3886 = vmatpush1.bf16.msra.mxu1 %v6207_v33  ;;  %4148 = vmatprep.subr.bf16.mxu0 %v6338_v23 }
 0x857   :  { %3887 = vmatprep.subr.bf16.mxu1 %v6338_v23 }
 0x859   :  { %4149 = vmatpush1.bf16.msra.mxu0 %v6208_v35  ;;  %v6212_v35 = vld [vmem:[%s7901_s16] sm:$0xff]  }
 0x85a   :  { %3888 = vmatpush1.bf16.msra.mxu1 %v6209_v36  ;;  %4150 = vmatprep.subr.bf16.mxu0 %v6338_v23  ;;  %v4180_v36 = vld [vmem:[#allocation5 + $0x60] sm:$0xff] }
 0x85b   :  { %4220 = vmatprep.subr.bf16.mxu1 %v7383_v5 }
 0x85d   :  { %4151 = vmatpush1.bf16.msra.mxu0 %v6210_v37  ;;  %v6213_v37 = vld [vmem:[%s7901_s16 + $0x8] sm:$0xff]  }
 0x85e   :  { %4152 = vmatprep.subr.bf16.mxu0 %v6338_v23 }
 0x861   :  { %4153 = vmatpush1.bf16.msra.mxu0 %v6211_v38  ;;  %v6214_v38 = vld [vmem:[%s7901_s16] sm:$0xff]  }
 0x862   :  { %4485 = vmatprep.subr.bf16.mxu0 %v7383_v5 }
 0x8ef   :  { %v3365_v40 = vpop.f32.mrb[72].mxu1 }
 0x8f0   :  { %v3366_v41 = vadd.f32 %v7397_v8, %v3365_v40  ;;  %v3367_v42 = vpop.f32.mrb[73].mxu1  ;;  %v6215_v40 = vld [vmem:[%s7901_s16 + $0x10] sm:$0xff]  }
 0x8f1   :  { %v3368_v43 = vpop.f32.mrb[74].mxu1  ;;  %v6216_v42 = vld [vmem:[%s7901_s16 + $0x8] sm:$0xff]  }
 0x8f2   :  { %v3369_v45 = vadd.f32 %v7397_v8, %v3368_v43  ;;  %v3370_v46 = vpop.f32.mrb[75].mxu1  ;;  %6300 = vtanh.f32 %v3366_v41  ;;  %v4445_v41 = vld [vmem:[#allocation5 + $0x68] sm:$0xff] }
 0x8f3   :  { %v6217_v43 = vld [vmem:[%s7901_s16 + $0x18] sm:$0xff]  }
 0x8f4   :  { %6302 = vtanh.f32 %v3369_v45  ;;  %v6219_v45 = vld [vmem:[%s7901_s16 + $0x20] sm:$0xff]   ;;  %v6220_v46 = vld [vmem:[%s7901_s16 + $0x18] sm:$0xff]  }
 0x8f7   :  { %v3630_v39 = vpop.f32.mrb[64].mxu0  ;;  %v3724_v51 = vpop.f32.mrb[76].mxu1 }
 0x8f8   :  { %v3631_v52 = vadd.f32 %v7397_v8, %v3630_v39  ;;  %v3725_v55 = vadd.f32 %v3724_v51, %v3660_v34  ;;  %v3632_v56 = vpop.f32.mrb[65].mxu0  ;;  %v3726_v48 = vpop.f32.mrb[77].mxu1  ;;  %v6223_v39 = vld [vmem:[%s7901_s16 + $0x30] sm:$0xff]   ;;  %v6224_v51 = vld [vmem:[%s7901_s16 + $0x28] sm:$0xff]  }
 0x8f9   :  { %v3727_v58 = vadd.f32 %v3726_v48, %v3664_v32  ;;  %v3633_v59 = vpop.f32.mrb[66].mxu0  ;;  %v3728_v61 = vpop.f32.mrb[78].mxu1  ;;  %v6227_v56 = vld [vmem:[%s7901_s16 + $0x40] sm:$0xff]   ;;  %v6228_v48 = vld [vmem:[%s7901_s16 + $0x38] sm:$0xff]  }
 0x8fa   :  { %v3634_v54 = vadd.f32 %v7397_v8, %v3633_v59  ;;  %v3729_v63 = vadd.f32 %v3728_v61, %v3660_v34  ;;  %v3635_v22 = vpop.f32.mrb[67].mxu0  ;;  %v3730_v0 = vpop.f32.mrb[79].mxu1  ;;  %6304 = vtanh.f32 %v3631_v52  ;;  %v3733_v2 = vmax.f32 %v3725_v55, 0.0  ;;  %v6221_v34 = vld [vmem:[%s7901_s16 + $0x28] sm:$0xff]   ;;  %v6225_v52 = vld [vmem:[%s7901_s16 + $0x38] sm:$0xff]   ;;  %v6226_v55 = vld [vmem:[%s7901_s16 + $0x30] sm:$0xff]  }
 0x8fb   :  { %v3731_v1 = vadd.f32 %v3730_v0, %v3664_v32  ;;  %v3734_v6 = vmax.f32 %v3727_v58, 0.0  ;;  %v6222_v32 = vld [vmem:[%s7901_s16 + $0x20] sm:$0xff]   ;;  %v6229_v58 = vld [vmem:[%s7901_s16 + $0x48] sm:$0xff]   ;;  %v6231_v61 = vld [vmem:[%s7901_s16 + $0x50] sm:$0xff]  }
 0x8fc   :  { %6306 = vtanh.f32 %v3634_v54  ;;  %v3735_v3 = vmax.f32 %v3729_v63, 0.0  ;;  %v6301_v4 = vpop.eup %6300  ;;  %v6230_v59 = vld [vmem:[%s7901_s16 + $0x40] sm:$0xff]   ;;  %v6233_v54 = vld [vmem:[%s7901_s16 + $0x58] sm:$0xff]   ;;  %v6234_v63 = vld [vmem:[%s7901_s16 + $0x50] sm:$0xff]  }
 0x8fd   :  { %v3736_v7 = vmax.f32 %v3731_v1, 0.0  ;;  %v6235_v22 = vld [vmem:[%s7901_s16 + $0x60] sm:$0xff]   ;;  %v6236_v0 = vld [vmem:[%s7901_s16 + $0x58] sm:$0xff]   ;;  %v6237_v1 = vld [vmem:[%s7901_s16 + $0x68] sm:$0xff]  }
 0x8fe   :  { %v6303_v10 = vpop.eup %6302  ;;  %v3737_v11 = vpack.c.bf16 %v3735_v3, %v3733_v2  ;;  %v6238_v2 = vld [vmem:[%s7901_s16 + $0x60] sm:$0xff]   ;;  %v6239_v3 = vld [vmem:[%s7901_s16 + $0x68] sm:$0xff]  }
 0x8ff   :  { %v5780_v12 = vpack.c.bf16 %v6303_v10, %v6301_v4  ;;  %v3738_v13 = vpack.c.bf16 %v3736_v7, %v3734_v6  ;;  %v3989_v14 = vpop.f32.mrb[68].mxu0 }
 0x900   :  { %v3990_v15 = vadd.f32 %v3989_v14, %v3925_v21  ;;  %v3991_v16 = vpop.f32.mrb[69].mxu0 }
 0x901   :  { %5824 = vst [vmem:[%s7905_s18 + $0x8] sm:$0xff] %v5780_v12   ;;  %v3992_v19 = vadd.f32 %v3991_v16, %v3929_v9  ;;  %5575 = vmatprep.mubr.msk.bf16.mxu1 %vm1208_vm3, %v3738_v13  ;;  %v3993_v18 = vpop.f32.mrb[70].mxu0 }
 0x902   :  { %v3994_v20 = vadd.f32 %v3993_v18, %v3925_v21  ;;  %3894 = vmatmul.mubr.bf16.vlgmr.msra.gmra.mrb[80].mxu1 %v3737_v11  ;;  %v3995_v24 = vpop.f32.mrb[71].mxu0  ;;  %v3998_v25 = vmax.f32 %v3990_v15, 0.0 }
 0x903   :  { %v3996_v57 = vadd.f32 %v3995_v24, %v3929_v9  ;;  %4221 = vmatpush1.bf16.msra.mxu1 %v7416_v49  ;;  %4252 = vmatprep.mubr.bf16.mxu1 %v6338_v23  ;;  %v3999_v27 = vmax.f32 %v3992_v19, 0.0  ;;  %v4185_v9 = vld [vmem:[%s7903_s15] sm:$0x3] }
 0x904   :  { %v4000_v17 = vmax.f32 %v3994_v20, 0.0  ;;  %4222 = vmatprep.subr.bf16.mxu1 %v7421_v53  ;;  %v6305_v26 = vpop.eup %6304  ;;  %v4190_v12 = vrot.slane %v4185_v9, %v6783_v47  ;;  %v4194_v13 = vrot.slane %v4185_v9, %v6788_v50  ;;  %v6250_v9 = vld [vmem:[%s7901_s16 + $0x30] sm:$0xff]  }
 0x905   :  { %v4001_v28 = vmax.f32 %v3996_v57, 0.0 }
 0x906   :  { %v6307_v29 = vpop.eup %6306  ;;  %v4002_v30 = vpack.c.bf16 %v4000_v17, %v3998_v25  ;;  %v4450_v25 = vld [vmem:[%s7903_s15] sm:$0x3] }
 0x907   :  { %v5785_v31 = vpack.c.bf16 %v6307_v29, %v6305_v26  ;;  %v4003_v33 = vpack.c.bf16 %v4001_v28, %v3999_v27  ;;  %4223 = vmatpush1.bf16.msra.mxu1 %v7431_v60 }
 0x908   :  { %4391 = vmatprep.subr.bf16.mxu1 %v6338_v23 }
 0x909   :  { %5825 = vst [vmem:[%s7905_s18 + $0x48] sm:$0xff] %v5785_v31   ;;  %5600 = vmatprep.mubr.msk.bf16.mxu0 %vm1208_vm3, %v4003_v33  ;;  %v4455_v33 = vrot.slane %v4450_v25, %v6783_v47 }
 0x90a   :  { %4159 = vmatmul.mubr.bf16.vlgmr.msra.gmra.mrb[72].mxu0 %v4002_v30  ;;  %5609 = vmatmul.mubr.msk.bf16.vlgmr.msra.gmra.mrb[84].mxu1 %vm90_vm1, %v4180_v36 }
 0x90b   :  { %4486 = vmatpush1.bf16.msra.mxu0 %v7416_v49  ;;  %4517 = vmatprep.mubr.bf16.mxu0 %v6338_v23 }
 0x90c   :  { %4487 = vmatprep.subr.bf16.mxu0 %v7421_v53  ;;  %4392 = vmatpush1.bf16.msra.mxu1 %v6212_v35 }
 0x90d   :  { %4393 = vmatprep.subr.bf16.mxu1 %v6338_v23 }
 0x90f   :  { %4488 = vmatpush1.bf16.msra.mxu0 %v7431_v60 }
 0x910   :  { %4394 = vmatpush1.bf16.msra.mxu1 %v6213_v37  ;;  %4656 = vmatprep.subr.bf16.mxu0 %v6338_v23 }
 0x911   :  { %4395 = vmatprep.subr.bf16.mxu1 %v6338_v23 }
 0x912   :  { %5634 = vmatmul.mubr.msk.bf16.vlgmr.msra.gmra.mrb[76].mxu0 %vm90_vm1, %v4445_v41 }
 0x913   :  { %4657 = vmatpush1.bf16.msra.mxu0 %v6214_v38  ;;  %v4459_v38 = vrot.slane %v4450_v25, %v6788_v50  ;;  %v6265_v25 = vld [vmem:[%s7901_s16 + $0x58] sm:$0xff]  }
 0x914   :  { %4396 = vmatpush1.bf16.msra.mxu1 %v6215_v40  ;;  %4658 = vmatprep.subr.bf16.mxu0 %v6338_v23 }
 0x915   :  { %4397 = vmatprep.subr.bf16.mxu1 %v6338_v23 }
 0x917   :  { %4659 = vmatpush1.bf16.msra.mxu0 %v6216_v42 }
 0x918   :  { %4398 = vmatpush1.bf16.msra.mxu1 %v6217_v43  ;;  %4660 = vmatprep.subr.bf16.mxu0 %v6338_v23 }
 0x919   :  { %4399 = vmatprep.subr.bf16.mxu1 %v6338_v23 }
 0x91b   :  { %4661 = vmatpush1.bf16.msra.mxu0 %v6218_v44 }
 0x91c   :  { %4400 = vmatpush1.bf16.msra.mxu1 %v6219_v45  ;;  %4662 = vmatprep.subr.bf16.mxu0 %v6338_v23 }
 0x91d   :  { %4401 = vmatprep.subr.bf16.mxu1 %v6338_v23 }
 0x91f   :  { %4663 = vmatpush1.bf16.msra.mxu0 %v6220_v46 }
 0x920   :  { %4402 = vmatpush1.bf16.msra.mxu1 %v6221_v34  ;;  %4664 = vmatprep.subr.bf16.mxu0 %v6338_v23 }
 0x921   :  { %4403 = vmatprep.subr.bf16.mxu1 %v6338_v23 }
 0x923   :  { %4665 = vmatpush1.bf16.msra.mxu0 %v6222_v32 }
 0x924   :  { %4404 = vmatpush1.bf16.msra.mxu1 %v6223_v39  ;;  %4666 = vmatprep.subr.bf16.mxu0 %v6338_v23 }
 0x925   :  { %4405 = vmatprep.subr.bf16.mxu1 %v6338_v23 }
 0x927   :  { %4667 = vmatpush1.bf16.msra.mxu0 %v6224_v51 }
 0x928   :  { %4406 = vmatpush1.bf16.msra.mxu1 %v6225_v52  ;;  %4668 = vmatprep.subr.bf16.mxu0 %v6338_v23 }
 0x929   :  { %4407 = vmatprep.subr.bf16.mxu1 %v6338_v23 }
 0x92b   :  { %4669 = vmatpush1.bf16.msra.mxu0 %v6226_v55 }
 0x92c   :  { %4408 = vmatpush1.bf16.msra.mxu1 %v6227_v56  ;;  %4670 = vmatprep.subr.bf16.mxu0 %v6338_v23 }
 0x92d   :  { %4409 = vmatprep.subr.bf16.mxu1 %v6338_v23 }
 0x92f   :  { %4671 = vmatpush1.bf16.msra.mxu0 %v6228_v48 }
 0x930   :  { %4672 = vmatprep.subr.bf16.mxu0 %v6338_v23  ;;  %4410 = vmatpush1.bf16.msra.mxu1 %v6229_v58 }
 0x931   :  { %4411 = vmatprep.subr.bf16.mxu1 %v6338_v23 }
 0x933   :  { %4673 = vmatpush1.bf16.msra.mxu0 %v6230_v59 }
 0x934   :  { %4412 = vmatpush1.bf16.msra.mxu1 %v6231_v61  ;;  %4674 = vmatprep.subr.bf16.mxu0 %v6338_v23 }
 0x935   :  { %4413 = vmatprep.subr.bf16.mxu1 %v6338_v23 }
 0x937   :  { %4675 = vmatpush1.bf16.msra.mxu0 %v6232_v62 }
 0x938   :  { %4414 = vmatpush1.bf16.msra.mxu1 %v6233_v54  ;;  %4676 = vmatprep.subr.bf16.mxu0 %v6338_v23 }
 0x939   :  { %4415 = vmatprep.subr.bf16.mxu1 %v6338_v23 }
 0x93b   :  { %4677 = vmatpush1.bf16.msra.mxu0 %v6234_v63  ;;  %v6240_v63 = vld [vmem:[%s7901_s16] sm:$0xff]  }
 0x93c   :  { %4416 = vmatpush1.bf16.msra.mxu1 %v6235_v22  ;;  %4678 = vmatprep.subr.bf16.mxu0 %v6338_v23  ;;  %v4710_v22 = vld [vmem:[#allocation5 + $0x70] sm:$0xff] }
 0x93d   :  { %4417 = vmatprep.subr.bf16.mxu1 %v6338_v23 }
 0x93f   :  { %4679 = vmatpush1.bf16.msra.mxu0 %v6236_v0  ;;  %v6241_v0 = vld [vmem:[%s7901_s16 + $0x8] sm:$0xff]  }
 0x940   :  { %4418 = vmatpush1.bf16.msra.mxu1 %v6237_v1  ;;  %4680 = vmatprep.subr.bf16.mxu0 %v6338_v23  ;;  %v6243_v1 = vld [vmem:[%s7901_s16] sm:$0xff]  }
 0x941   :  { %4750 = vmatprep.subr.bf16.mxu1 %v7383_v5 }
 0x943   :  { %4681 = vmatpush1.bf16.msra.mxu0 %v6238_v2  ;;  %v6244_v2 = vld [vmem:[%s7901_s16 + $0x18] sm:$0xff]  }
 0x944   :  { %4682 = vmatprep.subr.bf16.mxu0 %v6338_v23 }
 0x947   :  { %4683 = vmatpush1.bf16.msra.mxu0 %v6239_v3  ;;  %v6247_v3 = vld [vmem:[%s7901_s16 + $0x10] sm:$0xff]  }
 0x948   :  { %5015 = vmatprep.subr.bf16.mxu0 %v7383_v5 }
 0x9d5   :  { %v3895_v21 = vpop.f32.mrb[80].mxu1 }
 0x9d6   :  { %v3896_v4 = vadd.f32 %v7397_v8, %v3895_v21  ;;  %v3897_v6 = vpop.f32.mrb[81].mxu1  ;;  %v6246_v21 = vld [vmem:[%s7901_s16 + $0x20] sm:$0xff]  }
 0x9d7   :  { %v3898_v7 = vpop.f32.mrb[82].mxu1  ;;  %v6248_v6 = vld [vmem:[%s7901_s16 + $0x28] sm:$0xff]  }
 0x9d8   :  { %v3899_v10 = vadd.f32 %v7397_v8, %v3898_v7  ;;  %v3900_v11 = vpop.f32.mrb[83].mxu1  ;;  %6308 = vtanh.f32 %v3896_v4  ;;  %v6249_v4 = vld [vmem:[%s7901_s16 + $0x18] sm:$0xff]   ;;  %v6251_v7 = vld [vmem:[%s7901_s16 + $0x20] sm:$0xff]  }
 0x9d9   :  { %v6252_v11 = vld [vmem:[%s7901_s16 + $0x38] sm:$0xff]  }
 0x9da   :  { %6310 = vtanh.f32 %v3899_v10  ;;  %v6253_v10 = vld [vmem:[%s7901_s16 + $0x28] sm:$0xff]  }
 0x9dd   :  { %v4160_v14 = vpop.f32.mrb[72].mxu0  ;;  %v4254_v5 = vpop.f32.mrb[84].mxu1 }
 0x9de   :  { %v4161_v15 = vadd.f32 %v7397_v8, %v4160_v14  ;;  %v4255_v16 = vadd.f32 %v4254_v5, %v4190_v12  ;;  %v4162_v19 = vpop.f32.mrb[73].mxu0  ;;  %v4256_v18 = vpop.f32.mrb[85].mxu1  ;;  %v6256_v14 = vld [vmem:[%s7901_s16 + $0x48] sm:$0xff]   ;;  %v6257_v5 = vld [vmem:[%s7901_s16 + $0x38] sm:$0xff]  }
 0x9df   :  { %v4257_v20 = vadd.f32 %v4256_v18, %v4194_v13  ;;  %v4163_v24 = vpop.f32.mrb[74].mxu0  ;;  %v4258_v57 = vpop.f32.mrb[86].mxu1  ;;  %v6260_v19 = vld [vmem:[%s7901_s16 + $0x58] sm:$0xff]   ;;  %v6261_v18 = vld [vmem:[%s7901_s16 + $0x48] sm:$0xff]  }
 0x9e0   :  { %v4164_v17 = vadd.f32 %v7397_v8, %v4163_v24  ;;  %v4259_v26 = vadd.f32 %v4258_v57, %v4190_v12  ;;  %v4165_v27 = vpop.f32.mrb[75].mxu0  ;;  %v4260_v28 = vpop.f32.mrb[87].mxu1  ;;  %6312 = vtanh.f32 %v4161_v15  ;;  %v4263_v30 = vmax.f32 %v4255_v16, 0.0  ;;  %v6255_v12 = vld [vmem:[%s7901_s16 + $0x30] sm:$0xff]   ;;  %v6259_v16 = vld [vmem:[%s7901_s16 + $0x40] sm:$0xff]   ;;  %v6264_v57 = vld [vmem:[%s7901_s16 + $0x68] sm:$0xff]  }
 0x9e1   :  { %v4261_v29 = vadd.f32 %v4260_v28, %v4194_v13  ;;  %v4264_v36 = vmax.f32 %v4257_v20, 0.0  ;;  %v6254_v13 = vld [vmem:[%s7901_s16 + $0x40] sm:$0xff]   ;;  %v6258_v15 = vld [vmem:[%s7901_s16 + $0x50] sm:$0xff]  }
 0x9e2   :  { %6314 = vtanh.f32 %v4164_v17  ;;  %v4265_v31 = vmax.f32 %v4259_v26, 0.0  ;;  %v6309_v35 = vpop.eup %6308  ;;  %v6262_v20 = vld [vmem:[%s7901_s16 + $0x60] sm:$0xff]   ;;  %v6263_v24 = vld [vmem:[%s7901_s16 + $0x50] sm:$0xff]   ;;  %v6267_v26 = vld [vmem:[%s7901_s16 + $0x68] sm:$0xff]  }
 0x9e3   :  { %v4266_v37 = vmax.f32 %v4261_v29, 0.0  ;;  %v6266_v17 = vld [vmem:[%s7901_s16 + $0x60] sm:$0xff]  }
 0x9e4   :  { %v6311_v40 = vpop.eup %6310  ;;  %v4267_v41 = vpack.c.bf16 %v4265_v31, %v4263_v30  ;;  %v7853_v27 = vld [vmem:[%s7904_s17] ss:$0 sm:$0xff] }
 0x9e5   :  { %v5790_v42 = vpack.c.bf16 %v6311_v40, %v6309_v35  ;;  %v4268_v43 = vpack.c.bf16 %v4266_v37, %v4264_v36  ;;  %v4519_v8 = vpop.f32.mrb[76].mxu0 }
 0x9e6   :  { %v4520_v44 = vadd.f32 %v4519_v8, %v4455_v33  ;;  %v4521_v45 = vpop.f32.mrb[77].mxu0 }
 0x9e7   :  { %5826 = vst [vmem:[%s7905_s18 + $0x28] sm:$0xff] %v5790_v42   ;;  %v4522_v46 = vadd.f32 %v4521_v45, %v4459_v38  ;;  %5625 = vmatprep.mubr.msk.bf16.mxu1 %vm1208_vm3, %v4268_v43  ;;  %v4523_v34 = vpop.f32.mrb[78].mxu0 }
 0x9e8   :  { %v4524_v32 = vadd.f32 %v4523_v34, %v4455_v33  ;;  %4424 = vmatmul.mubr.bf16.vlgmr.msra.gmra.mrb[88].mxu1 %v4267_v41  ;;  %v4525_v39 = vpop.f32.mrb[79].mxu0  ;;  %v4528_v52 = vmax.f32 %v4520_v44, 0.0  ;;  %v4715_v33 = vld [vmem:[%s7903_s15] sm:$0x3] }
 0x9e9   :  { %v4526_v51 = vadd.f32 %v4525_v39, %v4459_v38  ;;  %4751 = vmatpush1.bf16.msra.mxu1 %v7416_v49  ;;  %4782 = vmatprep.mubr.bf16.mxu1 %v6338_v23  ;;  %v4529_v48 = vmax.f32 %v4522_v46, 0.0  ;;  %v4724_v37 = vrot.slane %v4715_v33, %v6788_v50  ;;  %v4980_v34 = vld [vmem:[%s7903_s15] sm:$0x3] }
 0x9ea   :  { %v4530_v55 = vmax.f32 %v4524_v32, 0.0  ;;  %4752 = vmatprep.subr.bf16.mxu1 %v7421_v53  ;;  %v6313_v56 = vpop.eup %6312 }
 0x9eb   :  { %v4531_v58 = vmax.f32 %v4526_v51, 0.0 }
 0x9ec   :  { %v6315_v59 = vpop.eup %6314  ;;  %v4532_v61 = vpack.c.bf16 %v4530_v55, %v4528_v52 }
 0x9ed   :  { %v5795_v62 = vpack.c.bf16 %v6315_v59, %v6313_v56  ;;  %v4533_v54 = vpack.c.bf16 %v4531_v58, %v4529_v48  ;;  %4753 = vmatpush1.bf16.msra.mxu1 %v7431_v60  ;;  %v4985_v58 = vrot.slane %v4980_v34, %v6783_v47 }
 0x9ee   :  { %4921 = vmatprep.subr.bf16.mxu1 %v6338_v23 }
 0x9ef   :  { %5827 = vst [vmem:[%s7905_s18 + $0x68] sm:$0xff] %v5795_v62   ;;  %5650 = vmatprep.mubr.msk.bf16.mxu0 %vm1208_vm3, %v4533_v54  ;;  %v4989_v54 = vrot.slane %v4980_v34, %v6788_v50 }
 0x9f0   :  { %4689 = vmatmul.mubr.bf16.vlgmr.msra.gmra.mrb[80].mxu0 %v4532_v61  ;;  %5659 = vmatmul.mubr.msk.bf16.vlgmr.msra.gmra.mrb[92].mxu1 %vm90_vm1, %v4710_v22 }
 0x9f1   :  { %5016 = vmatpush1.bf16.msra.mxu0 %v7416_v49  ;;  %5047 = vmatprep.mubr.bf16.mxu0 %v6338_v23  ;;  %v6242_v49 = vld [vmem:[%s7901_s16 + $0x10] sm:$0xff]  }
 0x9f2   :  { %5017 = vmatprep.subr.bf16.mxu0 %v7421_v53  ;;  %4922 = vmatpush1.bf16.msra.mxu1 %v6240_v63  ;;  %v4975_v53 = vld [vmem:[#allocation5 + $0x78] sm:$0xff] }
 0x9f3   :  { %4923 = vmatprep.subr.bf16.mxu1 %v6338_v23 }
 0x9f5   :  { %5018 = vmatpush1.bf16.msra.mxu0 %v7431_v60  ;;  %v6245_v60 = vld [vmem:[%s7901_s16 + $0x8] sm:$0xff]  }
 0x9f6   :  { %4924 = vmatpush1.bf16.msra.mxu1 %v6241_v0  ;;  %5186 = vmatprep.subr.bf16.mxu0 %v6338_v23 }
 0x9f7   :  { %4925 = vmatprep.subr.bf16.mxu1 %v6338_v23 }
 0x9f8   :  { %5684 = vmatmul.mubr.msk.bf16.vlgmr.msra.gmra.mrb[84].mxu0 %vm90_vm1, %v4975_v53 }
 0x9f9   :  { %5187 = vmatpush1.bf16.msra.mxu0 %v6243_v1 }
 0x9fa   :  { %4926 = vmatpush1.bf16.msra.mxu1 %v6242_v49  ;;  %5188 = vmatprep.subr.bf16.mxu0 %v6338_v23 }
 0x9fb   :  { %4927 = vmatprep.subr.bf16.mxu1 %v6338_v23 }
 0x9fd   :  { %5189 = vmatpush1.bf16.msra.mxu0 %v6245_v60 }
 0x9fe   :  { %4928 = vmatpush1.bf16.msra.mxu1 %v6244_v2  ;;  %5190 = vmatprep.subr.bf16.mxu0 %v6338_v23 }
 0x9ff   :  { %4929 = vmatprep.subr.bf16.mxu1 %v6338_v23 }
 0xa01   :  { %5191 = vmatpush1.bf16.msra.mxu0 %v6247_v3 }
 0xa02   :  { %4930 = vmatpush1.bf16.msra.mxu1 %v6246_v21  ;;  %5192 = vmatprep.subr.bf16.mxu0 %v6338_v23 }
 0xa03   :  { %4931 = vmatprep.subr.bf16.mxu1 %v6338_v23 }
 0xa05   :  { %5193 = vmatpush1.bf16.msra.mxu0 %v6249_v4 }
 0xa06   :  { %4932 = vmatpush1.bf16.msra.mxu1 %v6248_v6  ;;  %5194 = vmatprep.subr.bf16.mxu0 %v6338_v23 }
 0xa07   :  { %4933 = vmatprep.subr.bf16.mxu1 %v6338_v23 }
 0xa09   :  { %5195 = vmatpush1.bf16.msra.mxu0 %v6251_v7 }
 0xa0a   :  { %4934 = vmatpush1.bf16.msra.mxu1 %v6250_v9  ;;  %5196 = vmatprep.subr.bf16.mxu0 %v6338_v23 }
 0xa0b   :  { %4935 = vmatprep.subr.bf16.mxu1 %v6338_v23 }
 0xa0d   :  { %5197 = vmatpush1.bf16.msra.mxu0 %v6253_v10 }
 0xa0e   :  { %4936 = vmatpush1.bf16.msra.mxu1 %v6252_v11  ;;  %5198 = vmatprep.subr.bf16.mxu0 %v6338_v23 }
 0xa0f   :  { %4937 = vmatprep.subr.bf16.mxu1 %v6338_v23 }
 0xa11   :  { %5199 = vmatpush1.bf16.msra.mxu0 %v6255_v12 }
 0xa12   :  { %4938 = vmatpush1.bf16.msra.mxu1 %v6254_v13  ;;  %5200 = vmatprep.subr.bf16.mxu0 %v6338_v23 }
 0xa13   :  { %4939 = vmatprep.subr.bf16.mxu1 %v6338_v23 }
 0xa15   :  { %5201 = vmatpush1.bf16.msra.mxu0 %v6257_v5 }
 0xa16   :  { %4940 = vmatpush1.bf16.msra.mxu1 %v6256_v14  ;;  %5202 = vmatprep.subr.bf16.mxu0 %v6338_v23 }
 0xa17   :  { %4941 = vmatprep.subr.bf16.mxu1 %v6338_v23 }
 0xa19   :  { %5203 = vmatpush1.bf16.msra.mxu0 %v6259_v16 }
 0xa1a   :  { %4942 = vmatpush1.bf16.msra.mxu1 %v6258_v15  ;;  %5204 = vmatprep.subr.bf16.mxu0 %v6338_v23 }
 0xa1b   :  { %4943 = vmatprep.subr.bf16.mxu1 %v6338_v23 }
 0xa1d   :  { %5205 = vmatpush1.bf16.msra.mxu0 %v6261_v18 }
 0xa1e   :  { %4944 = vmatpush1.bf16.msra.mxu1 %v6260_v19  ;;  %5206 = vmatprep.subr.bf16.mxu0 %v6338_v23 }
 0xa1f   :  { %4945 = vmatprep.subr.bf16.mxu1 %v6338_v23 }
 0xa21   :  { %5207 = vmatpush1.bf16.msra.mxu0 %v6263_v24 }
 0xa22   :  { %4946 = vmatpush1.bf16.msra.mxu1 %v6262_v20  ;;  %5208 = vmatprep.subr.bf16.mxu0 %v6338_v23 }
 0xa23   :  { %4947 = vmatprep.subr.bf16.mxu1 %v6338_v23 }
 0xa25   :  { %5209 = vmatpush1.bf16.msra.mxu0 %v6265_v25 }
 0xa26   :  { %4948 = vmatpush1.bf16.msra.mxu1 %v6264_v57  ;;  %5210 = vmatprep.subr.bf16.mxu0 %v6338_v23 }
 0xa29   :  { %5211 = vmatpush1.bf16.msra.mxu0 %v6266_v17 }
 0xa2a   :  { %5212 = vmatprep.subr.bf16.mxu0 %v6338_v23  ;;  %v4720_v23 = vrot.slane %v4715_v33, %v6783_v47 }
 0xa2d   :  { %5213 = vmatpush1.bf16.msra.mxu0 %v6267_v26 }
 0xabb   :  { %v4425_v28 = vpop.f32.mrb[88].mxu1 }
 0xabc   :  { %v4426_v29 = vadd.f32 %v7853_v27, %v4425_v28  ;;  %v4427_v30 = vpop.f32.mrb[89].mxu1 }
 0xabd   :  { %v4428_v31 = vpop.f32.mrb[90].mxu1 }
 0xabe   :  { %v4429_v35 = vadd.f32 %v7853_v27, %v4428_v31  ;;  %v4430_v36 = vpop.f32.mrb[91].mxu1  ;;  %6316 = vtanh.f32 %v4426_v29 }
 0xac0   :  { %6318 = vtanh.f32 %v4429_v35 }
 0xac3   :  { %v4690_v38 = vpop.f32.mrb[80].mxu0  ;;  %v4784_v40 = vpop.f32.mrb[92].mxu1 }
 0xac4   :  { %v4691_v41 = vadd.f32 %v7853_v27, %v4690_v38  ;;  %v4785_v42 = vadd.f32 %v4784_v40, %v4720_v23  ;;  %v4692_v43 = vpop.f32.mrb[81].mxu0  ;;  %v4786_v8 = vpop.f32.mrb[93].mxu1 }
 0xac5   :  { %v4787_v44 = vadd.f32 %v4786_v8, %v4724_v37  ;;  %v4693_v45 = vpop.f32.mrb[82].mxu0  ;;  %v4788_v46 = vpop.f32.mrb[94].mxu1 }
 0xac6   :  { %v4694_v32 = vadd.f32 %v7853_v27, %v4693_v45  ;;  %v4789_v39 = vadd.f32 %v4788_v46, %v4720_v23  ;;  %v4695_v51 = vpop.f32.mrb[83].mxu0  ;;  %v4790_v52 = vpop.f32.mrb[95].mxu1  ;;  %6320 = vtanh.f32 %v4691_v41  ;;  %v4793_v56 = vmax.f32 %v4785_v42, 0.0 }
 0xac7   :  { %v4791_v55 = vadd.f32 %v4790_v52, %v4724_v37  ;;  %v4794_v61 = vmax.f32 %v4787_v44, 0.0 }
 0xac8   :  { %6322 = vtanh.f32 %v4694_v32  ;;  %v4795_v48 = vmax.f32 %v4789_v39, 0.0  ;;  %v6317_v59 = vpop.eup %6316 }
 0xac9   :  { %v4796_v62 = vmax.f32 %v4791_v55, 0.0 }
 0xaca   :  { %v6319_v63 = vpop.eup %6318  ;;  %v4797_v22 = vpack.c.bf16 %v4795_v48, %v4793_v56 }
 0xacb   :  { %v5800_v0 = vpack.c.bf16 %v6319_v63, %v6317_v59  ;;  %v4798_v1 = vpack.c.bf16 %v4796_v62, %v4794_v61  ;;  %v5049_v49 = vpop.f32.mrb[84].mxu0 }
 0xacc   :  { %v5050_v53 = vadd.f32 %v5049_v49, %v4985_v58  ;;  %v5051_v60 = vpop.f32.mrb[85].mxu0 }
 0xacd   :  { %5828 = vst [vmem:[%s7905_s18 + $0x18] sm:$0xff] %v5800_v0   ;;  %v5052_v2 = vadd.f32 %v5051_v60, %v4989_v54  ;;  %5675 = vmatprep.mubr.msk.bf16.mxu1 %vm1208_vm3, %v4798_v1  ;;  %v5053_v47 = vpop.f32.mrb[86].mxu0 }
 0xace   :  { %v5054_v3 = vadd.f32 %v5053_v47, %v4985_v58  ;;  %4954 = vmatmul.mubr.bf16.vlgmr.msra.gmra.mrb[96].mxu1 %v4797_v22  ;;  %v5055_v21 = vpop.f32.mrb[87].mxu0  ;;  %v5058_v50 = vmax.f32 %v5050_v53, 0.0 }
 0xacf   :  { %v5056_v4 = vadd.f32 %v5055_v21, %v4989_v54  ;;  %v5059_v9 = vmax.f32 %v5052_v2, 0.0 }
 0xad0   :  { %v5060_v6 = vmax.f32 %v5054_v3, 0.0  ;;  %v6321_v7 = vpop.eup %6320 }
 0xad1   :  { %v5061_v10 = vmax.f32 %v5056_v4, 0.0 }
 0xad2   :  { %v6323_v11 = vpop.eup %6322  ;;  %v5062_v12 = vpack.c.bf16 %v5060_v6, %v5058_v50 }
 0xad3   :  { %v5805_v13 = vpack.c.bf16 %v6323_v11, %v6321_v7  ;;  %v5063_v14 = vpack.c.bf16 %v5061_v10, %v5059_v9 }
 0xad5   :  { %5829 = vst [vmem:[%s7905_s18 + $0x58] sm:$0xff] %v5805_v13   ;;  %5700 = vmatprep.mubr.msk.bf16.mxu0 %vm1208_vm3, %v5063_v14 }
 0xad6   :  { %5219 = vmatmul.mubr.bf16.vlgmr.msra.gmra.mrb[88].mxu0 %v5062_v12 }
 0xba1   :  { %v4955_v5 = vpop.f32.mrb[96].mxu1 }
 0xba2   :  { %v4956_v15 = vadd.f32 %v7853_v27, %v4955_v5  ;;  %v4957_v16 = vpop.f32.mrb[97].mxu1 }
 0xba3   :  { %v4958_v19 = vpop.f32.mrb[98].mxu1 }
 0xba4   :  { %v4959_v18 = vadd.f32 %v7853_v27, %v4958_v19  ;;  %v4960_v20 = vpop.f32.mrb[99].mxu1  ;;  %6324 = vtanh.f32 %v4956_v15 }
 0xba6   :  { %6326 = vtanh.f32 %v4959_v18 }
 0xba9   :  { %v5220_v24 = vpop.f32.mrb[88].mxu0 }
 0xbaa   :  { %v5221_v57 = vadd.f32 %v7853_v27, %v5220_v24  ;;  %v5222_v25 = vpop.f32.mrb[89].mxu0 }
 0xbab   :  { %v5223_v17 = vpop.f32.mrb[90].mxu0 }
 0xbac   :  { %v5224_v26 = vadd.f32 %v7853_v27, %v5223_v17  ;;  %v5225_v28 = vpop.f32.mrb[91].mxu0  ;;  %6328 = vtanh.f32 %v5221_v57 }
 0xbae   :  { %6330 = vtanh.f32 %v5224_v26  ;;  %v6325_v29 = vpop.eup %6324 }
 0xbb0   :  { %v6327_v30 = vpop.eup %6326 }
 0xbb1   :  { %v5810_v31 = vpack.c.bf16 %v6327_v30, %v6325_v29 }
 0xbb3   :  { %5830 = vst [vmem:[%s7905_s18 + $0x38] sm:$0xff] %v5810_v31  }
 0xbb6   :  { %v6329_v33 = vpop.eup %6328 }
 0xbb8   :  { %v6331_v35 = vpop.eup %6330 }
 0xbb9   :  { %v5815_v36 = vpack.c.bf16 %v6331_v35, %v6329_v33 }
 0xbbb   :  { %5831 = vst [vmem:[%s7905_s18 + $0x78] sm:$0xff] %v5815_v36  }

</bundles_post_ra>
